<compile_context>
chip_gen: v7x
topology: tpu7x:2x2x1
jax: 0.10.0
libtpu: 0.0.40
codegen_flags: <defaults>
</compile_context>

<pallas_src>
import functools

import jax
import jax.numpy as jnp
from jax.experimental import pallas as pl
from jax.experimental.pallas import tpu as pltpu

LANES = 128  # pad matmul N dims to this for lane-dense, MXU-aligned tiles


# ------------------------------ small helpers ------------------------------

def _round_up(x, m):
    return ((x + m - 1) // m) * m


def _pad_axis(a, axis, new_size):
    pad = new_size - a.shape[axis]
    if pad <= 0:
        return a
    widths = [(0, 0)] * a.ndim
    widths[axis] = (0, pad)
    return jnp.pad(a, widths)


def im2col_nhwc(x, k, stride):
    """x: (B, H, W, C) -> patches (B, Ho, Wo, k*k*C) in (kh, kw, c) order."""
    B, H, W, C = x.shape
    Ho = (H - k) // stride + 1
    Wo = (W - k) // stride + 1
    cols = []
    for kh in range(k):
        for kw in range(k):
            cols.append(x[:, kh:kh + stride * Ho:stride,
                          kw:kw + stride * Wo:stride, :])
    return jnp.concatenate(cols, axis=-1), Ho, Wo


def _conv1_blockdiag(w, n_pos, kp, np_):
    """conv1 OIHW weight -> block-diagonal (n_pos*75, n_pos*10) matrix, padded.

    Block s maps patch elements of pooled position s ((kh,kw,cin) order) to
    that position's 10 output channels, so the conv1 matmul output is already
    laid out as (sample row, spatial*channel lane)."""
    Cout, Cin, kh, kw = w.shape
    cols = jnp.transpose(w, (2, 3, 1, 0)).reshape(kh * kw * Cin, Cout)  # (75, 10)
    bd = jnp.kron(jnp.eye(n_pos, dtype=cols.dtype), cols)               # (3675, 490)
    bd = _pad_axis(_pad_axis(bd, 0, kp), 1, np_)
    return bd.astype(jnp.bfloat16)


def _conv2_fold_weights(w, side, np_):
    """Fold conv2 (OIHW, k=5, stride=2 on a side x side map) into 4 dense
    (side*side*Cin -> Cout) matrices, one per conv2 output position (= per
    2x2 pool quadrant), acting on the flattened (spatial*channel) activation."""
    Cout, Cin, K, _ = w.shape
    mats = []
    for i in range(2):
        for j in range(2):
            wf = jnp.zeros((side * side * Cin, Cout), jnp.float32)
            for r in range(K):
                for c in range(K):
                    s = (2 * i + r) * side + (2 * j + c)
                    wf = wf.at[s * Cin:(s + 1) * Cin, :].set(w[:, :, r, c].T)
            mats.append(wf)
    m = jnp.stack(mats, axis=0)                                  # (4, 490, 20)
    m = _pad_axis(_pad_axis(m, 1, np_), 2, LANES)
    return m.astype(jnp.bfloat16)


# ------------------------------ fused Pallas kernel -------------------------

def _fused_forward_kernel(p_ref, w1_ref, b1_ref, w2_ref, b2_ref,
                          wf1_ref, bf1_ref, wf2_ref, bf2_ref, o_ref,
                          *, n_classes):
    """Whole CIFAR_ConvNet forward for one batch tile.

    p_ref  : (4, TB, KP)   bf16  conv1 im2col patches, one per pool quadrant
    w1_ref : (KP, NP)      bf16  conv1 block-diagonal weight
    b1_ref : (1, NP)       f32   conv1 bias tiled over the 49 pooled positions
    w2_ref : (4, NP, 128)  bf16  conv2 folded weights (one per output position)
    b2_ref : (1, 128)      f32   conv2 bias
    wf1/wf2: (128, 128)    bf16  fc1 / fc2 weights (transposed, padded)
    bf1/bf2: (1, 128)      f32   fc1 / fc2 biases
    o_ref  : (TB, 128)     f32   log-probs (real classes in lanes 0..n_classes)
    """
    nq, tb, kp = p_ref.shape

    # conv1: one merged MXU push over the 4 pool quadrants (leading-dim merge
    # of the patch block is a free, tile-aligned reshape), then VPU maxima
    # over the quadrant sub-blocks == 2x2 maxpool, + bias, + ReLU.
    lhs = p_ref[...].reshape(nq * tb, kp)
    pm = jnp.dot(lhs, w1_ref[...], preferred_element_type=jnp.float32)
    m = jnp.maximum(jnp.maximum(pm[0 * tb:1 * tb], pm[1 * tb:2 * tb]),
                    jnp.maximum(pm[2 * tb:3 * tb], pm[3 * tb:4 * tb]))
    act = jnp.maximum(m + b1_ref[...], 0.0).astype(jnp.bfloat16)   # (TB, NP), real 490

    # conv2 (folded to dense per-position weights) + 2x2 maxpool + bias + ReLU.
    h = jnp.dot(act, w2_ref[0], preferred_element_type=jnp.float32)
    for q in range(1, 4):
        h = jnp.maximum(h, jnp.dot(act, w2_ref[q],
                                   preferred_element_type=jnp.float32))
    h = jnp.maximum(h + b2_ref[...], 0.0).astype(jnp.bfloat16)     # (TB, 128), real 20

    # fc1 + ReLU, fc2.
    z = jnp.maximum(jnp.dot(h, wf1_ref[...], preferred_element_type=jnp.float32)
                    + bf1_ref[...], 0.0).astype(jnp.bfloat16)      # real 50
    logits = jnp.dot(z, wf2_ref[...],
                     preferred_element_type=jnp.float32) + bf2_ref[...]

    # log_softmax over the real classes only (padded lanes masked out).
    lane = jax.lax.broadcasted_iota(jnp.int32, logits.shape, 1)
    valid = lane < n_classes
    masked = jnp.where(valid, logits, -jnp.inf)
    mx = jnp.max(masked, axis=-1, keepdims=True)
    e = jnp.where(valid, jnp.exp(logits - mx), 0.0)
    lse = jnp.log(jnp.sum(e, axis=-1, keepdims=True))
    o_ref[...] = jnp.where(valid, logits - mx - lse, 0.0)


# ------------------------------ forward wrapper ------------------------------

def cifar_forward_pallas(params, x, *, tb=None):
    B = x.shape[0]
    x = x.reshape(B, 3, 32, 32).astype(jnp.float32)
    # Single NCHW->NHWC relayout, then bf16 so all im2col/pad glue is half-width.
    x = jnp.transpose(x, (0, 2, 3, 1)).astype(jnp.bfloat16)

    # conv1 im2col per pool quadrant, flattened (pooled-position, patch) per sample.
    k1 = params["conv1_w"].shape[2]
    patches, Ho, Wo = im2col_nhwc(x, k1, stride=2)          # (B, 14, 14, 75)
    side = Ho // 2                                           # 7
    n_pos = side * (Wo // 2)                                 # 49 pooled positions
    kcol = patches.shape[-1]                                 # 75
    c1 = params["conv1_w"].shape[0]                          # 10
    KP = _round_up(n_pos * kcol, LANES)                      # 3712
    NP = _round_up(n_pos * c1, LANES)                        # 512

    quads = [patches[:, a::2, b::2, :].reshape(B, n_pos * kcol)
             for a in range(2) for b in range(2)]
    p = jnp.stack(quads, axis=0)                             # (4, B, 3675) bf16
    p = _pad_axis(p, 2, KP)

    if tb is None:
        tb = max(16, min(128, _round_up(B, 16)))             # bf16 sublane packing
    Bp = _round_up(B, tb)
    p = _pad_axis(p, 1, Bp)

    # Trace-time weight preparation (tiny, fuses into the jitted wrapper).
    w1bd = _conv1_blockdiag(params["conv1_w"], n_pos, KP, NP)
    b1t = _pad_axis(jnp.tile(params["conv1_b"], n_pos).reshape(1, -1),
                    1, NP).astype(jnp.float32)
    w2f = _conv2_fold_weights(params["conv2_w"], side, NP)
    b2 = _pad_axis(params["conv2_b"].reshape(1, -1), 1, LANES).astype(jnp.float32)
    wf1 = _pad_axis(_pad_axis(params["fc1_w"].T, 0, LANES), 1, LANES).astype(jnp.bfloat16)
    bf1 = _pad_axis(params["fc1_b"].reshape(1, -1), 1, LANES).astype(jnp.float32)
    wf2 = _pad_axis(_pad_axis(params["fc2_w"].T, 0, LANES), 1, LANES).astype(jnp.bfloat16)
    bf2 = _pad_axis(params["fc2_b"].reshape(1, -1), 1, LANES).astype(jnp.float32)
    n_classes = params["fc2_w"].shape[0]

    out = pl.pallas_call(
        functools.partial(_fused_forward_kernel, n_classes=n_classes),
        out_shape=jax.ShapeDtypeStruct((Bp, LANES), jnp.float32),
        grid=(Bp // tb,),
        in_specs=[
            pl.BlockSpec((4, tb, KP), lambda i: (0, i, 0)),      # patches
            pl.BlockSpec((KP, NP), lambda i: (0, 0)),            # conv1 block-diag
            pl.BlockSpec((1, NP), lambda i: (0, 0)),             # conv1 bias (tiled)
            pl.BlockSpec((4, NP, LANES), lambda i: (0, 0, 0)),   # conv2 folded
            pl.BlockSpec((1, LANES), lambda i: (0, 0)),          # conv2 bias
            pl.BlockSpec((LANES, LANES), lambda i: (0, 0)),      # fc1 weight
            pl.BlockSpec((1, LANES), lambda i: (0, 0)),          # fc1 bias
            pl.BlockSpec((LANES, LANES), lambda i: (0, 0)),      # fc2 weight
            pl.BlockSpec((1, LANES), lambda i: (0, 0)),          # fc2 bias
        ],
        out_specs=pl.BlockSpec((tb, LANES), lambda i: (i, 0)),
        compiler_params=pltpu.CompilerParams(
            dimension_semantics=("parallel",),
            vmem_limit_bytes=32 * 1024 * 1024),
    )(p, w1bd, b1t, w2f, b2, wf1, bf1, wf2, bf2)
    return out[:B, :n_classes]                                   # (B, 10) log-probs


# --------------------------- model definition -------------------------------

def init_params(key):
    ks = jax.random.split(key, 8)

    def u(k, shape, fan_in):
        bound = float(fan_in) ** -0.5
        return jax.random.uniform(k, shape, jnp.float32, -bound, bound)

    return dict(
        conv1_w=u(ks[0], (10, 3, 5, 5), 3 * 25),
        conv1_b=u(ks[1], (10,), 3 * 25),
        conv2_w=u(ks[2], (20, 10, 5, 5), 10 * 25),
        conv2_b=u(ks[3], (20,), 10 * 25),
        fc1_w=u(ks[4], (50, 20), 20),
        fc1_b=u(ks[5], (50,), 20),
        fc2_w=u(ks[6], (10, 50), 50),
        fc2_b=u(ks[7], (10,), 50),
    )


@jax.jit
def cifar_convnet_forward(params, x):
    return cifar_forward_pallas(params, x)


# ------------------------- pure-JAX reference --------------------------------

def reference_forward(params, x):
    B = x.shape[0]
    x = x.reshape(B, 3, 32, 32).astype(jnp.float32)

    def conv(x, w, b, stride):
        y = jax.lax.conv_general_dilated(
            x, w, window_strides=(stride, stride), padding="VALID",
            dimension_numbers=("NCHW", "OIHW", "NCHW"))
        return y + b.reshape(1, -1, 1, 1)

    def pool_relu(y):
        y = jax.lax.reduce_window(y, -jnp.inf, jax.lax.max,
                                  (1, 1, 2, 2), (1, 1, 2, 2), "VALID")
        return jnp.maximum(y, 0.0)

    x = pool_relu(conv(x, params["conv1_w"], params["conv1_b"], 2))
    x = pool_relu(conv(x, params["conv2_w"], params["conv2_b"], 2))
    x = x.reshape(B, 20)
    x = jnp.maximum(x @ params["fc1_w"].T + params["fc1_b"], 0.0)
    x = x @ params["fc2_w"].T + params["fc2_b"]
    return jax.nn.log_softmax(x, axis=1)


if __name__ == "__main__":
    key = jax.random.PRNGKey(0)
    pkey, xkey = jax.random.split(key)
    params = init_params(pkey)

    B = 2
    x = jax.random.normal(xkey, (B, 3, 32, 32), jnp.float32)

    out = jax.block_until_ready(cifar_convnet_forward(params, x))

    assert out.shape == (B, 10), out.shape
    # log_softmax rows must exponentiate-sum to 1
    assert jnp.allclose(jnp.exp(out).sum(axis=1), 1.0, atol=1e-4)
    # compare against an independent pure-JAX f32 reference
    # (kernel feeds the MXU bf16 operands with f32 accumulation, so tolerance
    #  is slightly looser than a pure-f32 comparison)
    ref = jax.block_until_ready(reference_forward(params, x))
    assert jnp.allclose(out, ref, atol=2e-2, rtol=2e-2), (
        float(jnp.max(jnp.abs(out - ref))))

    print("KERNEL_OK")
</pallas_src>

<mosaic_0001>
module attributes {stable_mosaic.version = 11 : i64} {
  func.func @_fused_forward_kernel(%arg0: i32, %arg1: memref<4x16x3712xbf16, #tpu.memory_space<vmem>>, %arg2: memref<3712x512xbf16, #tpu.memory_space<vmem>>, %arg3: memref<1x512xf32, #tpu.memory_space<vmem>>, %arg4: memref<4x512x128xbf16, #tpu.memory_space<vmem>>, %arg5: memref<1x128xf32, #tpu.memory_space<vmem>>, %arg6: memref<128x128xbf16, #tpu.memory_space<vmem>>, %arg7: memref<1x128xf32, #tpu.memory_space<vmem>>, %arg8: memref<128x128xbf16, #tpu.memory_space<vmem>>, %arg9: memref<1x128xf32, #tpu.memory_space<vmem>>, %arg10: memref<16x128xf32, #tpu.memory_space<vmem>>) attributes {dimension_semantics = [#tpu.dimension_semantics<parallel>], iteration_bounds = array<i64: 1>, scalar_prefetch = 0 : i64, scratch_operands = 0 : i64, tpu.core_type = #tpu.core_type<tc>, window_params = [{transform_indices = @transform_0, window_bounds = array<i64: 4, 16, 3712>}, {pipeline_mode = #tpu.pipeline_mode<synchronous>, transform_indices = @transform_1, window_bounds = array<i64: 3712, 512>}, {pipeline_mode = #tpu.pipeline_mode<synchronous>, transform_indices = @transform_2, window_bounds = array<i64: 1, 512>}, {pipeline_mode = #tpu.pipeline_mode<synchronous>, transform_indices = @transform_3, window_bounds = array<i64: 4, 512, 128>}, {pipeline_mode = #tpu.pipeline_mode<synchronous>, transform_indices = @transform_4, window_bounds = array<i64: 1, 128>}, {pipeline_mode = #tpu.pipeline_mode<synchronous>, transform_indices = @transform_5, window_bounds = array<i64: 128, 128>}, {pipeline_mode = #tpu.pipeline_mode<synchronous>, transform_indices = @transform_6, window_bounds = array<i64: 1, 128>}, {pipeline_mode = #tpu.pipeline_mode<synchronous>, transform_indices = @transform_7, window_bounds = array<i64: 128, 128>}, {pipeline_mode = #tpu.pipeline_mode<synchronous>, transform_indices = @transform_8, window_bounds = array<i64: 1, 128>}, {transform_indices = @transform_9, window_bounds = array<i64: 16, 128>}]} {
    %c0 = arith.constant 0 : index
    %c0_0 = arith.constant 0 : index
    %c0_1 = arith.constant 0 : index
    %0 = vector.load %arg1[%c0, %c0_0, %c0_1] : memref<4x16x3712xbf16, #tpu.memory_space<vmem>>, vector<4x16x3712xbf16>
    %1 = vector.shape_cast %0 : vector<4x16x3712xbf16> to vector<64x3712xbf16>
    %c0_2 = arith.constant 0 : index
    %c0_3 = arith.constant 0 : index
    %2 = vector.load %arg2[%c0_2, %c0_3] : memref<3712x512xbf16, #tpu.memory_space<vmem>>, vector<3712x512xbf16>
    %cst = arith.constant dense<0.000000e+00> : vector<64x512xf32>
    %3 = tpu.matmul %1, %2, %cst {dimension_numbers = #tpu.dot_dimension_numbers<[1], [0], [0], [1], [0, 0, 1, 1], [], []>} : vector<64x3712xbf16>, vector<3712x512xbf16>, vector<64x512xf32> -> vector<64x512xf32>
    %4 = vector.extract_strided_slice %3 {offsets = [0, 0], sizes = [16, 512], strides = [1, 1]} : vector<64x512xf32> to vector<16x512xf32>
    %5 = vector.extract_strided_slice %3 {offsets = [16, 0], sizes = [16, 512], strides = [1, 1]} : vector<64x512xf32> to vector<16x512xf32>
    %6 = arith.maximumf %4, %5 : vector<16x512xf32>
    %7 = vector.extract_strided_slice %3 {offsets = [32, 0], sizes = [16, 512], strides = [1, 1]} : vector<64x512xf32> to vector<16x512xf32>
    %8 = vector.extract_strided_slice %3 {offsets = [48, 0], sizes = [16, 512], strides = [1, 1]} : vector<64x512xf32> to vector<16x512xf32>
    %9 = arith.maximumf %7, %8 : vector<16x512xf32>
    %10 = arith.maximumf %6, %9 : vector<16x512xf32>
    %c0_4 = arith.constant 0 : index
    %c0_5 = arith.constant 0 : index
    %11 = vector.load %arg3[%c0_4, %c0_5] : memref<1x512xf32, #tpu.memory_space<vmem>>, vector<1x512xf32>
    %12 = vector.broadcast %11 : vector<1x512xf32> to vector<16x512xf32>
    %13 = arith.addf %10, %12 : vector<16x512xf32>
    %cst_6 = arith.constant 0.000000e+00 : f32
    %14 = vector.broadcast %cst_6 : f32 to vector<16x512xf32>
    %15 = arith.maximumf %13, %14 : vector<16x512xf32>
    %16 = arith.truncf %15 : vector<16x512xf32> to vector<16x512xbf16>
    %c0_7 = arith.constant 0 : index
    %c0_8 = arith.constant 0 : index
    %c0_9 = arith.constant 0 : index
    %17 = vector.load %arg4[%c0_7, %c0_8, %c0_9] : memref<4x512x128xbf16, #tpu.memory_space<vmem>>, vector<1x512x128xbf16>
    %18 = vector.shape_cast %17 : vector<1x512x128xbf16> to vector<512x128xbf16>
    %cst_10 = arith.constant dense<0.000000e+00> : vector<16x128xf32>
    %19 = tpu.matmul %16, %18, %cst_10 {dimension_numbers = #tpu.dot_dimension_numbers<[1], [0], [0], [1], [0, 0, 1, 1], [], []>} : vector<16x512xbf16>, vector<512x128xbf16>, vector<16x128xf32> -> vector<16x128xf32>
    %c1 = arith.constant 1 : index
    %c0_11 = arith.constant 0 : index
    %c0_12 = arith.constant 0 : index
    %20 = vector.load %arg4[%c1, %c0_11, %c0_12] : memref<4x512x128xbf16, #tpu.memory_space<vmem>>, vector<1x512x128xbf16>
    %21 = vector.shape_cast %20 : vector<1x512x128xbf16> to vector<512x128xbf16>
    %cst_13 = arith.constant dense<0.000000e+00> : vector<16x128xf32>
    %22 = tpu.matmul %16, %21, %cst_13 {dimension_numbers = #tpu.dot_dimension_numbers<[1], [0], [0], [1], [0, 0, 1, 1], [], []>} : vector<16x512xbf16>, vector<512x128xbf16>, vector<16x128xf32> -> vector<16x128xf32>
    %23 = arith.maximumf %19, %22 : vector<16x128xf32>
    %c2 = arith.constant 2 : index
    %c0_14 = arith.constant 0 : index
    %c0_15 = arith.constant 0 : index
    %24 = vector.load %arg4[%c2, %c0_14, %c0_15] : memref<4x512x128xbf16, #tpu.memory_space<vmem>>, vector<1x512x128xbf16>
    %25 = vector.shape_cast %24 : vector<1x512x128xbf16> to vector<512x128xbf16>
    %cst_16 = arith.constant dense<0.000000e+00> : vector<16x128xf32>
    %26 = tpu.matmul %16, %25, %cst_16 {dimension_numbers = #tpu.dot_dimension_numbers<[1], [0], [0], [1], [0, 0, 1, 1], [], []>} : vector<16x512xbf16>, vector<512x128xbf16>, vector<16x128xf32> -> vector<16x128xf32>
    %27 = arith.maximumf %23, %26 : vector<16x128xf32>
    %c3 = arith.constant 3 : index
    %c0_17 = arith.constant 0 : index
    %c0_18 = arith.constant 0 : index
    %28 = vector.load %arg4[%c3, %c0_17, %c0_18] : memref<4x512x128xbf16, #tpu.memory_space<vmem>>, vector<1x512x128xbf16>
    %29 = vector.shape_cast %28 : vector<1x512x128xbf16> to vector<512x128xbf16>
    %cst_19 = arith.constant dense<0.000000e+00> : vector<16x128xf32>
    %30 = tpu.matmul %16, %29, %cst_19 {dimension_numbers = #tpu.dot_dimension_numbers<[1], [0], [0], [1], [0, 0, 1, 1], [], []>} : vector<16x512xbf16>, vector<512x128xbf16>, vector<16x128xf32> -> vector<16x128xf32>
    %31 = arith.maximumf %27, %30 : vector<16x128xf32>
    %c0_20 = arith.constant 0 : index
    %c0_21 = arith.constant 0 : index
    %32 = vector.load %arg5[%c0_20, %c0_21] : memref<1x128xf32, #tpu.memory_space<vmem>>, vector<1x128xf32>
    %33 = vector.broadcast %32 : vector<1x128xf32> to vector<16x128xf32>
    %34 = arith.addf %31, %33 : vector<16x128xf32>
    %cst_22 = arith.constant 0.000000e+00 : f32
    %35 = vector.broadcast %cst_22 : f32 to vector<16x128xf32>
    %36 = arith.maximumf %34, %35 : vector<16x128xf32>
    %37 = arith.truncf %36 : vector<16x128xf32> to vector<16x128xbf16>
    %c0_23 = arith.constant 0 : index
    %c0_24 = arith.constant 0 : index
    %38 = vector.load %arg6[%c0_23, %c0_24] : memref<128x128xbf16, #tpu.memory_space<vmem>>, vector<128x128xbf16>
    %cst_25 = arith.constant dense<0.000000e+00> : vector<16x128xf32>
    %39 = tpu.matmul %37, %38, %cst_25 {dimension_numbers = #tpu.dot_dimension_numbers<[1], [0], [0], [1], [0, 0, 1, 1], [], []>} : vector<16x128xbf16>, vector<128x128xbf16>, vector<16x128xf32> -> vector<16x128xf32>
    %c0_26 = arith.constant 0 : index
    %c0_27 = arith.constant 0 : index
    %40 = vector.load %arg7[%c0_26, %c0_27] : memref<1x128xf32, #tpu.memory_space<vmem>>, vector<1x128xf32>
    %41 = vector.broadcast %40 : vector<1x128xf32> to vector<16x128xf32>
    %42 = arith.addf %39, %41 : vector<16x128xf32>
    %cst_28 = arith.constant 0.000000e+00 : f32
    %43 = vector.broadcast %cst_28 : f32 to vector<16x128xf32>
    %44 = arith.maximumf %42, %43 : vector<16x128xf32>
    %45 = arith.truncf %44 : vector<16x128xf32> to vector<16x128xbf16>
    %c0_29 = arith.constant 0 : index
    %c0_30 = arith.constant 0 : index
    %46 = vector.load %arg8[%c0_29, %c0_30] : memref<128x128xbf16, #tpu.memory_space<vmem>>, vector<128x128xbf16>
    %cst_31 = arith.constant dense<0.000000e+00> : vector<16x128xf32>
    %47 = tpu.matmul %45, %46, %cst_31 {dimension_numbers = #tpu.dot_dimension_numbers<[1], [0], [0], [1], [0, 0, 1, 1], [], []>} : vector<16x128xbf16>, vector<128x128xbf16>, vector<16x128xf32> -> vector<16x128xf32>
    %c0_32 = arith.constant 0 : index
    %c0_33 = arith.constant 0 : index
    %48 = vector.load %arg9[%c0_32, %c0_33] : memref<1x128xf32, #tpu.memory_space<vmem>>, vector<1x128xf32>
    %49 = vector.broadcast %48 : vector<1x128xf32> to vector<16x128xf32>
    %50 = arith.addf %47, %49 : vector<16x128xf32>
    %51 = tpu.iota {dimensions = array<i32: 1>} : vector<16x128xi32>
    %c10_i32 = arith.constant 10 : i32
    %52 = vector.broadcast %c10_i32 : i32 to vector<16x128xi32>
    %53 = arith.cmpi slt, %51, %52 : vector<16x128xi32>
    %cst_34 = arith.constant 0xFF800000 : f32
    %54 = vector.broadcast %cst_34 : f32 to vector<16x128xf32>
    %55 = arith.select %53, %50, %54 : vector<16x128xi1>, vector<16x128xf32>
    %cst_35 = arith.constant dense<0xFF800000> : vector<16xf32>
    %56 = vector.multi_reduction <maximumf>, %55, %cst_35 [1] : vector<16x128xf32> to vector<16xf32>
    %57 = vector.shape_cast %56 : vector<16xf32> to vector<16x1xf32>
    %58 = vector.broadcast %57 : vector<16x1xf32> to vector<16x128xf32>
    %59 = arith.subf %50, %58 : vector<16x128xf32>
    %60 = math.exp %59 : vector<16x128xf32>
    %cst_36 = arith.constant 0.000000e+00 : f32
    %61 = vector.broadcast %cst_36 : f32 to vector<16x128xf32>
    %62 = arith.select %53, %60, %61 : vector<16x128xi1>, vector<16x128xf32>
    %cst_37 = arith.constant dense<0.000000e+00> : vector<16xf32>
    %63 = vector.multi_reduction <add>, %62, %cst_37 [1] : vector<16x128xf32> to vector<16xf32>
    %64 = vector.shape_cast %63 : vector<16xf32> to vector<16x1xf32>
    %65 = math.log %64 : vector<16x1xf32>
    %66 = vector.broadcast %57 : vector<16x1xf32> to vector<16x128xf32>
    %67 = arith.subf %50, %66 : vector<16x128xf32>
    %68 = vector.broadcast %65 : vector<16x1xf32> to vector<16x128xf32>
    %69 = arith.subf %67, %68 : vector<16x128xf32>
    %cst_38 = arith.constant 0.000000e+00 : f32
    %70 = vector.broadcast %cst_38 : f32 to vector<16x128xf32>
    %71 = arith.select %53, %69, %70 : vector<16x128xi1>, vector<16x128xf32>
    %c0_39 = arith.constant 0 : index
    %c0_40 = arith.constant 0 : index
    %72 = vector.load %arg10[%c0_39, %c0_40] : memref<16x128xf32, #tpu.memory_space<vmem>>, vector<16x128xf32>
    tpu.vector_store %arg10[%c0_39, %c0_40], %71 {strides = array<i32>} : memref<16x128xf32, #tpu.memory_space<vmem>>, vector<16x128xf32>,
    return
  }
  func.func @transform_0(%arg0: i32) -> (i32, i32, i32) {
    %c0_i32 = arith.constant 0 : i32
    %c0_i32_0 = arith.constant 0 : i32
    %c0_i32_1 = arith.constant 0 : i32
    return %c0_i32, %arg0, %c0_i32_0 : i32, i32, i32
  }
  func.func @transform_1(%arg0: i32) -> (i32, i32) {
    %c0_i32 = arith.constant 0 : i32
    %c0_i32_0 = arith.constant 0 : i32
    %c0_i32_1 = arith.constant 0 : i32
    return %c0_i32, %c0_i32_0 : i32, i32
  }
  func.func @transform_2(%arg0: i32) -> (i32, i32) {
    %c0_i32 = arith.constant 0 : i32
    %c0_i32_0 = arith.constant 0 : i32
    %c0_i32_1 = arith.constant 0 : i32
    return %c0_i32, %c0_i32_0 : i32, i32
  }
  func.func @transform_3(%arg0: i32) -> (i32, i32, i32) {
    %c0_i32 = arith.constant 0 : i32
    %c0_i32_0 = arith.constant 0 : i32
    %c0_i32_1 = arith.constant 0 : i32
    %c0_i32_2 = arith.constant 0 : i32
    return %c0_i32, %c0_i32_0, %c0_i32_1 : i32, i32, i32
  }
  func.func @transform_4(%arg0: i32) -> (i32, i32) {
    %c0_i32 = arith.constant 0 : i32
    %c0_i32_0 = arith.constant 0 : i32
    %c0_i32_1 = arith.constant 0 : i32
    return %c0_i32, %c0_i32_0 : i32, i32
  }
  func.func @transform_5(%arg0: i32) -> (i32, i32) {
    %c0_i32 = arith.constant 0 : i32
    %c0_i32_0 = arith.constant 0 : i32
    %c0_i32_1 = arith.constant 0 : i32
    return %c0_i32, %c0_i32_0 : i32, i32
  }
  func.func @transform_6(%arg0: i32) -> (i32, i32) {
    %c0_i32 = arith.constant 0 : i32
    %c0_i32_0 = arith.constant 0 : i32
    %c0_i32_1 = arith.constant 0 : i32
    return %c0_i32, %c0_i32_0 : i32, i32
  }
  func.func @transform_7(%arg0: i32) -> (i32, i32) {
    %c0_i32 = arith.constant 0 : i32
    %c0_i32_0 = arith.constant 0 : i32
    %c0_i32_1 = arith.constant 0 : i32
    return %c0_i32, %c0_i32_0 : i32, i32
  }
  func.func @transform_8(%arg0: i32) -> (i32, i32) {
    %c0_i32 = arith.constant 0 : i32
    %c0_i32_0 = arith.constant 0 : i32
    %c0_i32_1 = arith.constant 0 : i32
    return %c0_i32, %c0_i32_0 : i32, i32
  }
  func.func @transform_9(%arg0: i32) -> (i32, i32) {
    %c0_i32 = arith.constant 0 : i32
    %c0_i32_0 = arith.constant 0 : i32
    return %arg0, %c0_i32 : i32, i32
  }
}

</mosaic_0001>

<bundles_post_ra>
// kernel: mul.4
= control target key start
LH: loop header
LB: loop body
LE: loop exit
PB: predicated region body
PF: predicated region fallthrough
CT: control target
= control target key end

     0   :  { %vm126_vm0 = vcmask 80896   ;;  %s504_s0 = inlined_call_operand.vmem [shape: f32[5,5,3,10], index: 0, kind: input, shape index: {}]   ;;  %s505_s1 = inlined_call_operand.vmem [shape: f32[75,10], index: 1, kind: output, shape index: {}]  }
   0x1   :  { %v271_v0 = vld [vmem:[%s504_s0 + $0x60] sm:$0xf]  ;;  %v272_v1 = vld [vmem:[%s504_s0 + $0x5c] sm:$0xf]  ;;  %v273_v2 = vld [vmem:[%s504_s0 + $0x58] sm:$0xf] }
   0x2   :  { %8 = vst [vmem:[#allocation0 + $0xc0] sm:$0xf] %v271_v0  ;;  %13 = vst [vmem:[#allocation0 + $0xb8] sm:$0xf] %v272_v1  ;;  %v274_v3 = vld [vmem:[%s504_s0 + $0x54] sm:$0xf] }
   0x3   :  { %18 = vst [vmem:[#allocation0 + $0xb0] sm:$0xf] %v273_v2  ;;  %v275_v4 = vld [vmem:[%s504_s0 + $0x50] sm:$0xf]  ;;  %v276_v5 = vld [vmem:[%s504_s0 + $0x4c] sm:$0xf] }
   0x4   :  { %23 = vst [vmem:[#allocation0 + $0xa8] sm:$0xf] %v274_v3  ;;  %28 = vst [vmem:[#allocation0 + $0xa0] sm:$0xf] %v275_v4  ;;  %v277_v6 = vld [vmem:[%s504_s0 + $0x48] sm:$0xf] }
   0x5   :  { %33 = vst [vmem:[#allocation0 + $0x98] sm:$0xf] %v276_v5  ;;  %v278_v7 = vld [vmem:[%s504_s0 + $0x44] sm:$0xf]  ;;  %v279_v8 = vld [vmem:[%s504_s0 + $0x40] sm:$0xf] }
   0x6   :  { %38 = vst [vmem:[#allocation0 + $0x90] sm:$0xf] %v277_v6  ;;  %43 = vst [vmem:[#allocation0 + $0x88] sm:$0xf] %v278_v7  ;;  %v280_v9 = vld [vmem:[%s504_s0 + $0x3c] sm:$0xf] }
   0x7   :  { %48 = vst [vmem:[#allocation0 + $0x80] sm:$0xf] %v279_v8  ;;  %v281_v10 = vld [vmem:[%s504_s0 + $0x38] sm:$0xf]  ;;  %v282_v11 = vld [vmem:[%s504_s0 + $0x34] sm:$0xf] }
   0x8   :  { %53 = vst [vmem:[#allocation0 + $0x78] sm:$0xf] %v280_v9  ;;  %58 = vst [vmem:[#allocation0 + $0x70] sm:$0xf] %v281_v10  ;;  %v283_v12 = vld [vmem:[%s504_s0 + $0x30] sm:$0xf] }
   0x9   :  { %63 = vst [vmem:[#allocation0 + $0x68] sm:$0xf] %v282_v11  ;;  %v284_v13 = vld [vmem:[%s504_s0 + $0x2c] sm:$0xf]  ;;  %v285_v14 = vld [vmem:[%s504_s0 + $0x28] sm:$0xf] }
   0xa   :  { %68 = vst [vmem:[#allocation0 + $0x60] sm:$0xf] %v283_v12  ;;  %73 = vst [vmem:[#allocation0 + $0x58] sm:$0xf] %v284_v13  ;;  %v286_v15 = vld [vmem:[%s504_s0 + $0x24] sm:$0xf] }
   0xb   :  { %78 = vst [vmem:[#allocation0 + $0x50] sm:$0xf] %v285_v14  ;;  %v287_v16 = vld [vmem:[%s504_s0 + $0x20] sm:$0xf]  ;;  %v288_v17 = vld [vmem:[%s504_s0 + $0x1c] sm:$0xf] }
   0xc   :  { %83 = vst [vmem:[#allocation0 + $0x48] sm:$0xf] %v286_v15  ;;  %88 = vst [vmem:[#allocation0 + $0x40] sm:$0xf] %v287_v16  ;;  %v289_v18 = vld [vmem:[%s504_s0 + $0x18] sm:$0xf] }
   0xd   :  { %93 = vst [vmem:[#allocation0 + $0x38] sm:$0xf] %v288_v17  ;;  %v290_v19 = vld [vmem:[%s504_s0 + $0x14] sm:$0xf]  ;;  %v291_v20 = vld [vmem:[%s504_s0 + $0x10] sm:$0xf] }
   0xe   :  { %98 = vst [vmem:[#allocation0 + $0x30] sm:$0xf] %v289_v18  ;;  %103 = vst [vmem:[#allocation0 + $0x28] sm:$0xf] %v290_v19  ;;  %v292_v21 = vld [vmem:[%s504_s0 + $0xc] sm:$0xf] }
   0xf   :  { %108 = vst [vmem:[#allocation0 + $0x20] sm:$0xf] %v291_v20  ;;  %v293_v22 = vld [vmem:[%s504_s0 + $0x8] sm:$0xf]  ;;  %v294_v23 = vld [vmem:[%s504_s0 + $0x4] sm:$0xf] }
  0x10   :  { %113 = vst [vmem:[#allocation0 + $0x18] sm:$0xf] %v292_v21  ;;  %118 = vst [vmem:[#allocation0 + $0x10] sm:$0xf] %v293_v22  ;;  %v123_v24 = vld [vmem:[%s504_s0] sm:$0xf] }
  0x11   :  { %122 = vst [vmem:[#allocation0 + $0x8] sm:$0xf] %v294_v23  ;;  %v234_v25 = vld [vmem:[#allocation0 + $0xb0] sm:$0x7]   ;;  %124 = vst [vmem:[#allocation0] sm:$0xf] %v123_v24 }
  0x12   :  { %v219_v26 = vld [vmem:[#allocation0 + $0x98] sm:$0x7]   ;;  %v224_v27 = vld [vmem:[#allocation0 + $0xa0] sm:$0x7]   ;;  %v229_v28 = vld [vmem:[#allocation0 + $0xa8] sm:$0x7]  }
  0x13   :  { %316 = vst.msk [vmem:[%s505_s1 + $0x42] sm:$0x7] %vm126_vm0, %v234_v25   ;;  %v204_v29 = vld [vmem:[#allocation0 + $0x80] sm:$0x7]   ;;  %v209_v30 = vld [vmem:[#allocation0 + $0x88] sm:$0x7]  }
  0x14   :  { %v214_v31 = vld [vmem:[#allocation0 + $0x90] sm:$0x7]   ;;  %313 = vst.msk [vmem:[%s505_s1 + $0x39] sm:$0x7] %vm126_vm0, %v219_v26   ;;  %314 = vst.msk [vmem:[%s505_s1 + $0x3c] sm:$0x7] %vm126_vm0, %v224_v27  }
  0x15   :  { %315 = vst.msk [vmem:[%s505_s1 + $0x3f] sm:$0x7] %vm126_vm0, %v229_v28   ;;  %v189_v32 = vld [vmem:[#allocation0 + $0x68] sm:$0x7]   ;;  %v194_v33 = vld [vmem:[#allocation0 + $0x70] sm:$0x7]  }
  0x16   :  { %v199_v34 = vld [vmem:[#allocation0 + $0x78] sm:$0x7]   ;;  %310 = vst.msk [vmem:[%s505_s1 + $0x30] sm:$0x7] %vm126_vm0, %v204_v29   ;;  %311 = vst.msk [vmem:[%s505_s1 + $0x33] sm:$0x7] %vm126_vm0, %v209_v30  }
  0x17   :  { %312 = vst.msk [vmem:[%s505_s1 + $0x36] sm:$0x7] %vm126_vm0, %v214_v31   ;;  %v174_v35 = vld [vmem:[#allocation0 + $0x50] sm:$0x7]   ;;  %v179_v36 = vld [vmem:[#allocation0 + $0x58] sm:$0x7]  }
  0x18   :  { %v184_v37 = vld [vmem:[#allocation0 + $0x60] sm:$0x7]   ;;  %307 = vst.msk [vmem:[%s505_s1 + $0x27] sm:$0x7] %vm126_vm0, %v189_v32   ;;  %308 = vst.msk [vmem:[%s505_s1 + $0x2a] sm:$0x7] %vm126_vm0, %v194_v33  }
  0x19   :  { %309 = vst.msk [vmem:[%s505_s1 + $0x2d] sm:$0x7] %vm126_vm0, %v199_v34   ;;  %v159_v38 = vld [vmem:[#allocation0 + $0x38] sm:$0x7]   ;;  %v164_v39 = vld [vmem:[#allocation0 + $0x40] sm:$0x7]  }
  0x1a   :  { %v169_v40 = vld [vmem:[#allocation0 + $0x48] sm:$0x7]   ;;  %304 = vst.msk [vmem:[%s505_s1 + $0x1e] sm:$0x7] %vm126_vm0, %v174_v35   ;;  %305 = vst.msk [vmem:[%s505_s1 + $0x21] sm:$0x7] %vm126_vm0, %v179_v36  }
  0x1b   :  { %306 = vst.msk [vmem:[%s505_s1 + $0x24] sm:$0x7] %vm126_vm0, %v184_v37   ;;  %v144_v41 = vld [vmem:[#allocation0 + $0x20] sm:$0x7]   ;;  %v149_v42 = vld [vmem:[#allocation0 + $0x28] sm:$0x7]  }
  0x1c   :  { %v154_v43 = vld [vmem:[#allocation0 + $0x30] sm:$0x7]   ;;  %301 = vst.msk [vmem:[%s505_s1 + $0x15] sm:$0x7] %vm126_vm0, %v159_v38   ;;  %302 = vst.msk [vmem:[%s505_s1 + $0x18] sm:$0x7] %vm126_vm0, %v164_v39  }
  0x1d   :  { %303 = vst.msk [vmem:[%s505_s1 + $0x1b] sm:$0x7] %vm126_vm0, %v169_v40   ;;  %v129_v44 = vld [vmem:[#allocation0 + $0x8] sm:$0x7]   ;;  %v134_v45 = vld [vmem:[#allocation0 + $0x10] sm:$0x7]  }
  0x1e   :  { %v139_v46 = vld [vmem:[#allocation0 + $0x18] sm:$0x7]   ;;  %298 = vst.msk [vmem:[%s505_s1 + $0xc] sm:$0x7] %vm126_vm0, %v144_v41   ;;  %299 = vst.msk [vmem:[%s505_s1 + $0xf] sm:$0x7] %vm126_vm0, %v149_v42  }
  0x1f   :  { %300 = vst.msk [vmem:[%s505_s1 + $0x12] sm:$0x7] %vm126_vm0, %v154_v43   ;;  %v125_v47 = vld [vmem:[#allocation0] sm:$0x7]   ;;  %295 = vst.msk [vmem:[%s505_s1 + $0x3] sm:$0x7] %vm126_vm0, %v129_v44  }
  0x20   :  { %296 = vst.msk [vmem:[%s505_s1 + $0x6] sm:$0x7] %vm126_vm0, %v134_v45   ;;  %297 = vst.msk [vmem:[%s505_s1 + $0x9] sm:$0x7] %vm126_vm0, %v139_v46   ;;  %v239_v48 = vld [vmem:[#allocation0 + $0xb8] sm:$0x7]  }
  0x21   :  { %v244_v49 = vld [vmem:[#allocation0 + $0xc0] sm:$0x7]   ;;  %127 = vst.msk [vmem:[%s505_s1] sm:$0x7] %vm126_vm0, %v125_v47   ;;  %317 = vst.msk [vmem:[%s505_s1 + $0x45] sm:$0x7] %vm126_vm0, %v239_v48  }
  0x22   :  { %318 = vst.msk [vmem:[%s505_s1 + $0x48] sm:$0x7] %vm126_vm0, %v244_v49  }

// kernel: tile.8
= control target key start
LH: loop header
LB: loop body
LE: loop exit
PB: predicated region body
PF: predicated region fallthrough
CT: control target
= control target key end

     0   :  { %s58_s0 = inlined_call_operand.vmem [shape: f32[10], index: 0, kind: input, shape index: {}]   ;;  %s59_s1 = inlined_call_operand.vmem [shape: f32[49,10], index: 1, kind: output, shape index: {}]  }
   0x1   :  { %v4_v0 = vld [vmem:[%s58_s0] ss:$0 sm:$0xff] }
   0x2   :  { %5 = vst [vmem:[%s59_s1] sm:$0xff] %v4_v0  ;;  %18 = vst [vmem:[%s59_s1 + $0x8] sm:$0xff] %v4_v0 }
   0x3   :  { %19 = vst [vmem:[%s59_s1 + $0x10] sm:$0xff] %v4_v0  ;;  %20 = vst [vmem:[%s59_s1 + $0x18] sm:$0xff] %v4_v0 }
   0x4   :  { %21 = vst [vmem:[%s59_s1 + $0x20] sm:$0xff] %v4_v0  ;;  %22 = vst [vmem:[%s59_s1 + $0x28] sm:$0xff] %v4_v0 }
   0x5   :  { %23 = vst [vmem:[%s59_s1 + $0x30] sm:$0xff] %v4_v0 }

// kernel: tile.9
= control target key start
LH: loop header
LB: loop body
LE: loop exit
PB: predicated region body
PF: predicated region fallthrough
CT: control target
= control target key end

     0   :  { %vm37_vm0 = vcmask 64512   ;;  %vm9_vm1 = vcmask 31744   ;;  %s477_s14 = smov 120   ;;  %vm13_vm2 = vcmask 48128   ;;  %s478_s17 = smov 124   ;;  %vm3_vm3 = vcmask 80896   ;;  %s707_s0 = inlined_call_operand.vmem [shape: f32[49,10], index: 0, kind: input, shape index: {}]   ;;  %s708_s1 = inlined_call_operand.vmem [shape: f32[1,490], index: 1, kind: output, shape index: {}]  }
   0x1   :  { %v379_v0 = vld [vmem:[%s707_s0 + $0xc] sm:$0x1]   ;;  %v375_v3 = vld [vmem:[%s707_s0 + $0x26] sm:$0x1]   ;;  %v377_v6 = vld [vmem:[%s707_s0 + $0x19] sm:$0x1]  }
   0x2   :  { %v380_v1 = vld [vmem:[%s707_s0 + $0xc] sm:$0x1]   ;;  %v376_v4 = vld [vmem:[%s707_s0 + $0x26] sm:$0x1]   ;;  %v381_v7 = vld [vmem:[%s707_s0 + $0x25] sm:$0x1]  }
   0x3   :  { %v38_v2 = vsel %vm37_vm0, %v380_v1, %v379_v0  ;;  %v10_v5 = vsel %vm9_vm1, %v376_v4, %v375_v3  ;;  %v378_v8 = vld [vmem:[%s707_s0 + $0x19] sm:$0x1]   ;;  %s479_s22 = smov 114   ;;  %s480_s23 = smov 122   ;;  %v383_v10 = vld [vmem:[%s707_s0 + $0xb] sm:$0x1]  }
   0x4   :  { %39 = vrot.lane.b32.xlu1 %v38_v2, %s477_s14  ;;  %11 = vrot.lane.b32.xlu0 %v10_v5, %s478_s17  ;;  %v24_v9 = vsel %vm13_vm2, %v378_v8, %v377_v6  ;;  %v382_v11 = vld [vmem:[%s707_s0 + $0x18] sm:$0x1]   ;;  %s481_s28 = smov 110   ;;  %s482_s29 = smov 112   ;;  %v385_v12 = vld [vmem:[%s707_s0 + $0x17] sm:$0x1]  }
   0x5   :  { %v384_v13 = vld [vmem:[%s707_s0 + $0x24] sm:$0x1]   ;;  %s483_s5 = smov 102   ;;  %s484_s6 = smov 104   ;;  %v387_v14 = vld [vmem:[%s707_s0 + $0x30] sm:$0x1]  }
   0x6   :  { %v386_v15 = vld [vmem:[%s707_s0 + $0xa] sm:$0x1]   ;;  %s485_s11 = smov 96   ;;  %s486_s12 = smov 100   ;;  %v389_v16 = vld [vmem:[%s707_s0 + $0x16] sm:$0x1]  }
   0x7   :  { %v388_v17 = vld [vmem:[%s707_s0 + $0x23] sm:$0x1]   ;;  %s487_s17 = smov 92   ;;  %s488_s18 = smov 94   ;;  %v391_v18 = vld [vmem:[%s707_s0 + $0x2f] sm:$0x1]  }
   0x8   :  { %48 = vrot.lane.b32.xlu1 %v381_v7, %s479_s22  ;;  %25 = vrot.lane.b32.xlu0 %v24_v9, %s480_s23  ;;  %v390_v19 = vld [vmem:[%s707_s0 + $0x9] sm:$0x1]   ;;  %s489_s23 = smov 86   ;;  %v2_v20 = vld [vmem:[%s707_s0] sm:$0x1]   ;;  %s490_s26 = smov 90  }
   0x9   :  { %v393_v21 = vld [vmem:[%s707_s0 + $0x15] sm:$0x1]   ;;  %4 = vst.msk [vmem:[#allocation0] sm:$0x1] %vm3_vm3, %v2_v20   ;;  %v392_v22 = vld [vmem:[%s707_s0 + $0x22] sm:$0x1]  }
   0xa   :  { %s491_s2 = smov 82   ;;  %s492_s3 = smov 84   ;;  %v395_v23 = vld [vmem:[%s707_s0 + $0x2e] sm:$0x1]   ;;  %v394_v24 = vld [vmem:[%s707_s0 + $0x8] sm:$0x1]  }
   0xb   :  { %s493_s8 = smov 76   ;;  %s494_s9 = smov 80   ;;  %v397_v25 = vld [vmem:[%s707_s0 + $0x14] sm:$0x1]   ;;  %v396_v26 = vld [vmem:[%s707_s0 + $0x21] sm:$0x1]  }
   0xc   :  { %62 = vrot.lane.b32.xlu1 %v383_v10, %s481_s28  ;;  %55 = vrot.lane.b32.xlu0 %v382_v11, %s482_s29  ;;  %s495_s14 = smov 72   ;;  %s496_s15 = smov 74   ;;  %v399_v27 = vld [vmem:[%s707_s0 + $0x2d] sm:$0x1]   ;;  %v398_v28 = vld [vmem:[%s707_s0 + $0x7] sm:$0x1]  }
   0xd   :  { %s497_s20 = smov 66   ;;  %s498_s21 = smov 70   ;;  %v401_v29 = vld [vmem:[%s707_s0 + $0x13] sm:$0x1]   ;;  %v400_v30 = vld [vmem:[%s707_s0 + $0x20] sm:$0x1]  }
   0xe   :  { %s500_s27 = smov 64   ;;  %v403_v31 = vld [vmem:[%s707_s0 + $0x2c] sm:$0x1]   ;;  %v402_v32 = vld [vmem:[%s707_s0 + $0x6] sm:$0x1]   ;;  %s502_s4 = smov 60  }
   0xf   :  { %v405_v33 = vld [vmem:[%s707_s0 + $0x12] sm:$0x1]   ;;  %v404_v34 = vld [vmem:[%s707_s0 + $0x1f] sm:$0x1]   ;;  %s504_s10 = smov 54   ;;  %s506_s16 = smov 50  }
  0x10   :  { %75 = vrot.lane.b32.xlu1 %v385_v12, %s483_s5  ;;  %68 = vrot.lane.b32.xlu0 %v384_v13, %s484_s6  ;;  %v407_v35 = vld [vmem:[%s707_s0 + $0x2b] sm:$0x1]   ;;  %v406_v36 = vld [vmem:[%s707_s0 + $0x5] sm:$0x1]   ;;  %s508_s22 = smov 44   ;;  %s510_s28 = smov 40  }
  0x11   :  { %v409_v37 = vld [vmem:[%s707_s0 + $0x11] sm:$0x1]   ;;  %v408_v38 = vld [vmem:[%s707_s0 + $0x1e] sm:$0x1]   ;;  %v411_v39 = vld [vmem:[%s707_s0 + $0x2a] sm:$0x1]  }
  0x12   :  { %v410_v40 = vld [vmem:[%s707_s0 + $0x4] sm:$0x1]   ;;  %v413_v41 = vld [vmem:[%s707_s0 + $0x10] sm:$0x1]   ;;  %v412_v42 = vld [vmem:[%s707_s0 + $0x1d] sm:$0x1]  }
  0x13   :  { %s512_s5 = smov 34   ;;  %v415_v43 = vld [vmem:[%s707_s0 + $0x29] sm:$0x1]   ;;  %v414_v44 = vld [vmem:[%s707_s0 + $0x3] sm:$0x1]   ;;  %s520_s29 = smov 14  }
  0x14   :  { %88 = vrot.lane.b32.xlu1 %v387_v14, %s485_s11  ;;  %82 = vrot.lane.b32.xlu0 %v386_v15, %s486_s12  ;;  %s514_s11 = smov 30   ;;  %v417_v45 = vld [vmem:[%s707_s0 + $0xf] sm:$0x1]   ;;  %v416_v46 = vld [vmem:[%s707_s0 + $0x1c] sm:$0x1]   ;;  %s522_s6 = smov 10  }
  0x15   :  { %v419_v47 = vld [vmem:[%s707_s0 + $0x28] sm:$0x1]   ;;  %v418_v48 = vld [vmem:[%s707_s0 + $0x2] sm:$0x1]   ;;  %v421_v49 = vld [vmem:[%s707_s0 + $0xe] sm:$0x1]  }
  0x16   :  { %v420_v50 = vld [vmem:[%s707_s0 + $0x1b] sm:$0x1]   ;;  %v423_v51 = vld [vmem:[%s707_s0 + $0x27] sm:$0x1]   ;;  %v422_v52 = vld [vmem:[%s707_s0 + $0x1] sm:$0x1]  }
  0x17   :  { %v425_v53 = vld [vmem:[%s707_s0 + $0xd] sm:$0x1]   ;;  %v424_v54 = vld [vmem:[%s707_s0 + $0x1a] sm:$0x1]   ;;  %s523_s0 = smov 2   ;;  %vm44_vm4 = vcmask 1048512  }
  0x18   :  { %102 = vrot.lane.b32.xlu1 %v389_v16, %s487_s17  ;;  %95 = vrot.lane.b32.xlu0 %v388_v17, %s488_s18  ;;  %s516_s17 = smov 24   ;;  %vm16_vm5 = vcmask 1048544   ;;  %vm30_vm6 = vcmask 1048528   ;;  %vm41_vm7 = vcmask 15360   ;;  %vm50_vm8 = vcmask 1015696  }
  0x19   :  { %vm64_vm9 = vcmask 982896   ;;  %vm57_vm10 = vcmask 999296   ;;  %vm77_vm11 = vcmask 917296   ;;  %vm70_vm12 = vcmask 933696  }
  0x1a   :  { %vm90_vm13 = vcmask 868096   ;;  %vm84_vm14 = vcmask 900896   ;;  %vm104_vm15 = vcmask 835296   ;;  %vm97_vm0 = vcmask 851696  }
  0x1b   :  { %vm131_vm3 = vcmask 753296  }
  0x1c   :  { %115 = vrot.lane.b32.xlu1 %v391_v18, %s489_s23  ;;  %109 = vrot.lane.b32.xlu0 %v390_v19, %s490_s26  ;;  %s499_s26 = smov 62   ;;  %s518_s23 = smov 20  }
  0x20   :  { %129 = vrot.lane.b32.xlu1 %v393_v21, %s491_s2  ;;  %122 = vrot.lane.b32.xlu0 %v392_v22, %s492_s3  ;;  %s501_s3 = smov 56  }
  0x24   :  { %142 = vrot.lane.b32.xlu1 %v395_v23, %s493_s8  ;;  %136 = vrot.lane.b32.xlu0 %v394_v24, %s494_s9  ;;  %s503_s9 = smov 52  }
  0x28   :  { %156 = vrot.lane.b32.xlu1 %v397_v25, %s495_s14  ;;  %149 = vrot.lane.b32.xlu0 %v396_v26, %s496_s15  ;;  %s505_s15 = smov 46  }
  0x2c   :  { %169 = vrot.lane.b32.xlu1 %v399_v27, %s497_s20  ;;  %163 = vrot.lane.b32.xlu0 %v398_v28, %s498_s21  ;;  %s507_s21 = smov 42  }
  0x30   :  { %183 = vrot.lane.b32.xlu1 %v401_v29, %s499_s26  ;;  %176 = vrot.lane.b32.xlu0 %v400_v30, %s500_s27  ;;  %s509_s27 = smov 36  }
  0x34   :  { %196 = vrot.lane.b32.xlu1 %v403_v31, %s501_s3  ;;  %190 = vrot.lane.b32.xlu0 %v402_v32, %s502_s4  ;;  %s511_s4 = smov 32  }
  0x38   :  { %210 = vrot.lane.b32.xlu1 %v405_v33, %s503_s9  ;;  %203 = vrot.lane.b32.xlu0 %v404_v34, %s504_s10  ;;  %s513_s10 = smov 26  }
  0x3c   :  { %223 = vrot.lane.b32.xlu1 %v407_v35, %s505_s15  ;;  %217 = vrot.lane.b32.xlu0 %v406_v36, %s506_s16  ;;  %s515_s16 = smov 22  }
  0x40   :  { %237 = vrot.lane.b32.xlu1 %v409_v37, %s507_s21  ;;  %230 = vrot.lane.b32.xlu0 %v408_v38, %s508_s22  ;;  %s517_s22 = smov 16  }
  0x44   :  { %250 = vrot.lane.b32.xlu1 %v411_v39, %s509_s27  ;;  %244 = vrot.lane.b32.xlu0 %v410_v40, %s510_s28  ;;  %s519_s28 = smov 12  }
  0x48   :  { %264 = vrot.lane.b32.xlu1 %v413_v41, %s511_s4  ;;  %257 = vrot.lane.b32.xlu0 %v412_v42, %s512_s5  ;;  %s521_s5 = smov 6  }
  0x4c   :  { %277 = vrot.lane.b32.xlu1 %v415_v43, %s513_s10  ;;  %271 = vrot.lane.b32.xlu0 %v414_v44, %s514_s11  ;;  %s524_s11 = smov 4  }
  0x50   :  { %291 = vrot.lane.b32.xlu1 %v417_v45, %s515_s16  ;;  %284 = vrot.lane.b32.xlu0 %v416_v46, %s516_s17 }
  0x54   :  { %304 = vrot.lane.b32.xlu1 %v419_v47, %s517_s22  ;;  %298 = vrot.lane.b32.xlu0 %v418_v48, %s518_s23 }
  0x58   :  { %318 = vrot.lane.b32.xlu1 %v421_v49, %s519_s28  ;;  %311 = vrot.lane.b32.xlu0 %v420_v50, %s520_s29 }
  0x5c   :  { %331 = vrot.lane.b32.xlu1 %v423_v51, %s521_s5  ;;  %325 = vrot.lane.b32.xlu0 %v422_v52, %s522_s6 }
  0x60   :  { %345 = vrot.lane.b32.xlu1 %v425_v53, %s523_s0  ;;  %338 = vrot.lane.b32.xlu0 %v424_v54, %s524_s11 }
  0x76   :  { %v40_v55 = vpop.permute.xlu1 %39   ;;  %v12_v56 = vpop.permute.xlu0 %11  }
  0x77   :  { %45 = vst.msk [vmem:[#allocation0] sm:$0x1] %vm44_vm4, %v40_v55   ;;  %vm124_vm4 = vcmask 769696  }
  0x78   :  { %15 = vst.msk [vmem:[#allocation0 + $0x18] sm:$0x1] %vm13_vm2, %v12_v56   ;;  %vm111_vm2 = vcmask 818896  }
  0x79   :  { %18 = vst.msk [vmem:[#allocation0 + $0x10] sm:$0x1] %vm16_vm5, %v12_v56   ;;  %vm144_vm5 = vcmask 704096  }
  0x7a   :  { %v49_v57 = vpop.permute.xlu1 %48   ;;  %v26_v58 = vpop.permute.xlu0 %25  }
  0x7b   :  { %29 = vst.msk [vmem:[#allocation0 + $0x10] sm:$0x1] %vm9_vm1, %v26_v58   ;;  %vm117_vm1 = vcmask 786096  }
  0x7c   :  { %32 = vst.msk [vmem:[#allocation0 + $0x8] sm:$0x1] %vm30_vm6, %v26_v58   ;;  %vm138_vm6 = vcmask 736896  }
  0x7d   :  { %43 = vst.msk [vmem:[#allocation0 + $0x8] sm:$0x1] %vm41_vm7, %v40_v55   ;;  %vm158_vm7 = vcmask 671296  }
  0x7e   :  { %52 = vst.msk [vmem:[#allocation0 + $0x10] sm:$0x1] %vm50_vm8, %v49_v57   ;;  %v63_v59 = vpop.permute.xlu1 %62   ;;  %v56_v60 = vpop.permute.xlu0 %55   ;;  %vm151_vm8 = vcmask 687696  }
  0x7f   :  { %65 = vst.msk [vmem:[#allocation0] sm:$0x1] %vm64_vm9, %v63_v59   ;;  %vm171_vm9 = vcmask 622096  }
  0x80   :  { %59 = vst.msk [vmem:[#allocation0 + $0x8] sm:$0x1] %vm57_vm10, %v56_v60   ;;  %vm165_vm10 = vcmask 654896  }
  0x82   :  { %v76_v61 = vpop.permute.xlu1 %75   ;;  %v69_v62 = vpop.permute.xlu0 %68  }
  0x83   :  { %79 = vst.msk [vmem:[#allocation0 + $0x8] sm:$0x1] %vm77_vm11, %v76_v61   ;;  %vm185_vm11 = vcmask 589296  }
  0x84   :  { %72 = vst.msk [vmem:[#allocation0 + $0x10] sm:$0x1] %vm70_vm12, %v69_v62   ;;  %vm178_vm12 = vcmask 605696  }
  0x86   :  { %v89_v63 = vpop.permute.xlu1 %88   ;;  %v83_v0 = vpop.permute.xlu0 %82  }
  0x87   :  { %92 = vst.msk [vmem:[#allocation0 + $0x18] sm:$0x1] %vm90_vm13, %v89_v63   ;;  %vm198_vm13 = vcmask 540096  }
  0x88   :  { %85 = vst.msk [vmem:[#allocation0] sm:$0x1] %vm84_vm14, %v83_v0   ;;  %vm192_vm14 = vcmask 572896  }
  0x8a   :  { %v103_v1 = vpop.permute.xlu1 %102   ;;  %v96_v2 = vpop.permute.xlu0 %95  }
  0x8b   :  { %106 = vst.msk [vmem:[#allocation0 + $0x8] sm:$0x1] %vm104_vm15, %v103_v1   ;;  %vm212_vm15 = vcmask 507296  }
  0x8c   :  { %99 = vst.msk [vmem:[#allocation0 + $0x10] sm:$0x1] %vm97_vm0, %v96_v2   ;;  %vm205_vm0 = vcmask 523696  }
  0x8e   :  { %v116_v3 = vpop.permute.xlu1 %115   ;;  %v110_v4 = vpop.permute.xlu0 %109  }
  0x8f   :  { %119 = vst.msk [vmem:[#allocation0 + $0x18] sm:$0x1] %vm117_vm1, %v116_v3   ;;  %vm225_vm1 = vcmask 458096  }
  0x90   :  { %112 = vst.msk [vmem:[#allocation0] sm:$0x1] %vm111_vm2, %v110_v4   ;;  %vm219_vm2 = vcmask 490896  }
  0x92   :  { %v130_v5 = vpop.permute.xlu1 %129   ;;  %v123_v6 = vpop.permute.xlu0 %122  }
  0x93   :  { %133 = vst.msk [vmem:[#allocation0 + $0x8] sm:$0x1] %vm131_vm3, %v130_v5   ;;  %vm239_vm3 = vcmask 425296  }
  0x94   :  { %126 = vst.msk [vmem:[#allocation0 + $0x10] sm:$0x1] %vm124_vm4, %v123_v6   ;;  %vm232_vm4 = vcmask 441696  }
  0x96   :  { %v143_v7 = vpop.permute.xlu1 %142   ;;  %v137_v8 = vpop.permute.xlu0 %136  }
  0x97   :  { %146 = vst.msk [vmem:[#allocation0 + $0x18] sm:$0x1] %vm144_vm5, %v143_v7   ;;  %vm252_vm5 = vcmask 376096  }
  0x98   :  { %139 = vst.msk [vmem:[#allocation0] sm:$0x1] %vm138_vm6, %v137_v8   ;;  %vm246_vm6 = vcmask 408896  }
  0x9a   :  { %v157_v9 = vpop.permute.xlu1 %156   ;;  %v150_v10 = vpop.permute.xlu0 %149  }
  0x9b   :  { %160 = vst.msk [vmem:[#allocation0 + $0x8] sm:$0x1] %vm158_vm7, %v157_v9   ;;  %vm266_vm7 = vcmask 343296  }
  0x9c   :  { %153 = vst.msk [vmem:[#allocation0 + $0x10] sm:$0x1] %vm151_vm8, %v150_v10   ;;  %vm259_vm8 = vcmask 359696  }
  0x9e   :  { %v170_v11 = vpop.permute.xlu1 %169   ;;  %v164_v12 = vpop.permute.xlu0 %163  }
  0x9f   :  { %173 = vst.msk [vmem:[#allocation0 + $0x18] sm:$0x1] %vm171_vm9, %v170_v11   ;;  %vm279_vm9 = vcmask 294096  }
  0xa0   :  { %166 = vst.msk [vmem:[#allocation0] sm:$0x1] %vm165_vm10, %v164_v12   ;;  %vm273_vm10 = vcmask 326896  }
  0xa2   :  { %v184_v13 = vpop.permute.xlu1 %183   ;;  %v177_v14 = vpop.permute.xlu0 %176  }
  0xa3   :  { %187 = vst.msk [vmem:[#allocation0 + $0x8] sm:$0x1] %vm185_vm11, %v184_v13   ;;  %vm293_vm11 = vcmask 261296  }
  0xa4   :  { %180 = vst.msk [vmem:[#allocation0 + $0x10] sm:$0x1] %vm178_vm12, %v177_v14   ;;  %vm286_vm12 = vcmask 277696  }
  0xa6   :  { %v197_v15 = vpop.permute.xlu1 %196   ;;  %v191_v16 = vpop.permute.xlu0 %190  }
  0xa7   :  { %200 = vst.msk [vmem:[#allocation0 + $0x18] sm:$0x1] %vm198_vm13, %v197_v15   ;;  %vm306_vm13 = vcmask 212096  }
  0xa8   :  { %193 = vst.msk [vmem:[#allocation0] sm:$0x1] %vm192_vm14, %v191_v16   ;;  %vm300_vm14 = vcmask 244896  }
  0xaa   :  { %v211_v17 = vpop.permute.xlu1 %210   ;;  %v204_v18 = vpop.permute.xlu0 %203  }
  0xab   :  { %214 = vst.msk [vmem:[#allocation0 + $0x8] sm:$0x1] %vm212_vm15, %v211_v17   ;;  %vm320_vm15 = vcmask 179296  }
  0xac   :  { %207 = vst.msk [vmem:[#allocation0 + $0x10] sm:$0x1] %vm205_vm0, %v204_v18   ;;  %vm313_vm0 = vcmask 195696  }
  0xae   :  { %v224_v19 = vpop.permute.xlu1 %223   ;;  %v218_v20 = vpop.permute.xlu0 %217  }
  0xaf   :  { %227 = vst.msk [vmem:[#allocation0 + $0x18] sm:$0x1] %vm225_vm1, %v224_v19   ;;  %vm333_vm1 = vcmask 130096  }
  0xb0   :  { %220 = vst.msk [vmem:[#allocation0] sm:$0x1] %vm219_vm2, %v218_v20   ;;  %vm327_vm2 = vcmask 162896  }
  0xb2   :  { %v238_v21 = vpop.permute.xlu1 %237   ;;  %v231_v22 = vpop.permute.xlu0 %230  }
  0xb3   :  { %241 = vst.msk [vmem:[#allocation0 + $0x8] sm:$0x1] %vm239_vm3, %v238_v21   ;;  %vm347_vm3 = vcmask 97296  }
  0xb4   :  { %234 = vst.msk [vmem:[#allocation0 + $0x10] sm:$0x1] %vm232_vm4, %v231_v22   ;;  %vm340_vm4 = vcmask 113696  }
  0xb6   :  { %v251_v23 = vpop.permute.xlu1 %250   ;;  %v245_v24 = vpop.permute.xlu0 %244  }
  0xb7   :  { %254 = vst.msk [vmem:[#allocation0 + $0x18] sm:$0x1] %vm252_vm5, %v251_v23  }
  0xb8   :  { %247 = vst.msk [vmem:[#allocation0] sm:$0x1] %vm246_vm6, %v245_v24  }
  0xba   :  { %v265_v25 = vpop.permute.xlu1 %264   ;;  %v258_v26 = vpop.permute.xlu0 %257  }
  0xbb   :  { %268 = vst.msk [vmem:[#allocation0 + $0x8] sm:$0x1] %vm266_vm7, %v265_v25  }
  0xbc   :  { %261 = vst.msk [vmem:[#allocation0 + $0x10] sm:$0x1] %vm259_vm8, %v258_v26  }
  0xbe   :  { %v278_v27 = vpop.permute.xlu1 %277   ;;  %v272_v28 = vpop.permute.xlu0 %271  }
  0xbf   :  { %281 = vst.msk [vmem:[#allocation0 + $0x18] sm:$0x1] %vm279_vm9, %v278_v27  }
  0xc0   :  { %274 = vst.msk [vmem:[#allocation0] sm:$0x1] %vm273_vm10, %v272_v28  }
  0xc2   :  { %v292_v29 = vpop.permute.xlu1 %291   ;;  %v285_v30 = vpop.permute.xlu0 %284  }
  0xc3   :  { %295 = vst.msk [vmem:[#allocation0 + $0x8] sm:$0x1] %vm293_vm11, %v292_v29  }
  0xc4   :  { %288 = vst.msk [vmem:[#allocation0 + $0x10] sm:$0x1] %vm286_vm12, %v285_v30  }
  0xc6   :  { %v305_v31 = vpop.permute.xlu1 %304   ;;  %v299_v32 = vpop.permute.xlu0 %298  }
  0xc7   :  { %308 = vst.msk [vmem:[#allocation0 + $0x18] sm:$0x1] %vm306_vm13, %v305_v31  }
  0xc8   :  { %301 = vst.msk [vmem:[#allocation0] sm:$0x1] %vm300_vm14, %v299_v32  }
  0xca   :  { %v319_v33 = vpop.permute.xlu1 %318   ;;  %v312_v34 = vpop.permute.xlu0 %311  }
  0xcb   :  { %322 = vst.msk [vmem:[#allocation0 + $0x8] sm:$0x1] %vm320_vm15, %v319_v33  }
  0xcc   :  { %315 = vst.msk [vmem:[#allocation0 + $0x10] sm:$0x1] %vm313_vm0, %v312_v34  }
  0xce   :  { %v332_v35 = vpop.permute.xlu1 %331   ;;  %v326_v36 = vpop.permute.xlu0 %325  }
  0xcf   :  { %335 = vst.msk [vmem:[#allocation0 + $0x18] sm:$0x1] %vm333_vm1, %v332_v35  }
  0xd0   :  { %328 = vst.msk [vmem:[#allocation0] sm:$0x1] %vm327_vm2, %v326_v36  }
  0xd2   :  { %v346_v37 = vpop.permute.xlu1 %345   ;;  %v339_v38 = vpop.permute.xlu0 %338  }
  0xd3   :  { %349 = vst.msk [vmem:[#allocation0 + $0x8] sm:$0x1] %vm347_vm3, %v346_v37  }
  0xd4   :  { %342 = vst.msk [vmem:[#allocation0 + $0x10] sm:$0x1] %vm340_vm4, %v339_v38  }
  0xd6   :  { %v368_v39 = vld [vmem:[#allocation0 + $0x18] sm:$0x1] }
  0xd7   :  { %428 = vst [vmem:[%s708_s1 + $0x3] sm:$0x1] %v368_v39  ;;  %v353_v40 = vld [vmem:[#allocation0] sm:$0x1] }
  0xd8   :  { %355 = vst [vmem:[%s708_s1] sm:$0x1] %v353_v40 }
  0xda   :  { %v357_v41 = vld [vmem:[#allocation0 + $0x8] sm:$0x1] }
  0xdb   :  { %426 = vst [vmem:[%s708_s1 + $0x1] sm:$0x1] %v357_v41  ;;  %v362_v42 = vld [vmem:[#allocation0 + $0x10] sm:$0x1] }
  0xdc   :  { %427 = vst [vmem:[%s708_s1 + $0x2] sm:$0x1] %v362_v42 }

// kernel: cifar_convnet_forward.1
= control target key start
LH: loop header
LB: loop body
LE: loop exit
PB: predicated region body
PF: predicated region fallthrough
CT: control target
= control target key end

     0   :  { %vm13982_vm0 = vmmov 0   ;;  %s17677_s1 = inlined_call_operand.vmem [shape: bf16[3712,512], index: 1, kind: input, shape index: {}]   ;;  %s17678_s0 = inlined_call_operand.vmem [shape: bf16[4,16,3712], index: 0, kind: input, shape index: {}]   ;;  %s17679_s3 = inlined_call_operand.vmem [shape: bf16[4,512,128], index: 3, kind: input, shape index: {}]   ;;  %s17680_s2 = inlined_call_operand.vmem [shape: f32[1,512], index: 2, kind: input, shape index: {}]   ;;  %s17681_s5 = inlined_call_operand.vmem [shape: bf16[128,128], index: 5, kind: input, shape index: {}]   ;;  %s17682_s7 = inlined_call_operand.vmem [shape: bf16[128,128], index: 7, kind: input, shape index: {}]   ;;  %s17683_s4 = inlined_call_operand.vmem [shape: f32[1,128], index: 4, kind: input, shape index: {}]   ;;  %s17684_s6 = inlined_call_operand.vmem [shape: f32[1,128], index: 6, kind: input, shape index: {}]   ;;  %s17685_s8 = inlined_call_operand.vmem [shape: f32[1,128], index: 8, kind: input, shape index: {}]   ;;  %s17686_s9 = inlined_call_operand.vmem [shape: f32[16,128], index: 9, kind: output, shape index: {}]  }
   0x1   :  { %v12264_v0 = vld [vmem:[%s17677_s1 + $0x4] ss:$16 sps:$4 sm:$0xff]   ;;  %v12266_v1 = vld [vmem:[%s17677_s1 + $0xc] ss:$16 sps:$4 sm:$0xff]   ;;  %v12268_v2 = vld [vmem:[%s17677_s1] ss:$16 sps:$4 sm:$0xff]  }
   0x2   :  { %6305 = vmatprep.subr.bf16.mxu0 %v12264_v0  ;;  %v12269_v3 = vld [vmem:[%s17677_s1 + $0x8] ss:$16 sps:$4 sm:$0xff]   ;;  %7400 = vmatprep.subr.bf16.mxu1 %v12266_v1  ;;  %v12270_v4 = vld [vmem:[%s17677_s1 + $0x24] ss:$16 sps:$4 sm:$0xff]   ;;  %v12272_v5 = vld [vmem:[%s17677_s1 + $0x2c] ss:$16 sps:$4 sm:$0xff]  }
   0x3   :  { %6306 = vmatpush1.bf16.msra.mxu0 %v12268_v2  ;;  %7401 = vmatpush1.bf16.msra.mxu1 %v12269_v3  ;;  %v12274_v6 = vld [vmem:[%s17677_s1 + $0x20] ss:$16 sps:$4 sm:$0xff]   ;;  %v12275_v7 = vld [vmem:[%s17677_s1 + $0x28] ss:$16 sps:$4 sm:$0xff]   ;;  %v12276_v8 = vld [vmem:[%s17677_s1 + $0x44] ss:$16 sps:$4 sm:$0xff]  }
   0x4   :  { %6307 = vmatprep.subr.bf16.mxu0 %v12270_v4  ;;  %7402 = vmatprep.subr.bf16.mxu1 %v12272_v5  ;;  %v12278_v9 = vld [vmem:[%s17677_s1 + $0x4c] ss:$16 sps:$4 sm:$0xff]   ;;  %v12280_v10 = vld [vmem:[%s17677_s1 + $0x40] ss:$16 sps:$4 sm:$0xff]   ;;  %v12281_v11 = vld [vmem:[%s17677_s1 + $0x48] ss:$16 sps:$4 sm:$0xff]  }
   0x5   :  { %v12282_v12 = vld [vmem:[%s17677_s1 + $0x64] ss:$16 sps:$4 sm:$0xff]   ;;  %v12284_v13 = vld [vmem:[%s17677_s1 + $0x6c] ss:$16 sps:$4 sm:$0xff]   ;;  %v12286_v14 = vld [vmem:[%s17677_s1 + $0x60] ss:$16 sps:$4 sm:$0xff]  }
   0x6   :  { %v12287_v15 = vld [vmem:[%s17677_s1 + $0x68] ss:$16 sps:$4 sm:$0xff]   ;;  %v12288_v16 = vld [vmem:[%s17677_s1 + $0x84] ss:$16 sps:$4 sm:$0xff]   ;;  %v12290_v17 = vld [vmem:[%s17677_s1 + $0x8c] ss:$16 sps:$4 sm:$0xff]  }
   0x7   :  { %6308 = vmatpush1.bf16.msra.mxu0 %v12274_v6  ;;  %7403 = vmatpush1.bf16.msra.mxu1 %v12275_v7  ;;  %v12292_v18 = vld [vmem:[%s17677_s1 + $0x80] ss:$16 sps:$4 sm:$0xff]   ;;  %v12293_v19 = vld [vmem:[%s17677_s1 + $0x88] ss:$16 sps:$4 sm:$0xff]   ;;  %v12294_v20 = vld [vmem:[%s17677_s1 + $0xa4] ss:$16 sps:$4 sm:$0xff]  }
   0x8   :  { %6309 = vmatprep.subr.bf16.mxu0 %v12276_v8  ;;  %7404 = vmatprep.subr.bf16.mxu1 %v12278_v9  ;;  %v12296_v21 = vld [vmem:[%s17677_s1 + $0xac] ss:$16 sps:$4 sm:$0xff]   ;;  %v12298_v22 = vld [vmem:[%s17677_s1 + $0xa0] ss:$16 sps:$4 sm:$0xff]   ;;  %v12299_v23 = vld [vmem:[%s17677_s1 + $0xa8] ss:$16 sps:$4 sm:$0xff]  }
   0x9   :  { %v12300_v24 = vld [vmem:[%s17677_s1 + $0xc4] ss:$16 sps:$4 sm:$0xff]   ;;  %v12302_v25 = vld [vmem:[%s17677_s1 + $0xcc] ss:$16 sps:$4 sm:$0xff]   ;;  %v12304_v26 = vld [vmem:[%s17677_s1 + $0xc0] ss:$16 sps:$4 sm:$0xff]  }
   0xa   :  { %v12305_v27 = vld [vmem:[%s17677_s1 + $0xc8] ss:$16 sps:$4 sm:$0xff]   ;;  %v12306_v28 = vld [vmem:[%s17677_s1 + $0xe4] ss:$16 sps:$4 sm:$0xff]   ;;  %v12308_v29 = vld [vmem:[%s17677_s1 + $0xec] ss:$16 sps:$4 sm:$0xff]  }
   0xb   :  { %6310 = vmatpush1.bf16.msra.mxu0 %v12280_v10  ;;  %7405 = vmatpush1.bf16.msra.mxu1 %v12281_v11  ;;  %v12310_v30 = vld [vmem:[%s17677_s1 + $0xe0] ss:$16 sps:$4 sm:$0xff]   ;;  %v12311_v31 = vld [vmem:[%s17677_s1 + $0xe8] ss:$16 sps:$4 sm:$0xff]   ;;  %v12312_v32 = vld [vmem:[%s17677_s1 + $0x104] ss:$16 sps:$4 sm:$0xff]  }
   0xc   :  { %6311 = vmatprep.subr.bf16.mxu0 %v12282_v12  ;;  %7406 = vmatprep.subr.bf16.mxu1 %v12284_v13  ;;  %v12314_v33 = vld [vmem:[%s17677_s1 + $0x10c] ss:$16 sps:$4 sm:$0xff]   ;;  %v12316_v34 = vld [vmem:[%s17677_s1 + $0x100] ss:$16 sps:$4 sm:$0xff]   ;;  %v12317_v35 = vld [vmem:[%s17677_s1 + $0x108] ss:$16 sps:$4 sm:$0xff]  }
   0xd   :  { %v12318_v36 = vld [vmem:[%s17677_s1 + $0x124] ss:$16 sps:$4 sm:$0xff]   ;;  %v12320_v37 = vld [vmem:[%s17677_s1 + $0x12c] ss:$16 sps:$4 sm:$0xff]   ;;  %v12322_v38 = vld [vmem:[%s17677_s1 + $0x120] ss:$16 sps:$4 sm:$0xff]  }
   0xe   :  { %v12323_v39 = vld [vmem:[%s17677_s1 + $0x128] ss:$16 sps:$4 sm:$0xff]   ;;  %v12324_v40 = vld [vmem:[%s17677_s1 + $0x144] ss:$16 sps:$4 sm:$0xff]   ;;  %v12326_v41 = vld [vmem:[%s17677_s1 + $0x14c] ss:$16 sps:$4 sm:$0xff]  }
   0xf   :  { %6312 = vmatpush1.bf16.msra.mxu0 %v12286_v14  ;;  %7407 = vmatpush1.bf16.msra.mxu1 %v12287_v15  ;;  %v12328_v42 = vld [vmem:[%s17677_s1 + $0x140] ss:$16 sps:$4 sm:$0xff]   ;;  %v12329_v43 = vld [vmem:[%s17677_s1 + $0x148] ss:$16 sps:$4 sm:$0xff]   ;;  %v12330_v44 = vld [vmem:[%s17677_s1 + $0x164] ss:$16 sps:$4 sm:$0xff]  }
  0x10   :  { %6313 = vmatprep.subr.bf16.mxu0 %v12288_v16  ;;  %7408 = vmatprep.subr.bf16.mxu1 %v12290_v17  ;;  %v12332_v45 = vld [vmem:[%s17677_s1 + $0x16c] ss:$16 sps:$4 sm:$0xff]   ;;  %v12334_v46 = vld [vmem:[%s17677_s1 + $0x160] ss:$16 sps:$4 sm:$0xff]   ;;  %v12335_v47 = vld [vmem:[%s17677_s1 + $0x168] ss:$16 sps:$4 sm:$0xff]  }
  0x11   :  { %v12362_v48 = vld [vmem:[%s17678_s0 + $0x4] ss:$116 sps:$4 sm:$0xff]   ;;  %v12338_v50 = vld [vmem:[%s17677_s1 + $0x18c] ss:$16 sps:$4 sm:$0xff]   ;;  %v12340_v51 = vld [vmem:[%s17677_s1 + $0x180] ss:$16 sps:$4 sm:$0xff]  }
  0x12   :  { %v12336_v49 = vld [vmem:[%s17677_s1 + $0x184] ss:$16 sps:$4 sm:$0xff]   ;;  %6337 = vmatprep.mubr.bf16.mxu0 %v12362_v48  ;;  %7432 = vmatprep.mubr.bf16.mxu1 %v12362_v48  ;;  %v12341_v52 = vld [vmem:[%s17677_s1 + $0x188] ss:$16 sps:$4 sm:$0xff]   ;;  %v12344_v54 = vld [vmem:[%s17677_s1 + $0x1ac] ss:$16 sps:$4 sm:$0xff]  }
  0x13   :  { %6314 = vmatpush1.bf16.msra.mxu0 %v12292_v18  ;;  %7409 = vmatpush1.bf16.msra.mxu1 %v12293_v19  ;;  %v12342_v53 = vld [vmem:[%s17677_s1 + $0x1a4] ss:$16 sps:$4 sm:$0xff]   ;;  %v12346_v55 = vld [vmem:[%s17677_s1 + $0x1a0] ss:$16 sps:$4 sm:$0xff]   ;;  %v12347_v56 = vld [vmem:[%s17677_s1 + $0x1a8] ss:$16 sps:$4 sm:$0xff]  }
  0x14   :  { %6315 = vmatprep.subr.bf16.mxu0 %v12294_v20  ;;  %7410 = vmatprep.subr.bf16.mxu1 %v12296_v21  ;;  %v12348_v57 = vld [vmem:[%s17677_s1 + $0x1c4] ss:$16 sps:$4 sm:$0xff]   ;;  %v12350_v58 = vld [vmem:[%s17677_s1 + $0x1cc] ss:$16 sps:$4 sm:$0xff]   ;;  %v12352_v59 = vld [vmem:[%s17677_s1 + $0x1c0] ss:$16 sps:$4 sm:$0xff]  }
  0x15   :  { %v12353_v60 = vld [vmem:[%s17677_s1 + $0x1c8] ss:$16 sps:$4 sm:$0xff]   ;;  %v12354_v61 = vld [vmem:[%s17677_s1 + $0x1e4] ss:$16 sps:$4 sm:$0xff]   ;;  %v12356_v62 = vld [vmem:[%s17677_s1 + $0x1ec] ss:$16 sps:$4 sm:$0xff]  }
  0x16   :  { %v12358_v63 = vld [vmem:[%s17677_s1 + $0x1e0] ss:$16 sps:$4 sm:$0xff]   ;;  %v12359_v0 = vld [vmem:[%s17677_s1 + $0x1e8] ss:$16 sps:$4 sm:$0xff]   ;;  %v12365_v1 = vld [vmem:[%s17677_s1 + $0x204] ss:$16 sps:$4 sm:$0xff]  }
  0x17   :  { %6316 = vmatpush1.bf16.msra.mxu0 %v12298_v22  ;;  %7411 = vmatpush1.bf16.msra.mxu1 %v12299_v23  ;;  %v12368_v2 = vld [vmem:[%s17677_s1 + $0x20c] ss:$16 sps:$4 sm:$0xff]   ;;  %v12360_v3 = vld [vmem:[%s17678_s0] ss:$116 sps:$4 sm:$0xff]   ;;  %v12366_v5 = vld [vmem:[%s17677_s1 + $0x208] ss:$16 sps:$4 sm:$0xff]  }
  0x18   :  { %6317 = vmatprep.subr.bf16.mxu0 %v12300_v24  ;;  %7412 = vmatprep.subr.bf16.mxu1 %v12302_v25  ;;  %v12363_v4 = vld [vmem:[%s17677_s1 + $0x200] ss:$16 sps:$4 sm:$0xff]   ;;  %v12371_v6 = vld [vmem:[%s17677_s1 + $0x224] ss:$16 sps:$4 sm:$0xff]   ;;  %v12374_v7 = vld [vmem:[%s17677_s1 + $0x22c] ss:$16 sps:$4 sm:$0xff]  }
  0x19   :  { %v12369_v8 = vld [vmem:[%s17677_s1 + $0x220] ss:$16 sps:$4 sm:$0xff]   ;;  %v12372_v9 = vld [vmem:[%s17677_s1 + $0x228] ss:$16 sps:$4 sm:$0xff]   ;;  %v12377_v10 = vld [vmem:[%s17677_s1 + $0x244] ss:$16 sps:$4 sm:$0xff]  }
  0x1a   :  { %v12380_v11 = vld [vmem:[%s17677_s1 + $0x24c] ss:$16 sps:$4 sm:$0xff]   ;;  %v12375_v12 = vld [vmem:[%s17677_s1 + $0x240] ss:$16 sps:$4 sm:$0xff]   ;;  %v12378_v14 = vld [vmem:[%s17677_s1 + $0x248] ss:$16 sps:$4 sm:$0xff]  }
  0x1b   :  { %6318 = vmatpush1.bf16.msra.mxu0 %v12304_v26  ;;  %7413 = vmatpush1.bf16.msra.mxu1 %v12305_v27  ;;  %v12423_v13 = vld [vmem:[%s17678_s0 + $0xec] ss:$116 sps:$4 sm:$0xff]   ;;  %v12383_v15 = vld [vmem:[%s17677_s1 + $0x264] ss:$16 sps:$4 sm:$0xff]   ;;  %v12431_v17 = vld [vmem:[%s17678_s0 + $0xe8] ss:$116 sps:$4 sm:$0xff]  }
  0x1c   :  { %6319 = vmatprep.subr.bf16.mxu0 %v12306_v28  ;;  %7414 = vmatprep.subr.bf16.mxu1 %v12308_v29  ;;  %v12386_v16 = vld [vmem:[%s17677_s1 + $0x26c] ss:$16 sps:$4 sm:$0xff]   ;;  %v12381_v18 = vld [vmem:[%s17677_s1 + $0x260] ss:$16 sps:$4 sm:$0xff]   ;;  %v12384_v19 = vld [vmem:[%s17677_s1 + $0x268] ss:$16 sps:$4 sm:$0xff]  }
  0x1d   :  { %v12389_v20 = vld [vmem:[%s17677_s1 + $0x284] ss:$16 sps:$4 sm:$0xff]   ;;  %v12392_v21 = vld [vmem:[%s17677_s1 + $0x28c] ss:$16 sps:$4 sm:$0xff]   ;;  %v12387_v23 = vld [vmem:[%s17677_s1 + $0x280] ss:$16 sps:$4 sm:$0xff]  }
  0x1e   :  { %v12438_v22 = vld [vmem:[%s17678_s0 + $0x1d4] ss:$116 sps:$4 sm:$0xff]   ;;  %v12398_v26 = vld [vmem:[%s17677_s1 + $0x2ac] ss:$16 sps:$4 sm:$0xff]   ;;  %v12393_v27 = vld [vmem:[%s17677_s1 + $0x2a0] ss:$16 sps:$4 sm:$0xff]  }
  0x1f   :  { %6320 = vmatpush1.bf16.msra.mxu0 %v12310_v30  ;;  %7415 = vmatpush1.bf16.msra.mxu1 %v12311_v31  ;;  %v12390_v24 = vld [vmem:[%s17677_s1 + $0x288] ss:$16 sps:$4 sm:$0xff]   ;;  %v12395_v25 = vld [vmem:[%s17677_s1 + $0x2a4] ss:$16 sps:$4 sm:$0xff]   ;;  %v12453_v31 = vld [vmem:[%s17678_s0 + $0x2bc] ss:$116 sps:$4 sm:$0xff]  }
  0x20   :  { %6321 = vmatprep.subr.bf16.mxu0 %v12312_v32  ;;  %7416 = vmatprep.subr.bf16.mxu1 %v12314_v33  ;;  %v12446_v28 = vld [vmem:[%s17678_s0 + $0x1d0] ss:$116 sps:$4 sm:$0xff]   ;;  %v12396_v29 = vld [vmem:[%s17677_s1 + $0x2a8] ss:$16 sps:$4 sm:$0xff]   ;;  %v12404_v32 = vld [vmem:[%s17677_s1 + $0x2cc] ss:$16 sps:$4 sm:$0xff]  }
  0x21   :  { %v12401_v30 = vld [vmem:[%s17677_s1 + $0x2c4] ss:$16 sps:$4 sm:$0xff]   ;;  %v12399_v33 = vld [vmem:[%s17677_s1 + $0x2c0] ss:$16 sps:$4 sm:$0xff]   ;;  %v12420_v48 = vld [vmem:[%s17677_s1 + $0x328] ss:$16 sps:$4 sm:$0xff]  }
  0x23   :  { %6322 = vmatpush1.bf16.msra.mxu0 %v12316_v34  ;;  %7417 = vmatpush1.bf16.msra.mxu1 %v12317_v35  ;;  %v12402_v34 = vld [vmem:[%s17677_s1 + $0x2c8] ss:$16 sps:$4 sm:$0xff]   ;;  %v12407_v35 = vld [vmem:[%s17677_s1 + $0x2e4] ss:$16 sps:$4 sm:$0xff]  }
  0x24   :  { %6323 = vmatprep.subr.bf16.mxu0 %v12318_v36  ;;  %7418 = vmatprep.subr.bf16.mxu1 %v12320_v37  ;;  %v12410_v36 = vld [vmem:[%s17677_s1 + $0x2ec] ss:$16 sps:$4 sm:$0xff]   ;;  %v12405_v37 = vld [vmem:[%s17677_s1 + $0x2e0] ss:$16 sps:$4 sm:$0xff]  }
  0x27   :  { %6324 = vmatpush1.bf16.msra.mxu0 %v12322_v38  ;;  %7419 = vmatpush1.bf16.msra.mxu1 %v12323_v39  ;;  %v12461_v38 = vld [vmem:[%s17678_s0 + $0x2b8] ss:$116 sps:$4 sm:$0xff]  }
  0x28   :  { %6325 = vmatprep.subr.bf16.mxu0 %v12324_v40  ;;  %7420 = vmatprep.subr.bf16.mxu1 %v12326_v41  ;;  %v12408_v39 = vld [vmem:[%s17677_s1 + $0x2e8] ss:$16 sps:$4 sm:$0xff]   ;;  %v12470_v40 = vld [vmem:[%s17678_s0 + $0xc] ss:$116 sps:$4 sm:$0xff]   ;;  %v12413_v41 = vld [vmem:[%s17677_s1 + $0x304] ss:$16 sps:$4 sm:$0xff]  }
  0x2b   :  { %6326 = vmatpush1.bf16.msra.mxu0 %v12328_v42  ;;  %7421 = vmatpush1.bf16.msra.mxu1 %v12329_v43  ;;  %v12416_v42 = vld [vmem:[%s17677_s1 + $0x30c] ss:$16 sps:$4 sm:$0xff]   ;;  %v12411_v43 = vld [vmem:[%s17677_s1 + $0x300] ss:$16 sps:$4 sm:$0xff]  }
  0x2c   :  { %6327 = vmatprep.subr.bf16.mxu0 %v12330_v44  ;;  %7422 = vmatprep.subr.bf16.mxu1 %v12332_v45  ;;  %v12414_v44 = vld [vmem:[%s17677_s1 + $0x308] ss:$16 sps:$4 sm:$0xff]   ;;  %v12419_v45 = vld [vmem:[%s17677_s1 + $0x324] ss:$16 sps:$4 sm:$0xff]  }
  0x2f   :  { %6328 = vmatpush1.bf16.msra.mxu0 %v12334_v46  ;;  %7423 = vmatpush1.bf16.msra.mxu1 %v12335_v47  ;;  %v12422_v46 = vld [vmem:[%s17677_s1 + $0x32c] ss:$16 sps:$4 sm:$0xff]   ;;  %v12417_v47 = vld [vmem:[%s17677_s1 + $0x320] ss:$16 sps:$4 sm:$0xff]  }
  0x30   :  { %6329 = vmatprep.subr.bf16.mxu0 %v12336_v49  ;;  %7424 = vmatprep.subr.bf16.mxu1 %v12338_v50  ;;  %v12427_v49 = vld [vmem:[%s17677_s1 + $0x344] ss:$16 sps:$4 sm:$0xff]   ;;  %v12430_v50 = vld [vmem:[%s17677_s1 + $0x34c] ss:$16 sps:$4 sm:$0xff]  }
  0x33   :  { %6330 = vmatpush1.bf16.msra.mxu0 %v12340_v51  ;;  %7425 = vmatpush1.bf16.msra.mxu1 %v12341_v52  ;;  %v12425_v51 = vld [vmem:[%s17677_s1 + $0x340] ss:$16 sps:$4 sm:$0xff]   ;;  %v12428_v52 = vld [vmem:[%s17677_s1 + $0x348] ss:$16 sps:$4 sm:$0xff]  }
  0x34   :  { %6331 = vmatprep.subr.bf16.mxu0 %v12342_v53  ;;  %7426 = vmatprep.subr.bf16.mxu1 %v12344_v54  ;;  %v12434_v53 = vld [vmem:[%s17677_s1 + $0x364] ss:$16 sps:$4 sm:$0xff]   ;;  %v12437_v54 = vld [vmem:[%s17677_s1 + $0x36c] ss:$16 sps:$4 sm:$0xff]  }
  0x37   :  { %6332 = vmatpush1.bf16.msra.mxu0 %v12346_v55  ;;  %7427 = vmatpush1.bf16.msra.mxu1 %v12347_v56  ;;  %v12432_v55 = vld [vmem:[%s17677_s1 + $0x360] ss:$16 sps:$4 sm:$0xff]   ;;  %v12435_v56 = vld [vmem:[%s17677_s1 + $0x368] ss:$16 sps:$4 sm:$0xff]  }
  0x38   :  { %6333 = vmatprep.subr.bf16.mxu0 %v12348_v57  ;;  %7428 = vmatprep.subr.bf16.mxu1 %v12350_v58  ;;  %v12442_v57 = vld [vmem:[%s17677_s1 + $0x384] ss:$16 sps:$4 sm:$0xff]   ;;  %v12445_v58 = vld [vmem:[%s17677_s1 + $0x38c] ss:$16 sps:$4 sm:$0xff]  }
  0x3b   :  { %6334 = vmatpush1.bf16.msra.mxu0 %v12352_v59  ;;  %7429 = vmatpush1.bf16.msra.mxu1 %v12353_v60  ;;  %v12440_v59 = vld [vmem:[%s17677_s1 + $0x380] ss:$16 sps:$4 sm:$0xff]   ;;  %v12443_v60 = vld [vmem:[%s17677_s1 + $0x388] ss:$16 sps:$4 sm:$0xff]  }
  0x3c   :  { %6335 = vmatprep.subr.bf16.mxu0 %v12354_v61  ;;  %7430 = vmatprep.subr.bf16.mxu1 %v12356_v62  ;;  %v12449_v61 = vld [vmem:[%s17677_s1 + $0x3a4] ss:$16 sps:$4 sm:$0xff]   ;;  %v12452_v62 = vld [vmem:[%s17677_s1 + $0x3ac] ss:$16 sps:$4 sm:$0xff]  }
  0x3f   :  { %6336 = vmatpush1.bf16.msra.mxu0 %v12358_v63  ;;  %7431 = vmatpush1.bf16.msra.mxu1 %v12359_v0  ;;  %v12447_v63 = vld [vmem:[%s17677_s1 + $0x3a0] ss:$16 sps:$4 sm:$0xff]   ;;  %v12450_v0 = vld [vmem:[%s17677_s1 + $0x3a8] ss:$16 sps:$4 sm:$0xff]  }
  0x40   :  { %6378 = vmatprep.subr.bf16.mxu0 %v12365_v1  ;;  %7473 = vmatprep.subr.bf16.mxu1 %v12368_v2  ;;  %v12457_v1 = vld [vmem:[%s17677_s1 + $0x3c4] ss:$16 sps:$4 sm:$0xff]   ;;  %v12460_v2 = vld [vmem:[%s17677_s1 + $0x3cc] ss:$16 sps:$4 sm:$0xff]  }
  0x42   :  { %6338 = vmatmul.mubr.bf16.vlgmr.msra.gmra.mrb[0].mxu0 %v12360_v3  ;;  %7433 = vmatmul.mubr.bf16.vlgmr.msra.gmra.mrb[0].mxu1 %v12360_v3  ;;  %v12455_v3 = vld [vmem:[%s17677_s1 + $0x3c0] ss:$16 sps:$4 sm:$0xff]  }
  0x43   :  { %6379 = vmatpush1.bf16.msra.mxu0 %v12363_v4  ;;  %7474 = vmatpush1.bf16.msra.mxu1 %v12366_v5  ;;  %v12458_v4 = vld [vmem:[%s17677_s1 + $0x3c8] ss:$16 sps:$4 sm:$0xff]   ;;  %v12464_v5 = vld [vmem:[%s17677_s1 + $0x3e4] ss:$16 sps:$4 sm:$0xff]  }
  0x44   :  { %6380 = vmatprep.subr.bf16.mxu0 %v12371_v6  ;;  %7475 = vmatprep.subr.bf16.mxu1 %v12374_v7  ;;  %v12467_v6 = vld [vmem:[%s17677_s1 + $0x3ec] ss:$16 sps:$4 sm:$0xff]   ;;  %v12462_v7 = vld [vmem:[%s17677_s1 + $0x3e0] ss:$16 sps:$4 sm:$0xff]  }
  0x45   :  { %6347 = vmatprep.mubr.bf16.mxu0 %v12423_v13  ;;  %7442 = vmatprep.mubr.bf16.mxu1 %v12423_v13  ;;  %v12474_v13 = vld [vmem:[%s17677_s1 + $0x408] ss:$16 sps:$4 sm:$0xff]  }
  0x47   :  { %6381 = vmatpush1.bf16.msra.mxu0 %v12369_v8  ;;  %7476 = vmatpush1.bf16.msra.mxu1 %v12372_v9  ;;  %v12465_v8 = vld [vmem:[%s17677_s1 + $0x3e8] ss:$16 sps:$4 sm:$0xff]   ;;  %v12473_v9 = vld [vmem:[%s17677_s1 + $0x404] ss:$16 sps:$4 sm:$0xff]  }
  0x48   :  { %6382 = vmatprep.subr.bf16.mxu0 %v12377_v10  ;;  %7477 = vmatprep.subr.bf16.mxu1 %v12380_v11  ;;  %v12476_v10 = vld [vmem:[%s17677_s1 + $0x40c] ss:$16 sps:$4 sm:$0xff]  }
  0x49   :  { %v12468_v11 = vld [vmem:[%s17678_s0 + $0x8] ss:$116 sps:$4 sm:$0xff]  }
  0x4a   :  { %6348 = vmatmul.mubr.bf16.gmra.mrb[4].mxu0 %v12431_v17  ;;  %7443 = vmatmul.mubr.bf16.gmra.mrb[4].mxu1 %v12431_v17  ;;  %v12477_v17 = vld [vmem:[%s17677_s1 + $0x420] ss:$16 sps:$4 sm:$0xff]  }
  0x4b   :  { %6383 = vmatpush1.bf16.msra.mxu0 %v12375_v12  ;;  %7478 = vmatpush1.bf16.msra.mxu1 %v12378_v14  ;;  %v12471_v12 = vld [vmem:[%s17677_s1 + $0x400] ss:$16 sps:$4 sm:$0xff]   ;;  %v12479_v14 = vld [vmem:[%s17677_s1 + $0x424] ss:$16 sps:$4 sm:$0xff]  }
  0x4c   :  { %6384 = vmatprep.subr.bf16.mxu0 %v12383_v15  ;;  %7479 = vmatprep.subr.bf16.mxu1 %v12386_v16  ;;  %v12482_v15 = vld [vmem:[%s17677_s1 + $0x42c] ss:$16 sps:$4 sm:$0xff]   ;;  %v12531_v16 = vld [vmem:[%s17678_s0 + $0xf4] ss:$116 sps:$4 sm:$0xff]  }
  0x4d   :  { %6357 = vmatprep.mubr.bf16.mxu0 %v12438_v22  ;;  %7452 = vmatprep.mubr.bf16.mxu1 %v12438_v22  ;;  %v12486_v22 = vld [vmem:[%s17677_s1 + $0x448] ss:$16 sps:$4 sm:$0xff]  }
  0x4f   :  { %6385 = vmatpush1.bf16.msra.mxu0 %v12381_v18  ;;  %7480 = vmatpush1.bf16.msra.mxu1 %v12384_v19  ;;  %v12480_v18 = vld [vmem:[%s17677_s1 + $0x428] ss:$16 sps:$4 sm:$0xff]   ;;  %v12485_v19 = vld [vmem:[%s17677_s1 + $0x444] ss:$16 sps:$4 sm:$0xff]  }
  0x50   :  { %6386 = vmatprep.subr.bf16.mxu0 %v12389_v20  ;;  %7481 = vmatprep.subr.bf16.mxu1 %v12392_v21  ;;  %v12488_v20 = vld [vmem:[%s17677_s1 + $0x44c] ss:$16 sps:$4 sm:$0xff]   ;;  %v12483_v21 = vld [vmem:[%s17677_s1 + $0x440] ss:$16 sps:$4 sm:$0xff]  }
  0x52   :  { %6358 = vmatmul.mubr.bf16.gmra.mrb[8].mxu0 %v12446_v28  ;;  %7453 = vmatmul.mubr.bf16.gmra.mrb[8].mxu1 %v12446_v28  ;;  %v12492_v28 = vld [vmem:[%s17677_s1 + $0x468] ss:$16 sps:$4 sm:$0xff]  }
  0x53   :  { %6387 = vmatpush1.bf16.msra.mxu0 %v12387_v23  ;;  %7482 = vmatpush1.bf16.msra.mxu1 %v12390_v24  ;;  %v12539_v23 = vld [vmem:[%s17678_s0 + $0xf0] ss:$116 sps:$4 sm:$0xff]  }
  0x54   :  { %6388 = vmatprep.subr.bf16.mxu0 %v12395_v25  ;;  %7483 = vmatprep.subr.bf16.mxu1 %v12398_v26  ;;  %v12491_v24 = vld [vmem:[%s17677_s1 + $0x464] ss:$16 sps:$4 sm:$0xff]   ;;  %v12494_v25 = vld [vmem:[%s17677_s1 + $0x46c] ss:$16 sps:$4 sm:$0xff]  }
  0x55   :  { %6367 = vmatprep.mubr.bf16.mxu0 %v12453_v31  ;;  %7462 = vmatprep.mubr.bf16.mxu1 %v12453_v31  ;;  %v12546_v26 = vld [vmem:[%s17678_s0 + $0x1dc] ss:$116 sps:$4 sm:$0xff]  }
  0x56   :  { %v12495_v31 = vld [vmem:[%s17677_s1 + $0x480] ss:$16 sps:$4 sm:$0xff]  }
  0x57   :  { %6389 = vmatpush1.bf16.msra.mxu0 %v12393_v27  ;;  %7484 = vmatpush1.bf16.msra.mxu1 %v12396_v29  ;;  %v12489_v27 = vld [vmem:[%s17677_s1 + $0x460] ss:$16 sps:$4 sm:$0xff]   ;;  %v12497_v29 = vld [vmem:[%s17677_s1 + $0x484] ss:$16 sps:$4 sm:$0xff]  }
  0x58   :  { %6390 = vmatprep.subr.bf16.mxu0 %v12401_v30  ;;  %7485 = vmatprep.subr.bf16.mxu1 %v12404_v32  ;;  %v12500_v30 = vld [vmem:[%s17677_s1 + $0x48c] ss:$16 sps:$4 sm:$0xff]   ;;  %v12498_v32 = vld [vmem:[%s17677_s1 + $0x488] ss:$16 sps:$4 sm:$0xff]  }
  0x5a   :  { %6368 = vmatmul.mubr.bf16.gmra.mrb[12].mxu0 %v12461_v38  ;;  %7463 = vmatmul.mubr.bf16.gmra.mrb[12].mxu1 %v12461_v38  ;;  %v12504_v38 = vld [vmem:[%s17677_s1 + $0x4a8] ss:$16 sps:$4 sm:$0xff]  }
  0x5b   :  { %6391 = vmatpush1.bf16.msra.mxu0 %v12399_v33  ;;  %7486 = vmatpush1.bf16.msra.mxu1 %v12402_v34  ;;  %v12554_v33 = vld [vmem:[%s17678_s0 + $0x1d8] ss:$116 sps:$4 sm:$0xff]   ;;  %v12503_v34 = vld [vmem:[%s17677_s1 + $0x4a4] ss:$16 sps:$4 sm:$0xff]  }
  0x5c   :  { %6392 = vmatprep.subr.bf16.mxu0 %v12407_v35  ;;  %7487 = vmatprep.subr.bf16.mxu1 %v12410_v36  ;;  %v12506_v35 = vld [vmem:[%s17677_s1 + $0x4ac] ss:$16 sps:$4 sm:$0xff]   ;;  %v12561_v36 = vld [vmem:[%s17678_s0 + $0x2c4] ss:$116 sps:$4 sm:$0xff]  }
  0x5d   :  { %6410 = vmatprep.mubr.bf16.mxu0 %v12470_v40  ;;  %7505 = vmatprep.mubr.bf16.mxu1 %v12470_v40  ;;  %v12512_v40 = vld [vmem:[%s17677_s1 + $0x4cc] ss:$16 sps:$4 sm:$0xff]  }
  0x5f   :  { %6393 = vmatpush1.bf16.msra.mxu0 %v12405_v37  ;;  %7488 = vmatpush1.bf16.msra.mxu1 %v12408_v39  ;;  %v12501_v37 = vld [vmem:[%s17677_s1 + $0x4a0] ss:$16 sps:$4 sm:$0xff]   ;;  %v12509_v39 = vld [vmem:[%s17677_s1 + $0x4c4] ss:$16 sps:$4 sm:$0xff]  }
  0x60   :  { %6394 = vmatprep.subr.bf16.mxu0 %v12413_v41  ;;  %7489 = vmatprep.subr.bf16.mxu1 %v12416_v42  ;;  %v12507_v41 = vld [vmem:[%s17677_s1 + $0x4c0] ss:$16 sps:$4 sm:$0xff]   ;;  %v12510_v42 = vld [vmem:[%s17677_s1 + $0x4c8] ss:$16 sps:$4 sm:$0xff]  }
  0x63   :  { %6395 = vmatpush1.bf16.msra.mxu0 %v12411_v43  ;;  %7490 = vmatpush1.bf16.msra.mxu1 %v12414_v44  ;;  %v12569_v43 = vld [vmem:[%s17678_s0 + $0x2c0] ss:$116 sps:$4 sm:$0xff]  }
  0x64   :  { %6396 = vmatprep.subr.bf16.mxu0 %v12419_v45  ;;  %7491 = vmatprep.subr.bf16.mxu1 %v12422_v46  ;;  %v12515_v44 = vld [vmem:[%s17677_s1 + $0x4e4] ss:$16 sps:$4 sm:$0xff]   ;;  %v12518_v45 = vld [vmem:[%s17677_s1 + $0x4ec] ss:$16 sps:$4 sm:$0xff]  }
  0x65   :  { %v12578_v46 = vld [vmem:[%s17678_s0 + $0x14] ss:$116 sps:$4 sm:$0xff]  }
  0x67   :  { %6397 = vmatpush1.bf16.msra.mxu0 %v12417_v47  ;;  %7492 = vmatpush1.bf16.msra.mxu1 %v12420_v48  ;;  %v12513_v47 = vld [vmem:[%s17677_s1 + $0x4e0] ss:$16 sps:$4 sm:$0xff]   ;;  %v12516_v48 = vld [vmem:[%s17677_s1 + $0x4e8] ss:$16 sps:$4 sm:$0xff]  }
  0x68   :  { %6398 = vmatprep.subr.bf16.mxu0 %v12427_v49  ;;  %7493 = vmatprep.subr.bf16.mxu1 %v12430_v50  ;;  %v12521_v49 = vld [vmem:[%s17677_s1 + $0x504] ss:$16 sps:$4 sm:$0xff]   ;;  %v12524_v50 = vld [vmem:[%s17677_s1 + $0x50c] ss:$16 sps:$4 sm:$0xff]  }
  0x6b   :  { %6399 = vmatpush1.bf16.msra.mxu0 %v12425_v51  ;;  %7494 = vmatpush1.bf16.msra.mxu1 %v12428_v52  ;;  %v12519_v51 = vld [vmem:[%s17677_s1 + $0x500] ss:$16 sps:$4 sm:$0xff]   ;;  %v12522_v52 = vld [vmem:[%s17677_s1 + $0x508] ss:$16 sps:$4 sm:$0xff]  }
  0x6c   :  { %6400 = vmatprep.subr.bf16.mxu0 %v12434_v53  ;;  %7495 = vmatprep.subr.bf16.mxu1 %v12437_v54  ;;  %v12527_v53 = vld [vmem:[%s17677_s1 + $0x524] ss:$16 sps:$4 sm:$0xff]   ;;  %v12530_v54 = vld [vmem:[%s17677_s1 + $0x52c] ss:$16 sps:$4 sm:$0xff]  }
  0x6f   :  { %6401 = vmatpush1.bf16.msra.mxu0 %v12432_v55  ;;  %7496 = vmatpush1.bf16.msra.mxu1 %v12435_v56  ;;  %v12525_v55 = vld [vmem:[%s17677_s1 + $0x520] ss:$16 sps:$4 sm:$0xff]   ;;  %v12528_v56 = vld [vmem:[%s17677_s1 + $0x528] ss:$16 sps:$4 sm:$0xff]  }
  0x70   :  { %6402 = vmatprep.subr.bf16.mxu0 %v12442_v57  ;;  %7497 = vmatprep.subr.bf16.mxu1 %v12445_v58  ;;  %v12535_v57 = vld [vmem:[%s17677_s1 + $0x544] ss:$16 sps:$4 sm:$0xff]   ;;  %v12538_v58 = vld [vmem:[%s17677_s1 + $0x54c] ss:$16 sps:$4 sm:$0xff]  }
  0x73   :  { %6403 = vmatpush1.bf16.msra.mxu0 %v12440_v59  ;;  %7498 = vmatpush1.bf16.msra.mxu1 %v12443_v60  ;;  %v12533_v59 = vld [vmem:[%s17677_s1 + $0x540] ss:$16 sps:$4 sm:$0xff]   ;;  %v12536_v60 = vld [vmem:[%s17677_s1 + $0x548] ss:$16 sps:$4 sm:$0xff]  }
  0x74   :  { %6404 = vmatprep.subr.bf16.mxu0 %v12449_v61  ;;  %7499 = vmatprep.subr.bf16.mxu1 %v12452_v62  ;;  %v12542_v61 = vld [vmem:[%s17677_s1 + $0x564] ss:$16 sps:$4 sm:$0xff]   ;;  %v12545_v62 = vld [vmem:[%s17677_s1 + $0x56c] ss:$16 sps:$4 sm:$0xff]  }
  0x77   :  { %6405 = vmatpush1.bf16.msra.mxu0 %v12447_v63  ;;  %7500 = vmatpush1.bf16.msra.mxu1 %v12450_v0  ;;  %v12540_v63 = vld [vmem:[%s17677_s1 + $0x560] ss:$16 sps:$4 sm:$0xff]   ;;  %v12543_v0 = vld [vmem:[%s17677_s1 + $0x568] ss:$16 sps:$4 sm:$0xff]  }
  0x78   :  { %6406 = vmatprep.subr.bf16.mxu0 %v12457_v1  ;;  %7501 = vmatprep.subr.bf16.mxu1 %v12460_v2  ;;  %v12550_v1 = vld [vmem:[%s17677_s1 + $0x584] ss:$16 sps:$4 sm:$0xff]   ;;  %v12553_v2 = vld [vmem:[%s17677_s1 + $0x58c] ss:$16 sps:$4 sm:$0xff]  }
  0x7b   :  { %6407 = vmatpush1.bf16.msra.mxu0 %v12455_v3  ;;  %7502 = vmatpush1.bf16.msra.mxu1 %v12458_v4  ;;  %v12548_v3 = vld [vmem:[%s17677_s1 + $0x580] ss:$16 sps:$4 sm:$0xff]   ;;  %v12551_v4 = vld [vmem:[%s17677_s1 + $0x588] ss:$16 sps:$4 sm:$0xff]  }
  0x7c   :  { %6408 = vmatprep.subr.bf16.mxu0 %v12464_v5  ;;  %7503 = vmatprep.subr.bf16.mxu1 %v12467_v6  ;;  %v12557_v5 = vld [vmem:[%s17677_s1 + $0x5a4] ss:$16 sps:$4 sm:$0xff]   ;;  %v12560_v6 = vld [vmem:[%s17677_s1 + $0x5ac] ss:$16 sps:$4 sm:$0xff]  }
  0x7f   :  { %6409 = vmatpush1.bf16.msra.mxu0 %v12462_v7  ;;  %7504 = vmatpush1.bf16.msra.mxu1 %v12465_v8  ;;  %v12555_v7 = vld [vmem:[%s17677_s1 + $0x5a0] ss:$16 sps:$4 sm:$0xff]   ;;  %v12558_v8 = vld [vmem:[%s17677_s1 + $0x5a8] ss:$16 sps:$4 sm:$0xff]  }
  0x80   :  { %6451 = vmatprep.subr.bf16.mxu0 %v12473_v9  ;;  %7546 = vmatprep.subr.bf16.mxu1 %v12476_v10  ;;  %v12565_v9 = vld [vmem:[%s17677_s1 + $0x5c4] ss:$16 sps:$4 sm:$0xff]   ;;  %v12568_v10 = vld [vmem:[%s17677_s1 + $0x5cc] ss:$16 sps:$4 sm:$0xff]  }
  0x82   :  { %6411 = vmatmul.mubr.bf16.vlgmr.msra.gmra.mrb[0].mxu0 %v12468_v11  ;;  %7506 = vmatmul.mubr.bf16.vlgmr.msra.gmra.mrb[0].mxu1 %v12468_v11  ;;  %v12563_v11 = vld [vmem:[%s17677_s1 + $0x5c0] ss:$16 sps:$4 sm:$0xff]  }
  0x83   :  { %6452 = vmatpush1.bf16.msra.mxu0 %v12471_v12  ;;  %7547 = vmatpush1.bf16.msra.mxu1 %v12474_v13  ;;  %v12566_v12 = vld [vmem:[%s17677_s1 + $0x5c8] ss:$16 sps:$4 sm:$0xff]   ;;  %v12572_v13 = vld [vmem:[%s17677_s1 + $0x5e4] ss:$16 sps:$4 sm:$0xff]  }
  0x84   :  { %6453 = vmatprep.subr.bf16.mxu0 %v12479_v14  ;;  %7548 = vmatprep.subr.bf16.mxu1 %v12482_v15  ;;  %v12575_v14 = vld [vmem:[%s17677_s1 + $0x5ec] ss:$16 sps:$4 sm:$0xff]   ;;  %v12570_v15 = vld [vmem:[%s17677_s1 + $0x5e0] ss:$16 sps:$4 sm:$0xff]  }
  0x85   :  { %6420 = vmatprep.mubr.bf16.mxu0 %v12531_v16  ;;  %7515 = vmatprep.mubr.bf16.mxu1 %v12531_v16  ;;  %v12573_v16 = vld [vmem:[%s17677_s1 + $0x5e8] ss:$16 sps:$4 sm:$0xff]  }
  0x87   :  { %6454 = vmatpush1.bf16.msra.mxu0 %v12477_v17  ;;  %7549 = vmatpush1.bf16.msra.mxu1 %v12480_v18  ;;  %v12581_v17 = vld [vmem:[%s17677_s1 + $0x604] ss:$16 sps:$4 sm:$0xff]   ;;  %v12584_v18 = vld [vmem:[%s17677_s1 + $0x60c] ss:$16 sps:$4 sm:$0xff]  }
  0x88   :  { %6455 = vmatprep.subr.bf16.mxu0 %v12485_v19  ;;  %7550 = vmatprep.subr.bf16.mxu1 %v12488_v20  ;;  %v12576_v19 = vld [vmem:[%s17678_s0 + $0x10] ss:$116 sps:$4 sm:$0xff]  }
  0x89   :  { %v12579_v20 = vld [vmem:[%s17677_s1 + $0x600] ss:$16 sps:$4 sm:$0xff]  }
  0x8a   :  { %6421 = vmatmul.mubr.bf16.gmra.mrb[4].mxu0 %v12539_v23  ;;  %7516 = vmatmul.mubr.bf16.gmra.mrb[4].mxu1 %v12539_v23  ;;  %v12590_v23 = vld [vmem:[%s17677_s1 + $0x62c] ss:$16 sps:$4 sm:$0xff]  }
  0x8b   :  { %6456 = vmatpush1.bf16.msra.mxu0 %v12483_v21  ;;  %7551 = vmatpush1.bf16.msra.mxu1 %v12486_v22  ;;  %v12582_v21 = vld [vmem:[%s17677_s1 + $0x608] ss:$16 sps:$4 sm:$0xff]   ;;  %v12587_v22 = vld [vmem:[%s17677_s1 + $0x624] ss:$16 sps:$4 sm:$0xff]  }
  0x8c   :  { %6457 = vmatprep.subr.bf16.mxu0 %v12491_v24  ;;  %7552 = vmatprep.subr.bf16.mxu1 %v12494_v25  ;;  %v12639_v24 = vld [vmem:[%s17678_s0 + $0xfc] ss:$116 sps:$4 sm:$0xff]  }
  0x8d   :  { %6430 = vmatprep.mubr.bf16.mxu0 %v12546_v26  ;;  %7525 = vmatprep.mubr.bf16.mxu1 %v12546_v26  ;;  %v12585_v25 = vld [vmem:[%s17677_s1 + $0x620] ss:$16 sps:$4 sm:$0xff]   ;;  %v12588_v26 = vld [vmem:[%s17677_s1 + $0x628] ss:$16 sps:$4 sm:$0xff]  }
  0x8f   :  { %6458 = vmatpush1.bf16.msra.mxu0 %v12489_v27  ;;  %7553 = vmatpush1.bf16.msra.mxu1 %v12492_v28  ;;  %v12593_v27 = vld [vmem:[%s17677_s1 + $0x644] ss:$16 sps:$4 sm:$0xff]   ;;  %v12596_v28 = vld [vmem:[%s17677_s1 + $0x64c] ss:$16 sps:$4 sm:$0xff]  }
  0x90   :  { %6459 = vmatprep.subr.bf16.mxu0 %v12497_v29  ;;  %7554 = vmatprep.subr.bf16.mxu1 %v12500_v30  ;;  %v12591_v29 = vld [vmem:[%s17677_s1 + $0x640] ss:$16 sps:$4 sm:$0xff]   ;;  %v12594_v30 = vld [vmem:[%s17677_s1 + $0x648] ss:$16 sps:$4 sm:$0xff]  }
  0x92   :  { %6431 = vmatmul.mubr.bf16.gmra.mrb[8].mxu0 %v12554_v33  ;;  %7526 = vmatmul.mubr.bf16.gmra.mrb[8].mxu1 %v12554_v33  ;;  %v12602_v33 = vld [vmem:[%s17677_s1 + $0x66c] ss:$16 sps:$4 sm:$0xff]  }
  0x93   :  { %6460 = vmatpush1.bf16.msra.mxu0 %v12495_v31  ;;  %7555 = vmatpush1.bf16.msra.mxu1 %v12498_v32  ;;  %v12647_v31 = vld [vmem:[%s17678_s0 + $0xf8] ss:$116 sps:$4 sm:$0xff]   ;;  %v12599_v32 = vld [vmem:[%s17677_s1 + $0x664] ss:$16 sps:$4 sm:$0xff]  }
  0x94   :  { %6461 = vmatprep.subr.bf16.mxu0 %v12503_v34  ;;  %7556 = vmatprep.subr.bf16.mxu1 %v12506_v35  ;;  %v12654_v34 = vld [vmem:[%s17678_s0 + $0x1e4] ss:$116 sps:$4 sm:$0xff]   ;;  %v12597_v35 = vld [vmem:[%s17677_s1 + $0x660] ss:$16 sps:$4 sm:$0xff]  }
  0x95   :  { %6440 = vmatprep.mubr.bf16.mxu0 %v12561_v36  ;;  %7535 = vmatprep.mubr.bf16.mxu1 %v12561_v36  ;;  %v12600_v36 = vld [vmem:[%s17677_s1 + $0x668] ss:$16 sps:$4 sm:$0xff]  }
  0x97   :  { %6462 = vmatpush1.bf16.msra.mxu0 %v12501_v37  ;;  %7557 = vmatpush1.bf16.msra.mxu1 %v12504_v38  ;;  %v12605_v37 = vld [vmem:[%s17677_s1 + $0x684] ss:$16 sps:$4 sm:$0xff]   ;;  %v12608_v38 = vld [vmem:[%s17677_s1 + $0x68c] ss:$16 sps:$4 sm:$0xff]  }
  0x98   :  { %6463 = vmatprep.subr.bf16.mxu0 %v12509_v39  ;;  %7558 = vmatprep.subr.bf16.mxu1 %v12512_v40  ;;  %v12603_v39 = vld [vmem:[%s17677_s1 + $0x680] ss:$16 sps:$4 sm:$0xff]   ;;  %v12606_v40 = vld [vmem:[%s17677_s1 + $0x688] ss:$16 sps:$4 sm:$0xff]  }
  0x9a   :  { %6441 = vmatmul.mubr.bf16.gmra.mrb[12].mxu0 %v12569_v43  ;;  %7536 = vmatmul.mubr.bf16.gmra.mrb[12].mxu1 %v12569_v43  ;;  %v12614_v43 = vld [vmem:[%s17677_s1 + $0x6ac] ss:$16 sps:$4 sm:$0xff]  }
  0x9b   :  { %6464 = vmatpush1.bf16.msra.mxu0 %v12507_v41  ;;  %7559 = vmatpush1.bf16.msra.mxu1 %v12510_v42  ;;  %v12662_v41 = vld [vmem:[%s17678_s0 + $0x1e0] ss:$116 sps:$4 sm:$0xff]  }
  0x9c   :  { %6465 = vmatprep.subr.bf16.mxu0 %v12515_v44  ;;  %7560 = vmatprep.subr.bf16.mxu1 %v12518_v45  ;;  %v12611_v42 = vld [vmem:[%s17677_s1 + $0x6a4] ss:$16 sps:$4 sm:$0xff]   ;;  %v12669_v44 = vld [vmem:[%s17678_s0 + $0x2cc] ss:$116 sps:$4 sm:$0xff]  }
  0x9d   :  { %6483 = vmatprep.mubr.bf16.mxu0 %v12578_v46  ;;  %7578 = vmatprep.mubr.bf16.mxu1 %v12578_v46  ;;  %v12609_v45 = vld [vmem:[%s17677_s1 + $0x6a0] ss:$16 sps:$4 sm:$0xff]   ;;  %v12612_v46 = vld [vmem:[%s17677_s1 + $0x6a8] ss:$16 sps:$4 sm:$0xff]  }
  0x9f   :  { %6466 = vmatpush1.bf16.msra.mxu0 %v12513_v47  ;;  %7561 = vmatpush1.bf16.msra.mxu1 %v12516_v48  ;;  %v12617_v47 = vld [vmem:[%s17677_s1 + $0x6c4] ss:$16 sps:$4 sm:$0xff]   ;;  %v12620_v48 = vld [vmem:[%s17677_s1 + $0x6cc] ss:$16 sps:$4 sm:$0xff]  }
  0xa0   :  { %6467 = vmatprep.subr.bf16.mxu0 %v12521_v49  ;;  %7562 = vmatprep.subr.bf16.mxu1 %v12524_v50  ;;  %v12615_v49 = vld [vmem:[%s17677_s1 + $0x6c0] ss:$16 sps:$4 sm:$0xff]   ;;  %v12677_v50 = vld [vmem:[%s17678_s0 + $0x2c8] ss:$116 sps:$4 sm:$0xff]  }
  0xa3   :  { %6468 = vmatpush1.bf16.msra.mxu0 %v12519_v51  ;;  %7563 = vmatpush1.bf16.msra.mxu1 %v12522_v52  ;;  %v12618_v51 = vld [vmem:[%s17677_s1 + $0x6c8] ss:$16 sps:$4 sm:$0xff]   ;;  %v12623_v52 = vld [vmem:[%s17677_s1 + $0x6e4] ss:$16 sps:$4 sm:$0xff]  }
  0xa4   :  { %6469 = vmatprep.subr.bf16.mxu0 %v12527_v53  ;;  %7564 = vmatprep.subr.bf16.mxu1 %v12530_v54  ;;  %v12626_v53 = vld [vmem:[%s17677_s1 + $0x6ec] ss:$16 sps:$4 sm:$0xff]  }
  0xa5   :  { %v12686_v54 = vld [vmem:[%s17678_s0 + $0x1c] ss:$116 sps:$4 sm:$0xff]  }
  0xa7   :  { %6470 = vmatpush1.bf16.msra.mxu0 %v12525_v55  ;;  %7565 = vmatpush1.bf16.msra.mxu1 %v12528_v56  ;;  %v12621_v55 = vld [vmem:[%s17677_s1 + $0x6e0] ss:$16 sps:$4 sm:$0xff]   ;;  %v12624_v56 = vld [vmem:[%s17677_s1 + $0x6e8] ss:$16 sps:$4 sm:$0xff]  }
  0xa8   :  { %6471 = vmatprep.subr.bf16.mxu0 %v12535_v57  ;;  %7566 = vmatprep.subr.bf16.mxu1 %v12538_v58  ;;  %v12629_v57 = vld [vmem:[%s17677_s1 + $0x704] ss:$16 sps:$4 sm:$0xff]   ;;  %v12632_v58 = vld [vmem:[%s17677_s1 + $0x70c] ss:$16 sps:$4 sm:$0xff]  }
  0xab   :  { %6472 = vmatpush1.bf16.msra.mxu0 %v12533_v59  ;;  %7567 = vmatpush1.bf16.msra.mxu1 %v12536_v60  ;;  %v12627_v59 = vld [vmem:[%s17677_s1 + $0x700] ss:$16 sps:$4 sm:$0xff]   ;;  %v12630_v60 = vld [vmem:[%s17677_s1 + $0x708] ss:$16 sps:$4 sm:$0xff]  }
  0xac   :  { %6473 = vmatprep.subr.bf16.mxu0 %v12542_v61  ;;  %7568 = vmatprep.subr.bf16.mxu1 %v12545_v62  ;;  %v12635_v61 = vld [vmem:[%s17677_s1 + $0x724] ss:$16 sps:$4 sm:$0xff]   ;;  %v12638_v62 = vld [vmem:[%s17677_s1 + $0x72c] ss:$16 sps:$4 sm:$0xff]  }
  0xaf   :  { %6474 = vmatpush1.bf16.msra.mxu0 %v12540_v63  ;;  %7569 = vmatpush1.bf16.msra.mxu1 %v12543_v0  ;;  %v12633_v63 = vld [vmem:[%s17677_s1 + $0x720] ss:$16 sps:$4 sm:$0xff]   ;;  %v12636_v0 = vld [vmem:[%s17677_s1 + $0x728] ss:$16 sps:$4 sm:$0xff]  }
  0xb0   :  { %6475 = vmatprep.subr.bf16.mxu0 %v12550_v1  ;;  %7570 = vmatprep.subr.bf16.mxu1 %v12553_v2  ;;  %v12643_v1 = vld [vmem:[%s17677_s1 + $0x744] ss:$16 sps:$4 sm:$0xff]   ;;  %v12646_v2 = vld [vmem:[%s17677_s1 + $0x74c] ss:$16 sps:$4 sm:$0xff]  }
  0xb3   :  { %6476 = vmatpush1.bf16.msra.mxu0 %v12548_v3  ;;  %7571 = vmatpush1.bf16.msra.mxu1 %v12551_v4  ;;  %v12641_v3 = vld [vmem:[%s17677_s1 + $0x740] ss:$16 sps:$4 sm:$0xff]   ;;  %v12644_v4 = vld [vmem:[%s17677_s1 + $0x748] ss:$16 sps:$4 sm:$0xff]  }
  0xb4   :  { %6477 = vmatprep.subr.bf16.mxu0 %v12557_v5  ;;  %7572 = vmatprep.subr.bf16.mxu1 %v12560_v6  ;;  %v12650_v5 = vld [vmem:[%s17677_s1 + $0x764] ss:$16 sps:$4 sm:$0xff]   ;;  %v12653_v6 = vld [vmem:[%s17677_s1 + $0x76c] ss:$16 sps:$4 sm:$0xff]  }
  0xb7   :  { %6478 = vmatpush1.bf16.msra.mxu0 %v12555_v7  ;;  %7573 = vmatpush1.bf16.msra.mxu1 %v12558_v8  ;;  %v12648_v7 = vld [vmem:[%s17677_s1 + $0x760] ss:$16 sps:$4 sm:$0xff]   ;;  %v12651_v8 = vld [vmem:[%s17677_s1 + $0x768] ss:$16 sps:$4 sm:$0xff]  }
  0xb8   :  { %6479 = vmatprep.subr.bf16.mxu0 %v12565_v9  ;;  %7574 = vmatprep.subr.bf16.mxu1 %v12568_v10  ;;  %v12658_v9 = vld [vmem:[%s17677_s1 + $0x784] ss:$16 sps:$4 sm:$0xff]   ;;  %v12661_v10 = vld [vmem:[%s17677_s1 + $0x78c] ss:$16 sps:$4 sm:$0xff]  }
  0xbb   :  { %6480 = vmatpush1.bf16.msra.mxu0 %v12563_v11  ;;  %7575 = vmatpush1.bf16.msra.mxu1 %v12566_v12  ;;  %v12656_v11 = vld [vmem:[%s17677_s1 + $0x780] ss:$16 sps:$4 sm:$0xff]   ;;  %v12659_v12 = vld [vmem:[%s17677_s1 + $0x788] ss:$16 sps:$4 sm:$0xff]  }
  0xbc   :  { %6481 = vmatprep.subr.bf16.mxu0 %v12572_v13  ;;  %7576 = vmatprep.subr.bf16.mxu1 %v12575_v14  ;;  %v12665_v13 = vld [vmem:[%s17677_s1 + $0x7a4] ss:$16 sps:$4 sm:$0xff]   ;;  %v12668_v14 = vld [vmem:[%s17677_s1 + $0x7ac] ss:$16 sps:$4 sm:$0xff]  }
  0xbf   :  { %6482 = vmatpush1.bf16.msra.mxu0 %v12570_v15  ;;  %7577 = vmatpush1.bf16.msra.mxu1 %v12573_v16  ;;  %v12663_v15 = vld [vmem:[%s17677_s1 + $0x7a0] ss:$16 sps:$4 sm:$0xff]   ;;  %v12666_v16 = vld [vmem:[%s17677_s1 + $0x7a8] ss:$16 sps:$4 sm:$0xff]  }
  0xc0   :  { %6524 = vmatprep.subr.bf16.mxu0 %v12581_v17  ;;  %7619 = vmatprep.subr.bf16.mxu1 %v12584_v18  ;;  %v12673_v17 = vld [vmem:[%s17677_s1 + $0x7c4] ss:$16 sps:$4 sm:$0xff]   ;;  %v12676_v18 = vld [vmem:[%s17677_s1 + $0x7cc] ss:$16 sps:$4 sm:$0xff]  }
  0xc2   :  { %6484 = vmatmul.mubr.bf16.vlgmr.msra.gmra.mrb[0].mxu0 %v12576_v19  ;;  %7579 = vmatmul.mubr.bf16.vlgmr.msra.gmra.mrb[0].mxu1 %v12576_v19  ;;  %v12671_v19 = vld [vmem:[%s17677_s1 + $0x7c0] ss:$16 sps:$4 sm:$0xff]  }
  0xc3   :  { %6525 = vmatpush1.bf16.msra.mxu0 %v12579_v20  ;;  %7620 = vmatpush1.bf16.msra.mxu1 %v12582_v21  ;;  %v12674_v20 = vld [vmem:[%s17677_s1 + $0x7c8] ss:$16 sps:$4 sm:$0xff]   ;;  %v12680_v21 = vld [vmem:[%s17677_s1 + $0x7e4] ss:$16 sps:$4 sm:$0xff]  }
  0xc4   :  { %6526 = vmatprep.subr.bf16.mxu0 %v12587_v22  ;;  %7621 = vmatprep.subr.bf16.mxu1 %v12590_v23  ;;  %v12683_v22 = vld [vmem:[%s17677_s1 + $0x7ec] ss:$16 sps:$4 sm:$0xff]   ;;  %v12678_v23 = vld [vmem:[%s17677_s1 + $0x7e0] ss:$16 sps:$4 sm:$0xff]  }
  0xc5   :  { %6493 = vmatprep.mubr.bf16.mxu0 %v12639_v24  ;;  %7588 = vmatprep.mubr.bf16.mxu1 %v12639_v24  ;;  %v12681_v24 = vld [vmem:[%s17677_s1 + $0x7e8] ss:$16 sps:$4 sm:$0xff]  }
  0xc7   :  { %6527 = vmatpush1.bf16.msra.mxu0 %v12585_v25  ;;  %7622 = vmatpush1.bf16.msra.mxu1 %v12588_v26  ;;  %v12689_v25 = vld [vmem:[%s17677_s1 + $0x804] ss:$16 sps:$4 sm:$0xff]   ;;  %v12692_v26 = vld [vmem:[%s17677_s1 + $0x80c] ss:$16 sps:$4 sm:$0xff]  }
  0xc8   :  { %6528 = vmatprep.subr.bf16.mxu0 %v12593_v27  ;;  %7623 = vmatprep.subr.bf16.mxu1 %v12596_v28  ;;  %v12684_v27 = vld [vmem:[%s17678_s0 + $0x18] ss:$116 sps:$4 sm:$0xff]   ;;  %v12687_v28 = vld [vmem:[%s17677_s1 + $0x800] ss:$16 sps:$4 sm:$0xff]  }
  0xca   :  { %6494 = vmatmul.mubr.bf16.gmra.mrb[4].mxu0 %v12647_v31  ;;  %7589 = vmatmul.mubr.bf16.gmra.mrb[4].mxu1 %v12647_v31  ;;  %v12698_v31 = vld [vmem:[%s17677_s1 + $0x82c] ss:$16 sps:$4 sm:$0xff]  }
  0xcb   :  { %6529 = vmatpush1.bf16.msra.mxu0 %v12591_v29  ;;  %7624 = vmatpush1.bf16.msra.mxu1 %v12594_v30  ;;  %v12690_v29 = vld [vmem:[%s17677_s1 + $0x808] ss:$16 sps:$4 sm:$0xff]   ;;  %v12695_v30 = vld [vmem:[%s17677_s1 + $0x824] ss:$16 sps:$4 sm:$0xff]  }
  0xcc   :  { %6530 = vmatprep.subr.bf16.mxu0 %v12599_v32  ;;  %7625 = vmatprep.subr.bf16.mxu1 %v12602_v33  ;;  %v12747_v32 = vld [vmem:[%s17678_s0 + $0x104] ss:$116 sps:$4 sm:$0xff]   ;;  %v12693_v33 = vld [vmem:[%s17677_s1 + $0x820] ss:$16 sps:$4 sm:$0xff]  }
  0xcd   :  { %6503 = vmatprep.mubr.bf16.mxu0 %v12654_v34  ;;  %7598 = vmatprep.mubr.bf16.mxu1 %v12654_v34  ;;  %v12696_v34 = vld [vmem:[%s17677_s1 + $0x828] ss:$16 sps:$4 sm:$0xff]  }
  0xcf   :  { %6531 = vmatpush1.bf16.msra.mxu0 %v12597_v35  ;;  %7626 = vmatpush1.bf16.msra.mxu1 %v12600_v36  ;;  %v12701_v35 = vld [vmem:[%s17677_s1 + $0x844] ss:$16 sps:$4 sm:$0xff]   ;;  %v12704_v36 = vld [vmem:[%s17677_s1 + $0x84c] ss:$16 sps:$4 sm:$0xff]  }
  0xd0   :  { %6532 = vmatprep.subr.bf16.mxu0 %v12605_v37  ;;  %7627 = vmatprep.subr.bf16.mxu1 %v12608_v38  ;;  %v12699_v37 = vld [vmem:[%s17677_s1 + $0x840] ss:$16 sps:$4 sm:$0xff]  }
  0xd1   :  { %v12755_v38 = vld [vmem:[%s17678_s0 + $0x100] ss:$116 sps:$4 sm:$0xff]  }
  0xd2   :  { %6504 = vmatmul.mubr.bf16.gmra.mrb[8].mxu0 %v12662_v41  ;;  %7599 = vmatmul.mubr.bf16.gmra.mrb[8].mxu1 %v12662_v41  ;;  %v12710_v41 = vld [vmem:[%s17677_s1 + $0x86c] ss:$16 sps:$4 sm:$0xff]  }
  0xd3   :  { %6533 = vmatpush1.bf16.msra.mxu0 %v12603_v39  ;;  %7628 = vmatpush1.bf16.msra.mxu1 %v12606_v40  ;;  %v12702_v39 = vld [vmem:[%s17677_s1 + $0x848] ss:$16 sps:$4 sm:$0xff]   ;;  %v12707_v40 = vld [vmem:[%s17677_s1 + $0x864] ss:$16 sps:$4 sm:$0xff]  }
  0xd4   :  { %6534 = vmatprep.subr.bf16.mxu0 %v12611_v42  ;;  %7629 = vmatprep.subr.bf16.mxu1 %v12614_v43  ;;  %v12762_v42 = vld [vmem:[%s17678_s0 + $0x1ec] ss:$116 sps:$4 sm:$0xff]  }
  0xd5   :  { %6513 = vmatprep.mubr.bf16.mxu0 %v12669_v44  ;;  %7608 = vmatprep.mubr.bf16.mxu1 %v12669_v44  ;;  %v12705_v43 = vld [vmem:[%s17677_s1 + $0x860] ss:$16 sps:$4 sm:$0xff]   ;;  %v12708_v44 = vld [vmem:[%s17677_s1 + $0x868] ss:$16 sps:$4 sm:$0xff]  }
  0xd7   :  { %6535 = vmatpush1.bf16.msra.mxu0 %v12609_v45  ;;  %7630 = vmatpush1.bf16.msra.mxu1 %v12612_v46  ;;  %v12713_v45 = vld [vmem:[%s17677_s1 + $0x884] ss:$16 sps:$4 sm:$0xff]   ;;  %v12716_v46 = vld [vmem:[%s17677_s1 + $0x88c] ss:$16 sps:$4 sm:$0xff]  }
  0xd8   :  { %6536 = vmatprep.subr.bf16.mxu0 %v12617_v47  ;;  %7631 = vmatprep.subr.bf16.mxu1 %v12620_v48  ;;  %v12711_v47 = vld [vmem:[%s17677_s1 + $0x880] ss:$16 sps:$4 sm:$0xff]   ;;  %v12770_v48 = vld [vmem:[%s17678_s0 + $0x1e8] ss:$116 sps:$4 sm:$0xff]  }
  0xda   :  { %6514 = vmatmul.mubr.bf16.gmra.mrb[12].mxu0 %v12677_v50  ;;  %7609 = vmatmul.mubr.bf16.gmra.mrb[12].mxu1 %v12677_v50  ;;  %v12719_v50 = vld [vmem:[%s17677_s1 + $0x8a4] ss:$16 sps:$4 sm:$0xff]  }
  0xdb   :  { %6537 = vmatpush1.bf16.msra.mxu0 %v12615_v49  ;;  %7632 = vmatpush1.bf16.msra.mxu1 %v12618_v51  ;;  %v12714_v49 = vld [vmem:[%s17677_s1 + $0x888] ss:$16 sps:$4 sm:$0xff]   ;;  %v12722_v51 = vld [vmem:[%s17677_s1 + $0x8ac] ss:$16 sps:$4 sm:$0xff]  }
  0xdc   :  { %6538 = vmatprep.subr.bf16.mxu0 %v12623_v52  ;;  %7633 = vmatprep.subr.bf16.mxu1 %v12626_v53  ;;  %v12777_v52 = vld [vmem:[%s17678_s0 + $0x2d4] ss:$116 sps:$4 sm:$0xff]   ;;  %v12717_v53 = vld [vmem:[%s17677_s1 + $0x8a0] ss:$16 sps:$4 sm:$0xff]  }
  0xdd   :  { %6556 = vmatprep.mubr.bf16.mxu0 %v12686_v54  ;;  %7651 = vmatprep.mubr.bf16.mxu1 %v12686_v54  ;;  %v12720_v54 = vld [vmem:[%s17677_s1 + $0x8a8] ss:$16 sps:$4 sm:$0xff]  }
  0xdf   :  { %6539 = vmatpush1.bf16.msra.mxu0 %v12621_v55  ;;  %7634 = vmatpush1.bf16.msra.mxu1 %v12624_v56  ;;  %v12725_v55 = vld [vmem:[%s17677_s1 + $0x8c4] ss:$16 sps:$4 sm:$0xff]   ;;  %v12728_v56 = vld [vmem:[%s17677_s1 + $0x8cc] ss:$16 sps:$4 sm:$0xff]  }
  0xe0   :  { %6540 = vmatprep.subr.bf16.mxu0 %v12629_v57  ;;  %7635 = vmatprep.subr.bf16.mxu1 %v12632_v58  ;;  %v12723_v57 = vld [vmem:[%s17677_s1 + $0x8c0] ss:$16 sps:$4 sm:$0xff]   ;;  %v12726_v58 = vld [vmem:[%s17677_s1 + $0x8c8] ss:$16 sps:$4 sm:$0xff]  }
  0xe3   :  { %6541 = vmatpush1.bf16.msra.mxu0 %v12627_v59  ;;  %7636 = vmatpush1.bf16.msra.mxu1 %v12630_v60  ;;  %v12785_v59 = vld [vmem:[%s17678_s0 + $0x2d0] ss:$116 sps:$4 sm:$0xff]  }
  0xe4   :  { %6542 = vmatprep.subr.bf16.mxu0 %v12635_v61  ;;  %7637 = vmatprep.subr.bf16.mxu1 %v12638_v62  ;;  %v12731_v60 = vld [vmem:[%s17677_s1 + $0x8e4] ss:$16 sps:$4 sm:$0xff]   ;;  %v12734_v61 = vld [vmem:[%s17677_s1 + $0x8ec] ss:$16 sps:$4 sm:$0xff]  }
  0xe5   :  { %v12794_v62 = vld [vmem:[%s17678_s0 + $0x24] ss:$116 sps:$4 sm:$0xff]  }
  0xe7   :  { %6543 = vmatpush1.bf16.msra.mxu0 %v12633_v63  ;;  %7638 = vmatpush1.bf16.msra.mxu1 %v12636_v0  ;;  %v12729_v63 = vld [vmem:[%s17677_s1 + $0x8e0] ss:$16 sps:$4 sm:$0xff]   ;;  %v12732_v0 = vld [vmem:[%s17677_s1 + $0x8e8] ss:$16 sps:$4 sm:$0xff]  }
  0xe8   :  { %6544 = vmatprep.subr.bf16.mxu0 %v12643_v1  ;;  %7639 = vmatprep.subr.bf16.mxu1 %v12646_v2  ;;  %v12737_v1 = vld [vmem:[%s17677_s1 + $0x904] ss:$16 sps:$4 sm:$0xff]   ;;  %v12740_v2 = vld [vmem:[%s17677_s1 + $0x90c] ss:$16 sps:$4 sm:$0xff]  }
  0xeb   :  { %6545 = vmatpush1.bf16.msra.mxu0 %v12641_v3  ;;  %7640 = vmatpush1.bf16.msra.mxu1 %v12644_v4  ;;  %v12735_v3 = vld [vmem:[%s17677_s1 + $0x900] ss:$16 sps:$4 sm:$0xff]   ;;  %v12738_v4 = vld [vmem:[%s17677_s1 + $0x908] ss:$16 sps:$4 sm:$0xff]  }
  0xec   :  { %6546 = vmatprep.subr.bf16.mxu0 %v12650_v5  ;;  %7641 = vmatprep.subr.bf16.mxu1 %v12653_v6  ;;  %v12743_v5 = vld [vmem:[%s17677_s1 + $0x924] ss:$16 sps:$4 sm:$0xff]   ;;  %v12746_v6 = vld [vmem:[%s17677_s1 + $0x92c] ss:$16 sps:$4 sm:$0xff]  }
  0xef   :  { %6547 = vmatpush1.bf16.msra.mxu0 %v12648_v7  ;;  %7642 = vmatpush1.bf16.msra.mxu1 %v12651_v8  ;;  %v12741_v7 = vld [vmem:[%s17677_s1 + $0x920] ss:$16 sps:$4 sm:$0xff]   ;;  %v12744_v8 = vld [vmem:[%s17677_s1 + $0x928] ss:$16 sps:$4 sm:$0xff]  }
  0xf0   :  { %6548 = vmatprep.subr.bf16.mxu0 %v12658_v9  ;;  %7643 = vmatprep.subr.bf16.mxu1 %v12661_v10  ;;  %v12751_v9 = vld [vmem:[%s17677_s1 + $0x944] ss:$16 sps:$4 sm:$0xff]   ;;  %v12754_v10 = vld [vmem:[%s17677_s1 + $0x94c] ss:$16 sps:$4 sm:$0xff]  }
  0xf3   :  { %6549 = vmatpush1.bf16.msra.mxu0 %v12656_v11  ;;  %7644 = vmatpush1.bf16.msra.mxu1 %v12659_v12  ;;  %v12749_v11 = vld [vmem:[%s17677_s1 + $0x940] ss:$16 sps:$4 sm:$0xff]   ;;  %v12752_v12 = vld [vmem:[%s17677_s1 + $0x948] ss:$16 sps:$4 sm:$0xff]  }
  0xf4   :  { %6550 = vmatprep.subr.bf16.mxu0 %v12665_v13  ;;  %7645 = vmatprep.subr.bf16.mxu1 %v12668_v14  ;;  %v12758_v13 = vld [vmem:[%s17677_s1 + $0x964] ss:$16 sps:$4 sm:$0xff]   ;;  %v12761_v14 = vld [vmem:[%s17677_s1 + $0x96c] ss:$16 sps:$4 sm:$0xff]  }
  0xf7   :  { %6551 = vmatpush1.bf16.msra.mxu0 %v12663_v15  ;;  %7646 = vmatpush1.bf16.msra.mxu1 %v12666_v16  ;;  %v12756_v15 = vld [vmem:[%s17677_s1 + $0x960] ss:$16 sps:$4 sm:$0xff]   ;;  %v12759_v16 = vld [vmem:[%s17677_s1 + $0x968] ss:$16 sps:$4 sm:$0xff]  }
  0xf8   :  { %6552 = vmatprep.subr.bf16.mxu0 %v12673_v17  ;;  %7647 = vmatprep.subr.bf16.mxu1 %v12676_v18  ;;  %v12766_v17 = vld [vmem:[%s17677_s1 + $0x984] ss:$16 sps:$4 sm:$0xff]   ;;  %v12769_v18 = vld [vmem:[%s17677_s1 + $0x98c] ss:$16 sps:$4 sm:$0xff]  }
  0xfb   :  { %6553 = vmatpush1.bf16.msra.mxu0 %v12671_v19  ;;  %7648 = vmatpush1.bf16.msra.mxu1 %v12674_v20  ;;  %v12764_v19 = vld [vmem:[%s17677_s1 + $0x980] ss:$16 sps:$4 sm:$0xff]   ;;  %v12767_v20 = vld [vmem:[%s17677_s1 + $0x988] ss:$16 sps:$4 sm:$0xff]  }
  0xfc   :  { %6554 = vmatprep.subr.bf16.mxu0 %v12680_v21  ;;  %7649 = vmatprep.subr.bf16.mxu1 %v12683_v22  ;;  %v12773_v21 = vld [vmem:[%s17677_s1 + $0x9a4] ss:$16 sps:$4 sm:$0xff]   ;;  %v12776_v22 = vld [vmem:[%s17677_s1 + $0x9ac] ss:$16 sps:$4 sm:$0xff]  }
  0xff   :  { %6555 = vmatpush1.bf16.msra.mxu0 %v12678_v23  ;;  %7650 = vmatpush1.bf16.msra.mxu1 %v12681_v24  ;;  %v12771_v23 = vld [vmem:[%s17677_s1 + $0x9a0] ss:$16 sps:$4 sm:$0xff]   ;;  %v12774_v24 = vld [vmem:[%s17677_s1 + $0x9a8] ss:$16 sps:$4 sm:$0xff]  }
 0x100   :  { %6597 = vmatprep.subr.bf16.mxu0 %v12689_v25  ;;  %7692 = vmatprep.subr.bf16.mxu1 %v12692_v26  ;;  %v12781_v25 = vld [vmem:[%s17677_s1 + $0x9c4] ss:$16 sps:$4 sm:$0xff]   ;;  %v12784_v26 = vld [vmem:[%s17677_s1 + $0x9cc] ss:$16 sps:$4 sm:$0xff]  }
 0x102   :  { %6557 = vmatmul.mubr.bf16.vlgmr.msra.gmra.mrb[0].mxu0 %v12684_v27  ;;  %7652 = vmatmul.mubr.bf16.vlgmr.msra.gmra.mrb[0].mxu1 %v12684_v27  ;;  %v12779_v27 = vld [vmem:[%s17677_s1 + $0x9c0] ss:$16 sps:$4 sm:$0xff]  }
 0x103   :  { %6598 = vmatpush1.bf16.msra.mxu0 %v12687_v28  ;;  %7693 = vmatpush1.bf16.msra.mxu1 %v12690_v29  ;;  %v12782_v28 = vld [vmem:[%s17677_s1 + $0x9c8] ss:$16 sps:$4 sm:$0xff]   ;;  %v12788_v29 = vld [vmem:[%s17677_s1 + $0x9e4] ss:$16 sps:$4 sm:$0xff]  }
 0x104   :  { %6599 = vmatprep.subr.bf16.mxu0 %v12695_v30  ;;  %7694 = vmatprep.subr.bf16.mxu1 %v12698_v31  ;;  %v12791_v30 = vld [vmem:[%s17677_s1 + $0x9ec] ss:$16 sps:$4 sm:$0xff]   ;;  %v12786_v31 = vld [vmem:[%s17677_s1 + $0x9e0] ss:$16 sps:$4 sm:$0xff]  }
 0x105   :  { %6566 = vmatprep.mubr.bf16.mxu0 %v12747_v32  ;;  %7661 = vmatprep.mubr.bf16.mxu1 %v12747_v32  ;;  %v12789_v32 = vld [vmem:[%s17677_s1 + $0x9e8] ss:$16 sps:$4 sm:$0xff]  }
 0x107   :  { %6600 = vmatpush1.bf16.msra.mxu0 %v12693_v33  ;;  %7695 = vmatpush1.bf16.msra.mxu1 %v12696_v34  ;;  %v12797_v33 = vld [vmem:[%s17677_s1 + $0xa04] ss:$16 sps:$4 sm:$0xff]   ;;  %v12800_v34 = vld [vmem:[%s17677_s1 + $0xa0c] ss:$16 sps:$4 sm:$0xff]  }
 0x108   :  { %6601 = vmatprep.subr.bf16.mxu0 %v12701_v35  ;;  %7696 = vmatprep.subr.bf16.mxu1 %v12704_v36  ;;  %v12792_v35 = vld [vmem:[%s17678_s0 + $0x20] ss:$116 sps:$4 sm:$0xff]  }
 0x109   :  { %v12795_v36 = vld [vmem:[%s17677_s1 + $0xa00] ss:$16 sps:$4 sm:$0xff]  }
 0x10a   :  { %6567 = vmatmul.mubr.bf16.gmra.mrb[4].mxu0 %v12755_v38  ;;  %7662 = vmatmul.mubr.bf16.gmra.mrb[4].mxu1 %v12755_v38  ;;  %v12803_v38 = vld [vmem:[%s17677_s1 + $0xa24] ss:$16 sps:$4 sm:$0xff]  }
 0x10b   :  { %6602 = vmatpush1.bf16.msra.mxu0 %v12699_v37  ;;  %7697 = vmatpush1.bf16.msra.mxu1 %v12702_v39  ;;  %v12798_v37 = vld [vmem:[%s17677_s1 + $0xa08] ss:$16 sps:$4 sm:$0xff]   ;;  %v12806_v39 = vld [vmem:[%s17677_s1 + $0xa2c] ss:$16 sps:$4 sm:$0xff]  }
 0x10c   :  { %6603 = vmatprep.subr.bf16.mxu0 %v12707_v40  ;;  %7698 = vmatprep.subr.bf16.mxu1 %v12710_v41  ;;  %v12855_v40 = vld [vmem:[%s17678_s0 + $0x10c] ss:$116 sps:$4 sm:$0xff]  }
 0x10d   :  { %6576 = vmatprep.mubr.bf16.mxu0 %v12762_v42  ;;  %7671 = vmatprep.mubr.bf16.mxu1 %v12762_v42  ;;  %v12801_v41 = vld [vmem:[%s17677_s1 + $0xa20] ss:$16 sps:$4 sm:$0xff]   ;;  %v12804_v42 = vld [vmem:[%s17677_s1 + $0xa28] ss:$16 sps:$4 sm:$0xff]  }
 0x10f   :  { %6604 = vmatpush1.bf16.msra.mxu0 %v12705_v43  ;;  %7699 = vmatpush1.bf16.msra.mxu1 %v12708_v44  ;;  %v12809_v43 = vld [vmem:[%s17677_s1 + $0xa44] ss:$16 sps:$4 sm:$0xff]   ;;  %v12812_v44 = vld [vmem:[%s17677_s1 + $0xa4c] ss:$16 sps:$4 sm:$0xff]  }
 0x110   :  { %6605 = vmatprep.subr.bf16.mxu0 %v12713_v45  ;;  %7700 = vmatprep.subr.bf16.mxu1 %v12716_v46  ;;  %v12807_v45 = vld [vmem:[%s17677_s1 + $0xa40] ss:$16 sps:$4 sm:$0xff]   ;;  %v12810_v46 = vld [vmem:[%s17677_s1 + $0xa48] ss:$16 sps:$4 sm:$0xff]  }
 0x112   :  { %6577 = vmatmul.mubr.bf16.gmra.mrb[8].mxu0 %v12770_v48  ;;  %7672 = vmatmul.mubr.bf16.gmra.mrb[8].mxu1 %v12770_v48  ;;  %v12815_v48 = vld [vmem:[%s17677_s1 + $0xa64] ss:$16 sps:$4 sm:$0xff]  }
 0x113   :  { %6606 = vmatpush1.bf16.msra.mxu0 %v12711_v47  ;;  %7701 = vmatpush1.bf16.msra.mxu1 %v12714_v49  ;;  %v12863_v47 = vld [vmem:[%s17678_s0 + $0x108] ss:$116 sps:$4 sm:$0xff]  }
 0x114   :  { %6607 = vmatprep.subr.bf16.mxu0 %v12719_v50  ;;  %7702 = vmatprep.subr.bf16.mxu1 %v12722_v51  ;;  %v12818_v49 = vld [vmem:[%s17677_s1 + $0xa6c] ss:$16 sps:$4 sm:$0xff]   ;;  %v12870_v50 = vld [vmem:[%s17678_s0 + $0x1f4] ss:$116 sps:$4 sm:$0xff]   ;;  %v12813_v51 = vld [vmem:[%s17677_s1 + $0xa60] ss:$16 sps:$4 sm:$0xff]  }
 0x115   :  { %6586 = vmatprep.mubr.bf16.mxu0 %v12777_v52  ;;  %7681 = vmatprep.mubr.bf16.mxu1 %v12777_v52  ;;  %v12816_v52 = vld [vmem:[%s17677_s1 + $0xa68] ss:$16 sps:$4 sm:$0xff]  }
 0x117   :  { %6608 = vmatpush1.bf16.msra.mxu0 %v12717_v53  ;;  %7703 = vmatpush1.bf16.msra.mxu1 %v12720_v54  ;;  %v12821_v53 = vld [vmem:[%s17677_s1 + $0xa84] ss:$16 sps:$4 sm:$0xff]   ;;  %v12824_v54 = vld [vmem:[%s17677_s1 + $0xa8c] ss:$16 sps:$4 sm:$0xff]  }
 0x118   :  { %6609 = vmatprep.subr.bf16.mxu0 %v12725_v55  ;;  %7704 = vmatprep.subr.bf16.mxu1 %v12728_v56  ;;  %v12819_v55 = vld [vmem:[%s17677_s1 + $0xa80] ss:$16 sps:$4 sm:$0xff]   ;;  %v12822_v56 = vld [vmem:[%s17677_s1 + $0xa88] ss:$16 sps:$4 sm:$0xff]  }
 0x11a   :  { %6587 = vmatmul.mubr.bf16.gmra.mrb[12].mxu0 %v12785_v59  ;;  %7682 = vmatmul.mubr.bf16.gmra.mrb[12].mxu1 %v12785_v59  ;;  %v12830_v59 = vld [vmem:[%s17677_s1 + $0xaac] ss:$16 sps:$4 sm:$0xff]  }
 0x11b   :  { %6610 = vmatpush1.bf16.msra.mxu0 %v12723_v57  ;;  %7705 = vmatpush1.bf16.msra.mxu1 %v12726_v58  ;;  %v12878_v57 = vld [vmem:[%s17678_s0 + $0x1f0] ss:$116 sps:$4 sm:$0xff]  }
 0x11c   :  { %6611 = vmatprep.subr.bf16.mxu0 %v12731_v60  ;;  %7706 = vmatprep.subr.bf16.mxu1 %v12734_v61  ;;  %v12827_v58 = vld [vmem:[%s17677_s1 + $0xaa4] ss:$16 sps:$4 sm:$0xff]   ;;  %v12885_v60 = vld [vmem:[%s17678_s0 + $0x2dc] ss:$116 sps:$4 sm:$0xff]  }
 0x11d   :  { %6629 = vmatprep.mubr.bf16.mxu0 %v12794_v62  ;;  %7724 = vmatprep.mubr.bf16.mxu1 %v12794_v62  ;;  %v12825_v61 = vld [vmem:[%s17677_s1 + $0xaa0] ss:$16 sps:$4 sm:$0xff]   ;;  %v12828_v62 = vld [vmem:[%s17677_s1 + $0xaa8] ss:$16 sps:$4 sm:$0xff]  }
 0x11f   :  { %6612 = vmatpush1.bf16.msra.mxu0 %v12729_v63  ;;  %7707 = vmatpush1.bf16.msra.mxu1 %v12732_v0  ;;  %v12833_v63 = vld [vmem:[%s17677_s1 + $0xac4] ss:$16 sps:$4 sm:$0xff]   ;;  %v12836_v0 = vld [vmem:[%s17677_s1 + $0xacc] ss:$16 sps:$4 sm:$0xff]  }
 0x120   :  { %6613 = vmatprep.subr.bf16.mxu0 %v12737_v1  ;;  %7708 = vmatprep.subr.bf16.mxu1 %v12740_v2  ;;  %v12831_v1 = vld [vmem:[%s17677_s1 + $0xac0] ss:$16 sps:$4 sm:$0xff]   ;;  %v12834_v2 = vld [vmem:[%s17677_s1 + $0xac8] ss:$16 sps:$4 sm:$0xff]  }
 0x123   :  { %6614 = vmatpush1.bf16.msra.mxu0 %v12735_v3  ;;  %7709 = vmatpush1.bf16.msra.mxu1 %v12738_v4  ;;  %v12893_v3 = vld [vmem:[%s17678_s0 + $0x2d8] ss:$116 sps:$4 sm:$0xff]   ;;  %v12839_v4 = vld [vmem:[%s17677_s1 + $0xae4] ss:$16 sps:$4 sm:$0xff]  }
 0x124   :  { %6615 = vmatprep.subr.bf16.mxu0 %v12743_v5  ;;  %7710 = vmatprep.subr.bf16.mxu1 %v12746_v6  ;;  %v12842_v5 = vld [vmem:[%s17677_s1 + $0xaec] ss:$16 sps:$4 sm:$0xff]  }
 0x125   :  { %v12902_v6 = vld [vmem:[%s17678_s0 + $0x2c] ss:$116 sps:$4 sm:$0xff]  }
 0x127   :  { %6616 = vmatpush1.bf16.msra.mxu0 %v12741_v7  ;;  %7711 = vmatpush1.bf16.msra.mxu1 %v12744_v8  ;;  %v12837_v7 = vld [vmem:[%s17677_s1 + $0xae0] ss:$16 sps:$4 sm:$0xff]   ;;  %v12840_v8 = vld [vmem:[%s17677_s1 + $0xae8] ss:$16 sps:$4 sm:$0xff]  }
 0x128   :  { %6617 = vmatprep.subr.bf16.mxu0 %v12751_v9  ;;  %7712 = vmatprep.subr.bf16.mxu1 %v12754_v10  ;;  %v12845_v9 = vld [vmem:[%s17677_s1 + $0xb04] ss:$16 sps:$4 sm:$0xff]   ;;  %v12848_v10 = vld [vmem:[%s17677_s1 + $0xb0c] ss:$16 sps:$4 sm:$0xff]  }
 0x12b   :  { %6618 = vmatpush1.bf16.msra.mxu0 %v12749_v11  ;;  %7713 = vmatpush1.bf16.msra.mxu1 %v12752_v12  ;;  %v12843_v11 = vld [vmem:[%s17677_s1 + $0xb00] ss:$16 sps:$4 sm:$0xff]   ;;  %v12846_v12 = vld [vmem:[%s17677_s1 + $0xb08] ss:$16 sps:$4 sm:$0xff]  }
 0x12c   :  { %6619 = vmatprep.subr.bf16.mxu0 %v12758_v13  ;;  %7714 = vmatprep.subr.bf16.mxu1 %v12761_v14  ;;  %v12851_v13 = vld [vmem:[%s17677_s1 + $0xb24] ss:$16 sps:$4 sm:$0xff]   ;;  %v12854_v14 = vld [vmem:[%s17677_s1 + $0xb2c] ss:$16 sps:$4 sm:$0xff]  }
 0x12f   :  { %6620 = vmatpush1.bf16.msra.mxu0 %v12756_v15  ;;  %7715 = vmatpush1.bf16.msra.mxu1 %v12759_v16  ;;  %v12849_v15 = vld [vmem:[%s17677_s1 + $0xb20] ss:$16 sps:$4 sm:$0xff]   ;;  %v12852_v16 = vld [vmem:[%s17677_s1 + $0xb28] ss:$16 sps:$4 sm:$0xff]  }
 0x130   :  { %6621 = vmatprep.subr.bf16.mxu0 %v12766_v17  ;;  %7716 = vmatprep.subr.bf16.mxu1 %v12769_v18  ;;  %v12859_v17 = vld [vmem:[%s17677_s1 + $0xb44] ss:$16 sps:$4 sm:$0xff]   ;;  %v12862_v18 = vld [vmem:[%s17677_s1 + $0xb4c] ss:$16 sps:$4 sm:$0xff]  }
 0x133   :  { %6622 = vmatpush1.bf16.msra.mxu0 %v12764_v19  ;;  %7717 = vmatpush1.bf16.msra.mxu1 %v12767_v20  ;;  %v12857_v19 = vld [vmem:[%s17677_s1 + $0xb40] ss:$16 sps:$4 sm:$0xff]   ;;  %v12860_v20 = vld [vmem:[%s17677_s1 + $0xb48] ss:$16 sps:$4 sm:$0xff]  }
 0x134   :  { %6623 = vmatprep.subr.bf16.mxu0 %v12773_v21  ;;  %7718 = vmatprep.subr.bf16.mxu1 %v12776_v22  ;;  %v12866_v21 = vld [vmem:[%s17677_s1 + $0xb64] ss:$16 sps:$4 sm:$0xff]   ;;  %v12869_v22 = vld [vmem:[%s17677_s1 + $0xb6c] ss:$16 sps:$4 sm:$0xff]  }
 0x137   :  { %6624 = vmatpush1.bf16.msra.mxu0 %v12771_v23  ;;  %7719 = vmatpush1.bf16.msra.mxu1 %v12774_v24  ;;  %v12864_v23 = vld [vmem:[%s17677_s1 + $0xb60] ss:$16 sps:$4 sm:$0xff]   ;;  %v12867_v24 = vld [vmem:[%s17677_s1 + $0xb68] ss:$16 sps:$4 sm:$0xff]  }
 0x138   :  { %6625 = vmatprep.subr.bf16.mxu0 %v12781_v25  ;;  %7720 = vmatprep.subr.bf16.mxu1 %v12784_v26  ;;  %v12874_v25 = vld [vmem:[%s17677_s1 + $0xb84] ss:$16 sps:$4 sm:$0xff]   ;;  %v12877_v26 = vld [vmem:[%s17677_s1 + $0xb8c] ss:$16 sps:$4 sm:$0xff]  }
 0x13b   :  { %6626 = vmatpush1.bf16.msra.mxu0 %v12779_v27  ;;  %7721 = vmatpush1.bf16.msra.mxu1 %v12782_v28  ;;  %v12872_v27 = vld [vmem:[%s17677_s1 + $0xb80] ss:$16 sps:$4 sm:$0xff]   ;;  %v12875_v28 = vld [vmem:[%s17677_s1 + $0xb88] ss:$16 sps:$4 sm:$0xff]  }
 0x13c   :  { %6627 = vmatprep.subr.bf16.mxu0 %v12788_v29  ;;  %7722 = vmatprep.subr.bf16.mxu1 %v12791_v30  ;;  %v12881_v29 = vld [vmem:[%s17677_s1 + $0xba4] ss:$16 sps:$4 sm:$0xff]   ;;  %v12884_v30 = vld [vmem:[%s17677_s1 + $0xbac] ss:$16 sps:$4 sm:$0xff]  }
 0x13f   :  { %6628 = vmatpush1.bf16.msra.mxu0 %v12786_v31  ;;  %7723 = vmatpush1.bf16.msra.mxu1 %v12789_v32  ;;  %v12879_v31 = vld [vmem:[%s17677_s1 + $0xba0] ss:$16 sps:$4 sm:$0xff]   ;;  %v12882_v32 = vld [vmem:[%s17677_s1 + $0xba8] ss:$16 sps:$4 sm:$0xff]  }
 0x140   :  { %6670 = vmatprep.subr.bf16.mxu0 %v12797_v33  ;;  %7765 = vmatprep.subr.bf16.mxu1 %v12800_v34  ;;  %v12889_v33 = vld [vmem:[%s17677_s1 + $0xbc4] ss:$16 sps:$4 sm:$0xff]   ;;  %v12892_v34 = vld [vmem:[%s17677_s1 + $0xbcc] ss:$16 sps:$4 sm:$0xff]  }
 0x142   :  { %6630 = vmatmul.mubr.bf16.vlgmr.msra.gmra.mrb[0].mxu0 %v12792_v35  ;;  %7725 = vmatmul.mubr.bf16.vlgmr.msra.gmra.mrb[0].mxu1 %v12792_v35  ;;  %v12887_v35 = vld [vmem:[%s17677_s1 + $0xbc0] ss:$16 sps:$4 sm:$0xff]  }
 0x143   :  { %6671 = vmatpush1.bf16.msra.mxu0 %v12795_v36  ;;  %7766 = vmatpush1.bf16.msra.mxu1 %v12798_v37  ;;  %v12890_v36 = vld [vmem:[%s17677_s1 + $0xbc8] ss:$16 sps:$4 sm:$0xff]   ;;  %v12896_v37 = vld [vmem:[%s17677_s1 + $0xbe4] ss:$16 sps:$4 sm:$0xff]  }
 0x144   :  { %6672 = vmatprep.subr.bf16.mxu0 %v12803_v38  ;;  %7767 = vmatprep.subr.bf16.mxu1 %v12806_v39  ;;  %v12899_v38 = vld [vmem:[%s17677_s1 + $0xbec] ss:$16 sps:$4 sm:$0xff]   ;;  %v12894_v39 = vld [vmem:[%s17677_s1 + $0xbe0] ss:$16 sps:$4 sm:$0xff]  }
 0x145   :  { %6639 = vmatprep.mubr.bf16.mxu0 %v12855_v40  ;;  %7734 = vmatprep.mubr.bf16.mxu1 %v12855_v40  ;;  %v12897_v40 = vld [vmem:[%s17677_s1 + $0xbe8] ss:$16 sps:$4 sm:$0xff]  }
 0x147   :  { %6673 = vmatpush1.bf16.msra.mxu0 %v12801_v41  ;;  %7768 = vmatpush1.bf16.msra.mxu1 %v12804_v42  ;;  %v12900_v41 = vld [vmem:[%s17678_s0 + $0x28] ss:$116 sps:$4 sm:$0xff]   ;;  %v12905_v42 = vld [vmem:[%s17677_s1 + $0xc04] ss:$16 sps:$4 sm:$0xff]  }
 0x148   :  { %6674 = vmatprep.subr.bf16.mxu0 %v12809_v43  ;;  %7769 = vmatprep.subr.bf16.mxu1 %v12812_v44  ;;  %v12908_v43 = vld [vmem:[%s17677_s1 + $0xc0c] ss:$16 sps:$4 sm:$0xff]   ;;  %v12903_v44 = vld [vmem:[%s17677_s1 + $0xc00] ss:$16 sps:$4 sm:$0xff]  }
 0x14a   :  { %6640 = vmatmul.mubr.bf16.gmra.mrb[4].mxu0 %v12863_v47  ;;  %7735 = vmatmul.mubr.bf16.gmra.mrb[4].mxu1 %v12863_v47  ;;  %v12914_v47 = vld [vmem:[%s17677_s1 + $0xc2c] ss:$16 sps:$4 sm:$0xff]  }
 0x14b   :  { %6675 = vmatpush1.bf16.msra.mxu0 %v12807_v45  ;;  %7770 = vmatpush1.bf16.msra.mxu1 %v12810_v46  ;;  %v12906_v45 = vld [vmem:[%s17677_s1 + $0xc08] ss:$16 sps:$4 sm:$0xff]   ;;  %v12911_v46 = vld [vmem:[%s17677_s1 + $0xc24] ss:$16 sps:$4 sm:$0xff]  }
 0x14c   :  { %6676 = vmatprep.subr.bf16.mxu0 %v12815_v48  ;;  %7771 = vmatprep.subr.bf16.mxu1 %v12818_v49  ;;  %v12963_v48 = vld [vmem:[%s17678_s0 + $0x114] ss:$116 sps:$4 sm:$0xff]   ;;  %v12909_v49 = vld [vmem:[%s17677_s1 + $0xc20] ss:$16 sps:$4 sm:$0xff]  }
 0x14d   :  { %6649 = vmatprep.mubr.bf16.mxu0 %v12870_v50  ;;  %7744 = vmatprep.mubr.bf16.mxu1 %v12870_v50  ;;  %v12912_v50 = vld [vmem:[%s17677_s1 + $0xc28] ss:$16 sps:$4 sm:$0xff]  }
 0x14f   :  { %6677 = vmatpush1.bf16.msra.mxu0 %v12813_v51  ;;  %7772 = vmatpush1.bf16.msra.mxu1 %v12816_v52  ;;  %v12917_v51 = vld [vmem:[%s17677_s1 + $0xc44] ss:$16 sps:$4 sm:$0xff]   ;;  %v12920_v52 = vld [vmem:[%s17677_s1 + $0xc4c] ss:$16 sps:$4 sm:$0xff]  }
 0x150   :  { %6678 = vmatprep.subr.bf16.mxu0 %v12821_v53  ;;  %7773 = vmatprep.subr.bf16.mxu1 %v12824_v54  ;;  %v12971_v53 = vld [vmem:[%s17678_s0 + $0x110] ss:$116 sps:$4 sm:$0xff]  }
 0x151   :  { %v12915_v54 = vld [vmem:[%s17677_s1 + $0xc40] ss:$16 sps:$4 sm:$0xff]  }
 0x152   :  { %6650 = vmatmul.mubr.bf16.gmra.mrb[8].mxu0 %v12878_v57  ;;  %7745 = vmatmul.mubr.bf16.gmra.mrb[8].mxu1 %v12878_v57  ;;  %v12926_v57 = vld [vmem:[%s17677_s1 + $0xc6c] ss:$16 sps:$4 sm:$0xff]  }
 0x153   :  { %6679 = vmatpush1.bf16.msra.mxu0 %v12819_v55  ;;  %7774 = vmatpush1.bf16.msra.mxu1 %v12822_v56  ;;  %v12918_v55 = vld [vmem:[%s17677_s1 + $0xc48] ss:$16 sps:$4 sm:$0xff]   ;;  %v12923_v56 = vld [vmem:[%s17677_s1 + $0xc64] ss:$16 sps:$4 sm:$0xff]  }
 0x154   :  { %6680 = vmatprep.subr.bf16.mxu0 %v12827_v58  ;;  %7775 = vmatprep.subr.bf16.mxu1 %v12830_v59  ;;  %v12978_v58 = vld [vmem:[%s17678_s0 + $0x1fc] ss:$116 sps:$4 sm:$0xff]  }
 0x155   :  { %6659 = vmatprep.mubr.bf16.mxu0 %v12885_v60  ;;  %7754 = vmatprep.mubr.bf16.mxu1 %v12885_v60  ;;  %v12921_v59 = vld [vmem:[%s17677_s1 + $0xc60] ss:$16 sps:$4 sm:$0xff]   ;;  %v12924_v60 = vld [vmem:[%s17677_s1 + $0xc68] ss:$16 sps:$4 sm:$0xff]  }
 0x157   :  { %6681 = vmatpush1.bf16.msra.mxu0 %v12825_v61  ;;  %7776 = vmatpush1.bf16.msra.mxu1 %v12828_v62  ;;  %v12929_v61 = vld [vmem:[%s17677_s1 + $0xc84] ss:$16 sps:$4 sm:$0xff]   ;;  %v12932_v62 = vld [vmem:[%s17677_s1 + $0xc8c] ss:$16 sps:$4 sm:$0xff]  }
 0x158   :  { %6682 = vmatprep.subr.bf16.mxu0 %v12833_v63  ;;  %7777 = vmatprep.subr.bf16.mxu1 %v12836_v0  ;;  %v12986_v63 = vld [vmem:[%s17678_s0 + $0x1f8] ss:$116 sps:$4 sm:$0xff]   ;;  %v12927_v0 = vld [vmem:[%s17677_s1 + $0xc80] ss:$16 sps:$4 sm:$0xff]  }
 0x15a   :  { %6660 = vmatmul.mubr.bf16.gmra.mrb[12].mxu0 %v12893_v3  ;;  %7755 = vmatmul.mubr.bf16.gmra.mrb[12].mxu1 %v12893_v3  ;;  %v12938_v3 = vld [vmem:[%s17677_s1 + $0xcac] ss:$16 sps:$4 sm:$0xff]  }
 0x15b   :  { %6683 = vmatpush1.bf16.msra.mxu0 %v12831_v1  ;;  %7778 = vmatpush1.bf16.msra.mxu1 %v12834_v2  ;;  %v12930_v1 = vld [vmem:[%s17677_s1 + $0xc88] ss:$16 sps:$4 sm:$0xff]   ;;  %v12935_v2 = vld [vmem:[%s17677_s1 + $0xca4] ss:$16 sps:$4 sm:$0xff]  }
 0x15c   :  { %6684 = vmatprep.subr.bf16.mxu0 %v12839_v4  ;;  %7779 = vmatprep.subr.bf16.mxu1 %v12842_v5  ;;  %v12993_v4 = vld [vmem:[%s17678_s0 + $0x2e4] ss:$116 sps:$4 sm:$0xff]   ;;  %v12933_v5 = vld [vmem:[%s17677_s1 + $0xca0] ss:$16 sps:$4 sm:$0xff]  }
 0x15d   :  { %6702 = vmatprep.mubr.bf16.mxu0 %v12902_v6  ;;  %7797 = vmatprep.mubr.bf16.mxu1 %v12902_v6  ;;  %v12936_v6 = vld [vmem:[%s17677_s1 + $0xca8] ss:$16 sps:$4 sm:$0xff]  }
 0x15f   :  { %6685 = vmatpush1.bf16.msra.mxu0 %v12837_v7  ;;  %7780 = vmatpush1.bf16.msra.mxu1 %v12840_v8  ;;  %v12941_v7 = vld [vmem:[%s17677_s1 + $0xcc4] ss:$16 sps:$4 sm:$0xff]   ;;  %v12944_v8 = vld [vmem:[%s17677_s1 + $0xccc] ss:$16 sps:$4 sm:$0xff]  }
 0x160   :  { %6686 = vmatprep.subr.bf16.mxu0 %v12845_v9  ;;  %7781 = vmatprep.subr.bf16.mxu1 %v12848_v10  ;;  %v13001_v9 = vld [vmem:[%s17678_s0 + $0x2e0] ss:$116 sps:$4 sm:$0xff]  }
 0x161   :  { %v12939_v10 = vld [vmem:[%s17677_s1 + $0xcc0] ss:$16 sps:$4 sm:$0xff]  }
 0x163   :  { %6687 = vmatpush1.bf16.msra.mxu0 %v12843_v11  ;;  %7782 = vmatpush1.bf16.msra.mxu1 %v12846_v12  ;;  %v12942_v11 = vld [vmem:[%s17677_s1 + $0xcc8] ss:$16 sps:$4 sm:$0xff]   ;;  %v12947_v12 = vld [vmem:[%s17677_s1 + $0xce4] ss:$16 sps:$4 sm:$0xff]  }
 0x164   :  { %6688 = vmatprep.subr.bf16.mxu0 %v12851_v13  ;;  %7783 = vmatprep.subr.bf16.mxu1 %v12854_v14  ;;  %v12950_v13 = vld [vmem:[%s17677_s1 + $0xcec] ss:$16 sps:$4 sm:$0xff]   ;;  %v13010_v14 = vld [vmem:[%s17678_s0 + $0x34] ss:$116 sps:$4 sm:$0xff]  }
 0x167   :  { %6689 = vmatpush1.bf16.msra.mxu0 %v12849_v15  ;;  %7784 = vmatpush1.bf16.msra.mxu1 %v12852_v16  ;;  %v12945_v15 = vld [vmem:[%s17677_s1 + $0xce0] ss:$16 sps:$4 sm:$0xff]   ;;  %v12948_v16 = vld [vmem:[%s17677_s1 + $0xce8] ss:$16 sps:$4 sm:$0xff]  }
 0x168   :  { %6690 = vmatprep.subr.bf16.mxu0 %v12859_v17  ;;  %7785 = vmatprep.subr.bf16.mxu1 %v12862_v18  ;;  %v12953_v17 = vld [vmem:[%s17677_s1 + $0xd04] ss:$16 sps:$4 sm:$0xff]   ;;  %v12956_v18 = vld [vmem:[%s17677_s1 + $0xd0c] ss:$16 sps:$4 sm:$0xff]  }
 0x16b   :  { %6691 = vmatpush1.bf16.msra.mxu0 %v12857_v19  ;;  %7786 = vmatpush1.bf16.msra.mxu1 %v12860_v20  ;;  %v12951_v19 = vld [vmem:[%s17677_s1 + $0xd00] ss:$16 sps:$4 sm:$0xff]   ;;  %v12954_v20 = vld [vmem:[%s17677_s1 + $0xd08] ss:$16 sps:$4 sm:$0xff]  }
 0x16c   :  { %6692 = vmatprep.subr.bf16.mxu0 %v12866_v21  ;;  %7787 = vmatprep.subr.bf16.mxu1 %v12869_v22  ;;  %v12959_v21 = vld [vmem:[%s17677_s1 + $0xd24] ss:$16 sps:$4 sm:$0xff]   ;;  %v12962_v22 = vld [vmem:[%s17677_s1 + $0xd2c] ss:$16 sps:$4 sm:$0xff]  }
 0x16f   :  { %6693 = vmatpush1.bf16.msra.mxu0 %v12864_v23  ;;  %7788 = vmatpush1.bf16.msra.mxu1 %v12867_v24  ;;  %v12957_v23 = vld [vmem:[%s17677_s1 + $0xd20] ss:$16 sps:$4 sm:$0xff]   ;;  %v12960_v24 = vld [vmem:[%s17677_s1 + $0xd28] ss:$16 sps:$4 sm:$0xff]  }
 0x170   :  { %6694 = vmatprep.subr.bf16.mxu0 %v12874_v25  ;;  %7789 = vmatprep.subr.bf16.mxu1 %v12877_v26  ;;  %v12967_v25 = vld [vmem:[%s17677_s1 + $0xd44] ss:$16 sps:$4 sm:$0xff]   ;;  %v12970_v26 = vld [vmem:[%s17677_s1 + $0xd4c] ss:$16 sps:$4 sm:$0xff]  }
 0x173   :  { %6695 = vmatpush1.bf16.msra.mxu0 %v12872_v27  ;;  %7790 = vmatpush1.bf16.msra.mxu1 %v12875_v28  ;;  %v12965_v27 = vld [vmem:[%s17677_s1 + $0xd40] ss:$16 sps:$4 sm:$0xff]   ;;  %v12968_v28 = vld [vmem:[%s17677_s1 + $0xd48] ss:$16 sps:$4 sm:$0xff]  }
 0x174   :  { %6696 = vmatprep.subr.bf16.mxu0 %v12881_v29  ;;  %7791 = vmatprep.subr.bf16.mxu1 %v12884_v30  ;;  %v12974_v29 = vld [vmem:[%s17677_s1 + $0xd64] ss:$16 sps:$4 sm:$0xff]   ;;  %v12977_v30 = vld [vmem:[%s17677_s1 + $0xd6c] ss:$16 sps:$4 sm:$0xff]  }
 0x177   :  { %6697 = vmatpush1.bf16.msra.mxu0 %v12879_v31  ;;  %7792 = vmatpush1.bf16.msra.mxu1 %v12882_v32  ;;  %v12972_v31 = vld [vmem:[%s17677_s1 + $0xd60] ss:$16 sps:$4 sm:$0xff]   ;;  %v12975_v32 = vld [vmem:[%s17677_s1 + $0xd68] ss:$16 sps:$4 sm:$0xff]  }
 0x178   :  { %6698 = vmatprep.subr.bf16.mxu0 %v12889_v33  ;;  %7793 = vmatprep.subr.bf16.mxu1 %v12892_v34  ;;  %v12982_v33 = vld [vmem:[%s17677_s1 + $0xd84] ss:$16 sps:$4 sm:$0xff]   ;;  %v12985_v34 = vld [vmem:[%s17677_s1 + $0xd8c] ss:$16 sps:$4 sm:$0xff]  }
 0x17b   :  { %6699 = vmatpush1.bf16.msra.mxu0 %v12887_v35  ;;  %7794 = vmatpush1.bf16.msra.mxu1 %v12890_v36  ;;  %v12980_v35 = vld [vmem:[%s17677_s1 + $0xd80] ss:$16 sps:$4 sm:$0xff]   ;;  %v12983_v36 = vld [vmem:[%s17677_s1 + $0xd88] ss:$16 sps:$4 sm:$0xff]  }
 0x17c   :  { %6700 = vmatprep.subr.bf16.mxu0 %v12896_v37  ;;  %7795 = vmatprep.subr.bf16.mxu1 %v12899_v38  ;;  %v12989_v37 = vld [vmem:[%s17677_s1 + $0xda4] ss:$16 sps:$4 sm:$0xff]   ;;  %v12992_v38 = vld [vmem:[%s17677_s1 + $0xdac] ss:$16 sps:$4 sm:$0xff]  }
 0x17f   :  { %6701 = vmatpush1.bf16.msra.mxu0 %v12894_v39  ;;  %7796 = vmatpush1.bf16.msra.mxu1 %v12897_v40  ;;  %v12987_v39 = vld [vmem:[%s17677_s1 + $0xda0] ss:$16 sps:$4 sm:$0xff]   ;;  %v12990_v40 = vld [vmem:[%s17677_s1 + $0xda8] ss:$16 sps:$4 sm:$0xff]  }
 0x180   :  { %6743 = vmatprep.subr.bf16.mxu0 %v12905_v42  ;;  %7838 = vmatprep.subr.bf16.mxu1 %v12908_v43  ;;  %v13000_v42 = vld [vmem:[%s17677_s1 + $0xdcc] ss:$16 sps:$4 sm:$0xff]   ;;  %v12995_v43 = vld [vmem:[%s17677_s1 + $0xdc0] ss:$16 sps:$4 sm:$0xff]  }
 0x182   :  { %6703 = vmatmul.mubr.bf16.vlgmr.msra.gmra.mrb[0].mxu0 %v12900_v41  ;;  %7798 = vmatmul.mubr.bf16.vlgmr.msra.gmra.mrb[0].mxu1 %v12900_v41  ;;  %v12997_v41 = vld [vmem:[%s17677_s1 + $0xdc4] ss:$16 sps:$4 sm:$0xff]  }
 0x183   :  { %6744 = vmatpush1.bf16.msra.mxu0 %v12903_v44  ;;  %7839 = vmatpush1.bf16.msra.mxu1 %v12906_v45  ;;  %v12998_v44 = vld [vmem:[%s17677_s1 + $0xdc8] ss:$16 sps:$4 sm:$0xff]   ;;  %v13004_v45 = vld [vmem:[%s17677_s1 + $0xde4] ss:$16 sps:$4 sm:$0xff]  }
 0x184   :  { %6745 = vmatprep.subr.bf16.mxu0 %v12911_v46  ;;  %7840 = vmatprep.subr.bf16.mxu1 %v12914_v47  ;;  %v13007_v46 = vld [vmem:[%s17677_s1 + $0xdec] ss:$16 sps:$4 sm:$0xff]   ;;  %v13002_v47 = vld [vmem:[%s17677_s1 + $0xde0] ss:$16 sps:$4 sm:$0xff]  }
 0x185   :  { %6712 = vmatprep.mubr.bf16.mxu0 %v12963_v48  ;;  %7807 = vmatprep.mubr.bf16.mxu1 %v12963_v48  ;;  %v13005_v48 = vld [vmem:[%s17677_s1 + $0xde8] ss:$16 sps:$4 sm:$0xff]  }
 0x187   :  { %6746 = vmatpush1.bf16.msra.mxu0 %v12909_v49  ;;  %7841 = vmatpush1.bf16.msra.mxu1 %v12912_v50  ;;  %v13008_v49 = vld [vmem:[%s17678_s0 + $0x30] ss:$116 sps:$4 sm:$0xff]  }
 0x188   :  { %6747 = vmatprep.subr.bf16.mxu0 %v12917_v51  ;;  %7842 = vmatprep.subr.bf16.mxu1 %v12920_v52  ;;  %v13013_v50 = vld [vmem:[%s17677_s1 + $0xe04] ss:$16 sps:$4 sm:$0xff]   ;;  %v13016_v51 = vld [vmem:[%s17677_s1 + $0xe0c] ss:$16 sps:$4 sm:$0xff]   ;;  %v13011_v52 = vld [vmem:[%s17677_s1 + $0xe00] ss:$16 sps:$4 sm:$0xff]  }
 0x18a   :  { %6713 = vmatmul.mubr.bf16.gmra.mrb[4].mxu0 %v12971_v53  ;;  %7808 = vmatmul.mubr.bf16.gmra.mrb[4].mxu1 %v12971_v53  ;;  %v13014_v53 = vld [vmem:[%s17677_s1 + $0xe08] ss:$16 sps:$4 sm:$0xff]  }
 0x18b   :  { %6748 = vmatpush1.bf16.msra.mxu0 %v12915_v54  ;;  %7843 = vmatpush1.bf16.msra.mxu1 %v12918_v55  ;;  %v13019_v54 = vld [vmem:[%s17677_s1 + $0xe24] ss:$16 sps:$4 sm:$0xff]   ;;  %v13022_v55 = vld [vmem:[%s17677_s1 + $0xe2c] ss:$16 sps:$4 sm:$0xff]  }
 0x18c   :  { %6749 = vmatprep.subr.bf16.mxu0 %v12923_v56  ;;  %7844 = vmatprep.subr.bf16.mxu1 %v12926_v57  ;;  %v13071_v56 = vld [vmem:[%s17678_s0 + $0x11c] ss:$116 sps:$4 sm:$0xff]  }
 0x18d   :  { %6722 = vmatprep.mubr.bf16.mxu0 %v12978_v58  ;;  %7817 = vmatprep.mubr.bf16.mxu1 %v12978_v58  ;;  %v13017_v57 = vld [vmem:[%s17677_s1 + $0xe20] ss:$16 sps:$4 sm:$0xff]   ;;  %v13020_v58 = vld [vmem:[%s17677_s1 + $0xe28] ss:$16 sps:$4 sm:$0xff]  }
 0x18f   :  { %6750 = vmatpush1.bf16.msra.mxu0 %v12921_v59  ;;  %7845 = vmatpush1.bf16.msra.mxu1 %v12924_v60  ;;  %v13025_v59 = vld [vmem:[%s17677_s1 + $0xe44] ss:$16 sps:$4 sm:$0xff]   ;;  %v13028_v60 = vld [vmem:[%s17677_s1 + $0xe4c] ss:$16 sps:$4 sm:$0xff]  }
 0x190   :  { %6751 = vmatprep.subr.bf16.mxu0 %v12929_v61  ;;  %7846 = vmatprep.subr.bf16.mxu1 %v12932_v62  ;;  %v13079_v61 = vld [vmem:[%s17678_s0 + $0x118] ss:$116 sps:$4 sm:$0xff]   ;;  %v13023_v62 = vld [vmem:[%s17677_s1 + $0xe40] ss:$16 sps:$4 sm:$0xff]  }
 0x192   :  { %6723 = vmatmul.mubr.bf16.gmra.mrb[8].mxu0 %v12986_v63  ;;  %7818 = vmatmul.mubr.bf16.gmra.mrb[8].mxu1 %v12986_v63  ;;  %v13026_v63 = vld [vmem:[%s17677_s1 + $0xe48] ss:$16 sps:$4 sm:$0xff]  }
 0x193   :  { %6752 = vmatpush1.bf16.msra.mxu0 %v12927_v0  ;;  %7847 = vmatpush1.bf16.msra.mxu1 %v12930_v1  ;;  %v13031_v0 = vld [vmem:[%s17677_s1 + $0xe64] ss:$16 sps:$4 sm:$0xff]   ;;  %v13034_v1 = vld [vmem:[%s17677_s1 + $0xe6c] ss:$16 sps:$4 sm:$0xff]  }
 0x194   :  { %6753 = vmatprep.subr.bf16.mxu0 %v12935_v2  ;;  %7848 = vmatprep.subr.bf16.mxu1 %v12938_v3  ;;  %v13086_v2 = vld [vmem:[%s17678_s0 + $0x204] ss:$116 sps:$4 sm:$0xff]   ;;  %v13029_v3 = vld [vmem:[%s17677_s1 + $0xe60] ss:$16 sps:$4 sm:$0xff]  }
 0x195   :  { %6732 = vmatprep.mubr.bf16.mxu0 %v12993_v4  ;;  %7827 = vmatprep.mubr.bf16.mxu1 %v12993_v4  ;;  %v13032_v4 = vld [vmem:[%s17677_s1 + $0xe68] ss:$16 sps:$4 sm:$0xff]  }
 0x197   :  { %6754 = vmatpush1.bf16.msra.mxu0 %v12933_v5  ;;  %7849 = vmatpush1.bf16.msra.mxu1 %v12936_v6  ;;  %v13037_v5 = vld [vmem:[%s17677_s1 + $0xe84] ss:$16 sps:$4 sm:$0xff]   ;;  %v13040_v6 = vld [vmem:[%s17677_s1 + $0xe8c] ss:$16 sps:$4 sm:$0xff]  }
 0x198   :  { %6755 = vmatprep.subr.bf16.mxu0 %v12941_v7  ;;  %7850 = vmatprep.subr.bf16.mxu1 %v12944_v8  ;;  %v13094_v7 = vld [vmem:[%s17678_s0 + $0x200] ss:$116 sps:$4 sm:$0xff]  }
 0x199   :  { %v13035_v8 = vld [vmem:[%s17677_s1 + $0xe80] ss:$16 sps:$4 sm:$0xff]  }
 0x19a   :  { %6733 = vmatmul.mubr.bf16.gmra.mrb[12].mxu0 %v13001_v9  ;;  %7828 = vmatmul.mubr.bf16.gmra.mrb[12].mxu1 %v13001_v9  ;;  %v13038_v9 = vld [vmem:[%s17677_s1 + $0xe88] ss:$16 sps:$4 sm:$0xff]  }
 0x19b   :  { %6756 = vmatpush1.bf16.msra.mxu0 %v12939_v10  ;;  %7851 = vmatpush1.bf16.msra.mxu1 %v12942_v11  ;;  %v13043_v10 = vld [vmem:[%s17677_s1 + $0xea4] ss:$16 sps:$4 sm:$0xff]   ;;  %v13046_v11 = vld [vmem:[%s17677_s1 + $0xeac] ss:$16 sps:$4 sm:$0xff]  }
 0x19c   :  { %6757 = vmatprep.subr.bf16.mxu0 %v12947_v12  ;;  %7852 = vmatprep.subr.bf16.mxu1 %v12950_v13  ;;  %v13101_v12 = vld [vmem:[%s17678_s0 + $0x2ec] ss:$116 sps:$4 sm:$0xff]  }
 0x19d   :  { %6775 = vmatprep.mubr.bf16.mxu0 %v13010_v14  ;;  %7870 = vmatprep.mubr.bf16.mxu1 %v13010_v14  ;;  %v13041_v13 = vld [vmem:[%s17677_s1 + $0xea0] ss:$16 sps:$4 sm:$0xff]   ;;  %v13044_v14 = vld [vmem:[%s17677_s1 + $0xea8] ss:$16 sps:$4 sm:$0xff]  }
 0x19f   :  { %6758 = vmatpush1.bf16.msra.mxu0 %v12945_v15  ;;  %7853 = vmatpush1.bf16.msra.mxu1 %v12948_v16  ;;  %v13049_v15 = vld [vmem:[%s17677_s1 + $0xec4] ss:$16 sps:$4 sm:$0xff]   ;;  %v13052_v16 = vld [vmem:[%s17677_s1 + $0xecc] ss:$16 sps:$4 sm:$0xff]  }
 0x1a0   :  { %6759 = vmatprep.subr.bf16.mxu0 %v12953_v17  ;;  %7854 = vmatprep.subr.bf16.mxu1 %v12956_v18  ;;  %v13109_v17 = vld [vmem:[%s17678_s0 + $0x2e8] ss:$116 sps:$4 sm:$0xff]   ;;  %v13047_v18 = vld [vmem:[%s17677_s1 + $0xec0] ss:$16 sps:$4 sm:$0xff]  }
 0x1a3   :  { %6760 = vmatpush1.bf16.msra.mxu0 %v12951_v19  ;;  %7855 = vmatpush1.bf16.msra.mxu1 %v12954_v20  ;;  %v13050_v19 = vld [vmem:[%s17677_s1 + $0xec8] ss:$16 sps:$4 sm:$0xff]   ;;  %v13055_v20 = vld [vmem:[%s17677_s1 + $0xee4] ss:$16 sps:$4 sm:$0xff]  }
 0x1a4   :  { %6761 = vmatprep.subr.bf16.mxu0 %v12959_v21  ;;  %7856 = vmatprep.subr.bf16.mxu1 %v12962_v22  ;;  %v13058_v21 = vld [vmem:[%s17677_s1 + $0xeec] ss:$16 sps:$4 sm:$0xff]  }
 0x1a5   :  { %v13118_v22 = vld [vmem:[%s17678_s0 + $0x3c] ss:$116 sps:$4 sm:$0xff]  }
 0x1a7   :  { %6762 = vmatpush1.bf16.msra.mxu0 %v12957_v23  ;;  %7857 = vmatpush1.bf16.msra.mxu1 %v12960_v24  ;;  %v13053_v23 = vld [vmem:[%s17677_s1 + $0xee0] ss:$16 sps:$4 sm:$0xff]   ;;  %v13056_v24 = vld [vmem:[%s17677_s1 + $0xee8] ss:$16 sps:$4 sm:$0xff]  }
 0x1a8   :  { %6763 = vmatprep.subr.bf16.mxu0 %v12967_v25  ;;  %7858 = vmatprep.subr.bf16.mxu1 %v12970_v26  ;;  %v13061_v25 = vld [vmem:[%s17677_s1 + $0xf04] ss:$16 sps:$4 sm:$0xff]   ;;  %v13064_v26 = vld [vmem:[%s17677_s1 + $0xf0c] ss:$16 sps:$4 sm:$0xff]  }
 0x1ab   :  { %6764 = vmatpush1.bf16.msra.mxu0 %v12965_v27  ;;  %7859 = vmatpush1.bf16.msra.mxu1 %v12968_v28  ;;  %v13059_v27 = vld [vmem:[%s17677_s1 + $0xf00] ss:$16 sps:$4 sm:$0xff]   ;;  %v13062_v28 = vld [vmem:[%s17677_s1 + $0xf08] ss:$16 sps:$4 sm:$0xff]  }
 0x1ac   :  { %6765 = vmatprep.subr.bf16.mxu0 %v12974_v29  ;;  %7860 = vmatprep.subr.bf16.mxu1 %v12977_v30  ;;  %v13067_v29 = vld [vmem:[%s17677_s1 + $0xf24] ss:$16 sps:$4 sm:$0xff]   ;;  %v13070_v30 = vld [vmem:[%s17677_s1 + $0xf2c] ss:$16 sps:$4 sm:$0xff]  }
 0x1af   :  { %6766 = vmatpush1.bf16.msra.mxu0 %v12972_v31  ;;  %7861 = vmatpush1.bf16.msra.mxu1 %v12975_v32  ;;  %v13065_v31 = vld [vmem:[%s17677_s1 + $0xf20] ss:$16 sps:$4 sm:$0xff]   ;;  %v13068_v32 = vld [vmem:[%s17677_s1 + $0xf28] ss:$16 sps:$4 sm:$0xff]  }
 0x1b0   :  { %6767 = vmatprep.subr.bf16.mxu0 %v12982_v33  ;;  %7862 = vmatprep.subr.bf16.mxu1 %v12985_v34  ;;  %v13075_v33 = vld [vmem:[%s17677_s1 + $0xf44] ss:$16 sps:$4 sm:$0xff]   ;;  %v13078_v34 = vld [vmem:[%s17677_s1 + $0xf4c] ss:$16 sps:$4 sm:$0xff]  }
 0x1b3   :  { %6768 = vmatpush1.bf16.msra.mxu0 %v12980_v35  ;;  %7863 = vmatpush1.bf16.msra.mxu1 %v12983_v36  ;;  %v13073_v35 = vld [vmem:[%s17677_s1 + $0xf40] ss:$16 sps:$4 sm:$0xff]   ;;  %v13076_v36 = vld [vmem:[%s17677_s1 + $0xf48] ss:$16 sps:$4 sm:$0xff]  }
 0x1b4   :  { %6769 = vmatprep.subr.bf16.mxu0 %v12989_v37  ;;  %7864 = vmatprep.subr.bf16.mxu1 %v12992_v38  ;;  %v13082_v37 = vld [vmem:[%s17677_s1 + $0xf64] ss:$16 sps:$4 sm:$0xff]   ;;  %v13085_v38 = vld [vmem:[%s17677_s1 + $0xf6c] ss:$16 sps:$4 sm:$0xff]  }
 0x1b7   :  { %6770 = vmatpush1.bf16.msra.mxu0 %v12987_v39  ;;  %7865 = vmatpush1.bf16.msra.mxu1 %v12990_v40  ;;  %v13080_v39 = vld [vmem:[%s17677_s1 + $0xf60] ss:$16 sps:$4 sm:$0xff]   ;;  %v13083_v40 = vld [vmem:[%s17677_s1 + $0xf68] ss:$16 sps:$4 sm:$0xff]  }
 0x1b8   :  { %6771 = vmatprep.subr.bf16.mxu0 %v12997_v41  ;;  %7866 = vmatprep.subr.bf16.mxu1 %v13000_v42  ;;  %v13090_v41 = vld [vmem:[%s17677_s1 + $0xf84] ss:$16 sps:$4 sm:$0xff]   ;;  %v13093_v42 = vld [vmem:[%s17677_s1 + $0xf8c] ss:$16 sps:$4 sm:$0xff]  }
 0x1bb   :  { %6772 = vmatpush1.bf16.msra.mxu0 %v12995_v43  ;;  %7867 = vmatpush1.bf16.msra.mxu1 %v12998_v44  ;;  %v13088_v43 = vld [vmem:[%s17677_s1 + $0xf80] ss:$16 sps:$4 sm:$0xff]   ;;  %v13091_v44 = vld [vmem:[%s17677_s1 + $0xf88] ss:$16 sps:$4 sm:$0xff]  }
 0x1bc   :  { %6773 = vmatprep.subr.bf16.mxu0 %v13004_v45  ;;  %7868 = vmatprep.subr.bf16.mxu1 %v13007_v46  ;;  %v13097_v45 = vld [vmem:[%s17677_s1 + $0xfa4] ss:$16 sps:$4 sm:$0xff]   ;;  %v13100_v46 = vld [vmem:[%s17677_s1 + $0xfac] ss:$16 sps:$4 sm:$0xff]  }
 0x1bf   :  { %6774 = vmatpush1.bf16.msra.mxu0 %v13002_v47  ;;  %7869 = vmatpush1.bf16.msra.mxu1 %v13005_v48  ;;  %v13095_v47 = vld [vmem:[%s17677_s1 + $0xfa0] ss:$16 sps:$4 sm:$0xff]   ;;  %v13098_v48 = vld [vmem:[%s17677_s1 + $0xfa8] ss:$16 sps:$4 sm:$0xff]  }
 0x1c0   :  { %6816 = vmatprep.subr.bf16.mxu0 %v13013_v50  ;;  %7911 = vmatprep.subr.bf16.mxu1 %v13016_v51  ;;  %v13108_v50 = vld [vmem:[%s17677_s1 + $0xfcc] ss:$16 sps:$4 sm:$0xff]   ;;  %v13103_v51 = vld [vmem:[%s17677_s1 + $0xfc0] ss:$16 sps:$4 sm:$0xff]  }
 0x1c2   :  { %6776 = vmatmul.mubr.bf16.vlgmr.msra.gmra.mrb[0].mxu0 %v13008_v49  ;;  %7871 = vmatmul.mubr.bf16.vlgmr.msra.gmra.mrb[0].mxu1 %v13008_v49  ;;  %v13105_v49 = vld [vmem:[%s17677_s1 + $0xfc4] ss:$16 sps:$4 sm:$0xff]  }
 0x1c3   :  { %6817 = vmatpush1.bf16.msra.mxu0 %v13011_v52  ;;  %7912 = vmatpush1.bf16.msra.mxu1 %v13014_v53  ;;  %v13106_v52 = vld [vmem:[%s17677_s1 + $0xfc8] ss:$16 sps:$4 sm:$0xff]   ;;  %v13112_v53 = vld [vmem:[%s17677_s1 + $0xfe4] ss:$16 sps:$4 sm:$0xff]  }
 0x1c4   :  { %6818 = vmatprep.subr.bf16.mxu0 %v13019_v54  ;;  %7913 = vmatprep.subr.bf16.mxu1 %v13022_v55  ;;  %v13115_v54 = vld [vmem:[%s17677_s1 + $0xfec] ss:$16 sps:$4 sm:$0xff]   ;;  %v13110_v55 = vld [vmem:[%s17677_s1 + $0xfe0] ss:$16 sps:$4 sm:$0xff]  }
 0x1c5   :  { %6785 = vmatprep.mubr.bf16.mxu0 %v13071_v56  ;;  %7880 = vmatprep.mubr.bf16.mxu1 %v13071_v56  ;;  %v13113_v56 = vld [vmem:[%s17677_s1 + $0xfe8] ss:$16 sps:$4 sm:$0xff]  }
 0x1c7   :  { %6819 = vmatpush1.bf16.msra.mxu0 %v13017_v57  ;;  %7914 = vmatpush1.bf16.msra.mxu1 %v13020_v58  ;;  %v13116_v57 = vld [vmem:[%s17678_s0 + $0x38] ss:$116 sps:$4 sm:$0xff]   ;;  %v13121_v58 = vld [vmem:[%s17677_s1 + $0x1004] ss:$16 sps:$4 sm:$0xff]  }
 0x1c8   :  { %6820 = vmatprep.subr.bf16.mxu0 %v13025_v59  ;;  %7915 = vmatprep.subr.bf16.mxu1 %v13028_v60  ;;  %v13124_v59 = vld [vmem:[%s17677_s1 + $0x100c] ss:$16 sps:$4 sm:$0xff]   ;;  %v13119_v60 = vld [vmem:[%s17677_s1 + $0x1000] ss:$16 sps:$4 sm:$0xff]  }
 0x1ca   :  { %6786 = vmatmul.mubr.bf16.gmra.mrb[4].mxu0 %v13079_v61  ;;  %7881 = vmatmul.mubr.bf16.gmra.mrb[4].mxu1 %v13079_v61  ;;  %v13122_v61 = vld [vmem:[%s17677_s1 + $0x1008] ss:$16 sps:$4 sm:$0xff]  }
 0x1cb   :  { %6821 = vmatpush1.bf16.msra.mxu0 %v13023_v62  ;;  %7916 = vmatpush1.bf16.msra.mxu1 %v13026_v63  ;;  %v13127_v62 = vld [vmem:[%s17677_s1 + $0x1024] ss:$16 sps:$4 sm:$0xff]   ;;  %v13130_v63 = vld [vmem:[%s17677_s1 + $0x102c] ss:$16 sps:$4 sm:$0xff]  }
 0x1cc   :  { %6822 = vmatprep.subr.bf16.mxu0 %v13031_v0  ;;  %7917 = vmatprep.subr.bf16.mxu1 %v13034_v1  ;;  %v13179_v0 = vld [vmem:[%s17678_s0 + $0x124] ss:$116 sps:$4 sm:$0xff]   ;;  %v13125_v1 = vld [vmem:[%s17677_s1 + $0x1020] ss:$16 sps:$4 sm:$0xff]  }
 0x1cd   :  { %6795 = vmatprep.mubr.bf16.mxu0 %v13086_v2  ;;  %7890 = vmatprep.mubr.bf16.mxu1 %v13086_v2  ;;  %v13128_v2 = vld [vmem:[%s17677_s1 + $0x1028] ss:$16 sps:$4 sm:$0xff]  }
 0x1cf   :  { %6823 = vmatpush1.bf16.msra.mxu0 %v13029_v3  ;;  %7918 = vmatpush1.bf16.msra.mxu1 %v13032_v4  ;;  %v13133_v3 = vld [vmem:[%s17677_s1 + $0x1044] ss:$16 sps:$4 sm:$0xff]   ;;  %v13136_v4 = vld [vmem:[%s17677_s1 + $0x104c] ss:$16 sps:$4 sm:$0xff]  }
 0x1d0   :  { %6824 = vmatprep.subr.bf16.mxu0 %v13037_v5  ;;  %7919 = vmatprep.subr.bf16.mxu1 %v13040_v6  ;;  %v13187_v5 = vld [vmem:[%s17678_s0 + $0x120] ss:$116 sps:$4 sm:$0xff]  }
 0x1d1   :  { %v13131_v6 = vld [vmem:[%s17677_s1 + $0x1040] ss:$16 sps:$4 sm:$0xff]  }
 0x1d2   :  { %6796 = vmatmul.mubr.bf16.gmra.mrb[8].mxu0 %v13094_v7  ;;  %7891 = vmatmul.mubr.bf16.gmra.mrb[8].mxu1 %v13094_v7  ;;  %v13134_v7 = vld [vmem:[%s17677_s1 + $0x1048] ss:$16 sps:$4 sm:$0xff]  }
 0x1d3   :  { %6825 = vmatpush1.bf16.msra.mxu0 %v13035_v8  ;;  %7920 = vmatpush1.bf16.msra.mxu1 %v13038_v9  ;;  %v13139_v8 = vld [vmem:[%s17677_s1 + $0x1064] ss:$16 sps:$4 sm:$0xff]   ;;  %v13142_v9 = vld [vmem:[%s17677_s1 + $0x106c] ss:$16 sps:$4 sm:$0xff]  }
 0x1d4   :  { %6826 = vmatprep.subr.bf16.mxu0 %v13043_v10  ;;  %7921 = vmatprep.subr.bf16.mxu1 %v13046_v11  ;;  %v13194_v10 = vld [vmem:[%s17678_s0 + $0x20c] ss:$116 sps:$4 sm:$0xff]  }
 0x1d5   :  { %6805 = vmatprep.mubr.bf16.mxu0 %v13101_v12  ;;  %7900 = vmatprep.mubr.bf16.mxu1 %v13101_v12  ;;  %v13137_v11 = vld [vmem:[%s17677_s1 + $0x1060] ss:$16 sps:$4 sm:$0xff]   ;;  %v13140_v12 = vld [vmem:[%s17677_s1 + $0x1068] ss:$16 sps:$4 sm:$0xff]  }
 0x1d7   :  { %6827 = vmatpush1.bf16.msra.mxu0 %v13041_v13  ;;  %7922 = vmatpush1.bf16.msra.mxu1 %v13044_v14  ;;  %v13145_v13 = vld [vmem:[%s17677_s1 + $0x1084] ss:$16 sps:$4 sm:$0xff]   ;;  %v13148_v14 = vld [vmem:[%s17677_s1 + $0x108c] ss:$16 sps:$4 sm:$0xff]  }
 0x1d8   :  { %6828 = vmatprep.subr.bf16.mxu0 %v13049_v15  ;;  %7923 = vmatprep.subr.bf16.mxu1 %v13052_v16  ;;  %v13202_v15 = vld [vmem:[%s17678_s0 + $0x208] ss:$116 sps:$4 sm:$0xff]   ;;  %v13143_v16 = vld [vmem:[%s17677_s1 + $0x1080] ss:$16 sps:$4 sm:$0xff]  }
 0x1da   :  { %6806 = vmatmul.mubr.bf16.gmra.mrb[12].mxu0 %v13109_v17  ;;  %7901 = vmatmul.mubr.bf16.gmra.mrb[12].mxu1 %v13109_v17  ;;  %v13146_v17 = vld [vmem:[%s17677_s1 + $0x1088] ss:$16 sps:$4 sm:$0xff]  }
 0x1db   :  { %6829 = vmatpush1.bf16.msra.mxu0 %v13047_v18  ;;  %7924 = vmatpush1.bf16.msra.mxu1 %v13050_v19  ;;  %v13151_v18 = vld [vmem:[%s17677_s1 + $0x10a4] ss:$16 sps:$4 sm:$0xff]   ;;  %v13154_v19 = vld [vmem:[%s17677_s1 + $0x10ac] ss:$16 sps:$4 sm:$0xff]  }
 0x1dc   :  { %6830 = vmatprep.subr.bf16.mxu0 %v13055_v20  ;;  %7925 = vmatprep.subr.bf16.mxu1 %v13058_v21  ;;  %v13209_v20 = vld [vmem:[%s17678_s0 + $0x2f4] ss:$116 sps:$4 sm:$0xff]   ;;  %v13149_v21 = vld [vmem:[%s17677_s1 + $0x10a0] ss:$16 sps:$4 sm:$0xff]  }
 0x1dd   :  { %6848 = vmatprep.mubr.bf16.mxu0 %v13118_v22  ;;  %7943 = vmatprep.mubr.bf16.mxu1 %v13118_v22  ;;  %v13152_v22 = vld [vmem:[%s17677_s1 + $0x10a8] ss:$16 sps:$4 sm:$0xff]  }
 0x1df   :  { %6831 = vmatpush1.bf16.msra.mxu0 %v13053_v23  ;;  %7926 = vmatpush1.bf16.msra.mxu1 %v13056_v24  ;;  %v13157_v23 = vld [vmem:[%s17677_s1 + $0x10c4] ss:$16 sps:$4 sm:$0xff]   ;;  %v13160_v24 = vld [vmem:[%s17677_s1 + $0x10cc] ss:$16 sps:$4 sm:$0xff]  }
 0x1e0   :  { %6832 = vmatprep.subr.bf16.mxu0 %v13061_v25  ;;  %7927 = vmatprep.subr.bf16.mxu1 %v13064_v26  ;;  %v13217_v25 = vld [vmem:[%s17678_s0 + $0x2f0] ss:$116 sps:$4 sm:$0xff]  }
 0x1e1   :  { %v13155_v26 = vld [vmem:[%s17677_s1 + $0x10c0] ss:$16 sps:$4 sm:$0xff]  }
 0x1e3   :  { %6833 = vmatpush1.bf16.msra.mxu0 %v13059_v27  ;;  %7928 = vmatpush1.bf16.msra.mxu1 %v13062_v28  ;;  %v13158_v27 = vld [vmem:[%s17677_s1 + $0x10c8] ss:$16 sps:$4 sm:$0xff]   ;;  %v13163_v28 = vld [vmem:[%s17677_s1 + $0x10e4] ss:$16 sps:$4 sm:$0xff]  }
 0x1e4   :  { %6834 = vmatprep.subr.bf16.mxu0 %v13067_v29  ;;  %7929 = vmatprep.subr.bf16.mxu1 %v13070_v30  ;;  %v13166_v29 = vld [vmem:[%s17677_s1 + $0x10ec] ss:$16 sps:$4 sm:$0xff]   ;;  %v13226_v30 = vld [vmem:[%s17678_s0 + $0x44] ss:$116 sps:$4 sm:$0xff]  }
 0x1e7   :  { %6835 = vmatpush1.bf16.msra.mxu0 %v13065_v31  ;;  %7930 = vmatpush1.bf16.msra.mxu1 %v13068_v32  ;;  %v13161_v31 = vld [vmem:[%s17677_s1 + $0x10e0] ss:$16 sps:$4 sm:$0xff]   ;;  %v13164_v32 = vld [vmem:[%s17677_s1 + $0x10e8] ss:$16 sps:$4 sm:$0xff]  }
 0x1e8   :  { %6836 = vmatprep.subr.bf16.mxu0 %v13075_v33  ;;  %7931 = vmatprep.subr.bf16.mxu1 %v13078_v34  ;;  %v13169_v33 = vld [vmem:[%s17677_s1 + $0x1104] ss:$16 sps:$4 sm:$0xff]   ;;  %v13172_v34 = vld [vmem:[%s17677_s1 + $0x110c] ss:$16 sps:$4 sm:$0xff]  }
 0x1eb   :  { %6837 = vmatpush1.bf16.msra.mxu0 %v13073_v35  ;;  %7932 = vmatpush1.bf16.msra.mxu1 %v13076_v36  ;;  %v13167_v35 = vld [vmem:[%s17677_s1 + $0x1100] ss:$16 sps:$4 sm:$0xff]   ;;  %v13170_v36 = vld [vmem:[%s17677_s1 + $0x1108] ss:$16 sps:$4 sm:$0xff]  }
 0x1ec   :  { %6838 = vmatprep.subr.bf16.mxu0 %v13082_v37  ;;  %7933 = vmatprep.subr.bf16.mxu1 %v13085_v38  ;;  %v13175_v37 = vld [vmem:[%s17677_s1 + $0x1124] ss:$16 sps:$4 sm:$0xff]   ;;  %v13178_v38 = vld [vmem:[%s17677_s1 + $0x112c] ss:$16 sps:$4 sm:$0xff]  }
 0x1ef   :  { %6839 = vmatpush1.bf16.msra.mxu0 %v13080_v39  ;;  %7934 = vmatpush1.bf16.msra.mxu1 %v13083_v40  ;;  %v13173_v39 = vld [vmem:[%s17677_s1 + $0x1120] ss:$16 sps:$4 sm:$0xff]   ;;  %v13176_v40 = vld [vmem:[%s17677_s1 + $0x1128] ss:$16 sps:$4 sm:$0xff]  }
 0x1f0   :  { %6840 = vmatprep.subr.bf16.mxu0 %v13090_v41  ;;  %7935 = vmatprep.subr.bf16.mxu1 %v13093_v42  ;;  %v13183_v41 = vld [vmem:[%s17677_s1 + $0x1144] ss:$16 sps:$4 sm:$0xff]   ;;  %v13186_v42 = vld [vmem:[%s17677_s1 + $0x114c] ss:$16 sps:$4 sm:$0xff]  }
 0x1f3   :  { %6841 = vmatpush1.bf16.msra.mxu0 %v13088_v43  ;;  %7936 = vmatpush1.bf16.msra.mxu1 %v13091_v44  ;;  %v13181_v43 = vld [vmem:[%s17677_s1 + $0x1140] ss:$16 sps:$4 sm:$0xff]   ;;  %v13184_v44 = vld [vmem:[%s17677_s1 + $0x1148] ss:$16 sps:$4 sm:$0xff]  }
 0x1f4   :  { %6842 = vmatprep.subr.bf16.mxu0 %v13097_v45  ;;  %7937 = vmatprep.subr.bf16.mxu1 %v13100_v46  ;;  %v13190_v45 = vld [vmem:[%s17677_s1 + $0x1164] ss:$16 sps:$4 sm:$0xff]   ;;  %v13193_v46 = vld [vmem:[%s17677_s1 + $0x116c] ss:$16 sps:$4 sm:$0xff]  }
 0x1f7   :  { %6843 = vmatpush1.bf16.msra.mxu0 %v13095_v47  ;;  %7938 = vmatpush1.bf16.msra.mxu1 %v13098_v48  ;;  %v13188_v47 = vld [vmem:[%s17677_s1 + $0x1160] ss:$16 sps:$4 sm:$0xff]   ;;  %v13191_v48 = vld [vmem:[%s17677_s1 + $0x1168] ss:$16 sps:$4 sm:$0xff]  }
 0x1f8   :  { %6844 = vmatprep.subr.bf16.mxu0 %v13105_v49  ;;  %7939 = vmatprep.subr.bf16.mxu1 %v13108_v50  ;;  %v13198_v49 = vld [vmem:[%s17677_s1 + $0x1184] ss:$16 sps:$4 sm:$0xff]   ;;  %v13201_v50 = vld [vmem:[%s17677_s1 + $0x118c] ss:$16 sps:$4 sm:$0xff]  }
 0x1fb   :  { %6845 = vmatpush1.bf16.msra.mxu0 %v13103_v51  ;;  %7940 = vmatpush1.bf16.msra.mxu1 %v13106_v52  ;;  %v13196_v51 = vld [vmem:[%s17677_s1 + $0x1180] ss:$16 sps:$4 sm:$0xff]   ;;  %v13199_v52 = vld [vmem:[%s17677_s1 + $0x1188] ss:$16 sps:$4 sm:$0xff]  }
 0x1fc   :  { %6846 = vmatprep.subr.bf16.mxu0 %v13112_v53  ;;  %7941 = vmatprep.subr.bf16.mxu1 %v13115_v54  ;;  %v13205_v53 = vld [vmem:[%s17677_s1 + $0x11a4] ss:$16 sps:$4 sm:$0xff]   ;;  %v13208_v54 = vld [vmem:[%s17677_s1 + $0x11ac] ss:$16 sps:$4 sm:$0xff]  }
 0x1ff   :  { %6847 = vmatpush1.bf16.msra.mxu0 %v13110_v55  ;;  %7942 = vmatpush1.bf16.msra.mxu1 %v13113_v56  ;;  %v13203_v55 = vld [vmem:[%s17677_s1 + $0x11a0] ss:$16 sps:$4 sm:$0xff]   ;;  %v13206_v56 = vld [vmem:[%s17677_s1 + $0x11a8] ss:$16 sps:$4 sm:$0xff]  }
 0x200   :  { %6889 = vmatprep.subr.bf16.mxu0 %v13121_v58  ;;  %7984 = vmatprep.subr.bf16.mxu1 %v13124_v59  ;;  %v13216_v58 = vld [vmem:[%s17677_s1 + $0x11cc] ss:$16 sps:$4 sm:$0xff]   ;;  %v13211_v59 = vld [vmem:[%s17677_s1 + $0x11c0] ss:$16 sps:$4 sm:$0xff]  }
 0x202   :  { %6849 = vmatmul.mubr.bf16.vlgmr.msra.gmra.mrb[0].mxu0 %v13116_v57  ;;  %7944 = vmatmul.mubr.bf16.vlgmr.msra.gmra.mrb[0].mxu1 %v13116_v57  ;;  %v13213_v57 = vld [vmem:[%s17677_s1 + $0x11c4] ss:$16 sps:$4 sm:$0xff]  }
 0x203   :  { %6890 = vmatpush1.bf16.msra.mxu0 %v13119_v60  ;;  %7985 = vmatpush1.bf16.msra.mxu1 %v13122_v61  ;;  %v13214_v60 = vld [vmem:[%s17677_s1 + $0x11c8] ss:$16 sps:$4 sm:$0xff]   ;;  %v13220_v61 = vld [vmem:[%s17677_s1 + $0x11e4] ss:$16 sps:$4 sm:$0xff]  }
 0x204   :  { %6891 = vmatprep.subr.bf16.mxu0 %v13127_v62  ;;  %7986 = vmatprep.subr.bf16.mxu1 %v13130_v63  ;;  %v13223_v62 = vld [vmem:[%s17677_s1 + $0x11ec] ss:$16 sps:$4 sm:$0xff]   ;;  %v13218_v63 = vld [vmem:[%s17677_s1 + $0x11e0] ss:$16 sps:$4 sm:$0xff]  }
 0x205   :  { %6858 = vmatprep.mubr.bf16.mxu0 %v13179_v0  ;;  %7953 = vmatprep.mubr.bf16.mxu1 %v13179_v0  ;;  %v13221_v0 = vld [vmem:[%s17677_s1 + $0x11e8] ss:$16 sps:$4 sm:$0xff]  }
 0x207   :  { %6892 = vmatpush1.bf16.msra.mxu0 %v13125_v1  ;;  %7987 = vmatpush1.bf16.msra.mxu1 %v13128_v2  ;;  %v13224_v1 = vld [vmem:[%s17678_s0 + $0x40] ss:$116 sps:$4 sm:$0xff]  }
 0x208   :  { %6893 = vmatprep.subr.bf16.mxu0 %v13133_v3  ;;  %7988 = vmatprep.subr.bf16.mxu1 %v13136_v4  ;;  %v13229_v2 = vld [vmem:[%s17677_s1 + $0x1204] ss:$16 sps:$4 sm:$0xff]   ;;  %v13232_v3 = vld [vmem:[%s17677_s1 + $0x120c] ss:$16 sps:$4 sm:$0xff]   ;;  %v13227_v4 = vld [vmem:[%s17677_s1 + $0x1200] ss:$16 sps:$4 sm:$0xff]  }
 0x20a   :  { %6859 = vmatmul.mubr.bf16.gmra.mrb[4].mxu0 %v13187_v5  ;;  %7954 = vmatmul.mubr.bf16.gmra.mrb[4].mxu1 %v13187_v5  ;;  %v13230_v5 = vld [vmem:[%s17677_s1 + $0x1208] ss:$16 sps:$4 sm:$0xff]  }
 0x20b   :  { %6894 = vmatpush1.bf16.msra.mxu0 %v13131_v6  ;;  %7989 = vmatpush1.bf16.msra.mxu1 %v13134_v7  ;;  %v13235_v6 = vld [vmem:[%s17677_s1 + $0x1224] ss:$16 sps:$4 sm:$0xff]   ;;  %v13238_v7 = vld [vmem:[%s17677_s1 + $0x122c] ss:$16 sps:$4 sm:$0xff]  }
 0x20c   :  { %6895 = vmatprep.subr.bf16.mxu0 %v13139_v8  ;;  %7990 = vmatprep.subr.bf16.mxu1 %v13142_v9  ;;  %v13287_v8 = vld [vmem:[%s17678_s0 + $0x12c] ss:$116 sps:$4 sm:$0xff]  }
 0x20d   :  { %6868 = vmatprep.mubr.bf16.mxu0 %v13194_v10  ;;  %7963 = vmatprep.mubr.bf16.mxu1 %v13194_v10  ;;  %v13233_v9 = vld [vmem:[%s17677_s1 + $0x1220] ss:$16 sps:$4 sm:$0xff]   ;;  %v13236_v10 = vld [vmem:[%s17677_s1 + $0x1228] ss:$16 sps:$4 sm:$0xff]  }
 0x20f   :  { %6896 = vmatpush1.bf16.msra.mxu0 %v13137_v11  ;;  %7991 = vmatpush1.bf16.msra.mxu1 %v13140_v12  ;;  %v13241_v11 = vld [vmem:[%s17677_s1 + $0x1244] ss:$16 sps:$4 sm:$0xff]   ;;  %v13244_v12 = vld [vmem:[%s17677_s1 + $0x124c] ss:$16 sps:$4 sm:$0xff]  }
 0x210   :  { %6897 = vmatprep.subr.bf16.mxu0 %v13145_v13  ;;  %7992 = vmatprep.subr.bf16.mxu1 %v13148_v14  ;;  %v13295_v13 = vld [vmem:[%s17678_s0 + $0x128] ss:$116 sps:$4 sm:$0xff]   ;;  %v13239_v14 = vld [vmem:[%s17677_s1 + $0x1240] ss:$16 sps:$4 sm:$0xff]  }
 0x212   :  { %6869 = vmatmul.mubr.bf16.gmra.mrb[8].mxu0 %v13202_v15  ;;  %7964 = vmatmul.mubr.bf16.gmra.mrb[8].mxu1 %v13202_v15  ;;  %v13242_v15 = vld [vmem:[%s17677_s1 + $0x1248] ss:$16 sps:$4 sm:$0xff]  }
 0x213   :  { %6898 = vmatpush1.bf16.msra.mxu0 %v13143_v16  ;;  %7993 = vmatpush1.bf16.msra.mxu1 %v13146_v17  ;;  %v13247_v16 = vld [vmem:[%s17677_s1 + $0x1264] ss:$16 sps:$4 sm:$0xff]   ;;  %v13250_v17 = vld [vmem:[%s17677_s1 + $0x126c] ss:$16 sps:$4 sm:$0xff]  }
 0x214   :  { %6899 = vmatprep.subr.bf16.mxu0 %v13151_v18  ;;  %7994 = vmatprep.subr.bf16.mxu1 %v13154_v19  ;;  %v13302_v18 = vld [vmem:[%s17678_s0 + $0x214] ss:$116 sps:$4 sm:$0xff]   ;;  %v13245_v19 = vld [vmem:[%s17677_s1 + $0x1260] ss:$16 sps:$4 sm:$0xff]  }
 0x215   :  { %6878 = vmatprep.mubr.bf16.mxu0 %v13209_v20  ;;  %7973 = vmatprep.mubr.bf16.mxu1 %v13209_v20  ;;  %v13248_v20 = vld [vmem:[%s17677_s1 + $0x1268] ss:$16 sps:$4 sm:$0xff]  }
 0x217   :  { %6900 = vmatpush1.bf16.msra.mxu0 %v13149_v21  ;;  %7995 = vmatpush1.bf16.msra.mxu1 %v13152_v22  ;;  %v13253_v21 = vld [vmem:[%s17677_s1 + $0x1284] ss:$16 sps:$4 sm:$0xff]   ;;  %v13256_v22 = vld [vmem:[%s17677_s1 + $0x128c] ss:$16 sps:$4 sm:$0xff]  }
 0x218   :  { %6901 = vmatprep.subr.bf16.mxu0 %v13157_v23  ;;  %7996 = vmatprep.subr.bf16.mxu1 %v13160_v24  ;;  %v13310_v23 = vld [vmem:[%s17678_s0 + $0x210] ss:$116 sps:$4 sm:$0xff]  }
 0x219   :  { %v13251_v24 = vld [vmem:[%s17677_s1 + $0x1280] ss:$16 sps:$4 sm:$0xff]  }
 0x21a   :  { %6879 = vmatmul.mubr.bf16.gmra.mrb[12].mxu0 %v13217_v25  ;;  %7974 = vmatmul.mubr.bf16.gmra.mrb[12].mxu1 %v13217_v25  ;;  %v13254_v25 = vld [vmem:[%s17677_s1 + $0x1288] ss:$16 sps:$4 sm:$0xff]  }
 0x21b   :  { %6902 = vmatpush1.bf16.msra.mxu0 %v13155_v26  ;;  %7997 = vmatpush1.bf16.msra.mxu1 %v13158_v27  ;;  %v13259_v26 = vld [vmem:[%s17677_s1 + $0x12a4] ss:$16 sps:$4 sm:$0xff]   ;;  %v13262_v27 = vld [vmem:[%s17677_s1 + $0x12ac] ss:$16 sps:$4 sm:$0xff]  }
 0x21c   :  { %6903 = vmatprep.subr.bf16.mxu0 %v13163_v28  ;;  %7998 = vmatprep.subr.bf16.mxu1 %v13166_v29  ;;  %v13317_v28 = vld [vmem:[%s17678_s0 + $0x2fc] ss:$116 sps:$4 sm:$0xff]  }
 0x21d   :  { %6921 = vmatprep.mubr.bf16.mxu0 %v13226_v30  ;;  %8016 = vmatprep.mubr.bf16.mxu1 %v13226_v30  ;;  %v13257_v29 = vld [vmem:[%s17677_s1 + $0x12a0] ss:$16 sps:$4 sm:$0xff]   ;;  %v13260_v30 = vld [vmem:[%s17677_s1 + $0x12a8] ss:$16 sps:$4 sm:$0xff]  }
 0x21f   :  { %6904 = vmatpush1.bf16.msra.mxu0 %v13161_v31  ;;  %7999 = vmatpush1.bf16.msra.mxu1 %v13164_v32  ;;  %v13265_v31 = vld [vmem:[%s17677_s1 + $0x12c4] ss:$16 sps:$4 sm:$0xff]   ;;  %v13268_v32 = vld [vmem:[%s17677_s1 + $0x12cc] ss:$16 sps:$4 sm:$0xff]  }
 0x220   :  { %6905 = vmatprep.subr.bf16.mxu0 %v13169_v33  ;;  %8000 = vmatprep.subr.bf16.mxu1 %v13172_v34  ;;  %v13325_v33 = vld [vmem:[%s17678_s0 + $0x2f8] ss:$116 sps:$4 sm:$0xff]   ;;  %v13263_v34 = vld [vmem:[%s17677_s1 + $0x12c0] ss:$16 sps:$4 sm:$0xff]  }
 0x223   :  { %6906 = vmatpush1.bf16.msra.mxu0 %v13167_v35  ;;  %8001 = vmatpush1.bf16.msra.mxu1 %v13170_v36  ;;  %v13266_v35 = vld [vmem:[%s17677_s1 + $0x12c8] ss:$16 sps:$4 sm:$0xff]   ;;  %v13271_v36 = vld [vmem:[%s17677_s1 + $0x12e4] ss:$16 sps:$4 sm:$0xff]  }
 0x224   :  { %6907 = vmatprep.subr.bf16.mxu0 %v13175_v37  ;;  %8002 = vmatprep.subr.bf16.mxu1 %v13178_v38  ;;  %v13274_v37 = vld [vmem:[%s17677_s1 + $0x12ec] ss:$16 sps:$4 sm:$0xff]  }
 0x225   :  { %v13334_v38 = vld [vmem:[%s17678_s0 + $0x4c] ss:$116 sps:$4 sm:$0xff]  }
 0x227   :  { %6908 = vmatpush1.bf16.msra.mxu0 %v13173_v39  ;;  %8003 = vmatpush1.bf16.msra.mxu1 %v13176_v40  ;;  %v13269_v39 = vld [vmem:[%s17677_s1 + $0x12e0] ss:$16 sps:$4 sm:$0xff]   ;;  %v13272_v40 = vld [vmem:[%s17677_s1 + $0x12e8] ss:$16 sps:$4 sm:$0xff]  }
 0x228   :  { %6909 = vmatprep.subr.bf16.mxu0 %v13183_v41  ;;  %8004 = vmatprep.subr.bf16.mxu1 %v13186_v42  ;;  %v13277_v41 = vld [vmem:[%s17677_s1 + $0x1304] ss:$16 sps:$4 sm:$0xff]   ;;  %v13280_v42 = vld [vmem:[%s17677_s1 + $0x130c] ss:$16 sps:$4 sm:$0xff]  }
 0x22b   :  { %6910 = vmatpush1.bf16.msra.mxu0 %v13181_v43  ;;  %8005 = vmatpush1.bf16.msra.mxu1 %v13184_v44  ;;  %v13275_v43 = vld [vmem:[%s17677_s1 + $0x1300] ss:$16 sps:$4 sm:$0xff]   ;;  %v13278_v44 = vld [vmem:[%s17677_s1 + $0x1308] ss:$16 sps:$4 sm:$0xff]  }
 0x22c   :  { %6911 = vmatprep.subr.bf16.mxu0 %v13190_v45  ;;  %8006 = vmatprep.subr.bf16.mxu1 %v13193_v46  ;;  %v13283_v45 = vld [vmem:[%s17677_s1 + $0x1324] ss:$16 sps:$4 sm:$0xff]   ;;  %v13286_v46 = vld [vmem:[%s17677_s1 + $0x132c] ss:$16 sps:$4 sm:$0xff]  }
 0x22f   :  { %6912 = vmatpush1.bf16.msra.mxu0 %v13188_v47  ;;  %8007 = vmatpush1.bf16.msra.mxu1 %v13191_v48  ;;  %v13281_v47 = vld [vmem:[%s17677_s1 + $0x1320] ss:$16 sps:$4 sm:$0xff]   ;;  %v13284_v48 = vld [vmem:[%s17677_s1 + $0x1328] ss:$16 sps:$4 sm:$0xff]  }
 0x230   :  { %6913 = vmatprep.subr.bf16.mxu0 %v13198_v49  ;;  %8008 = vmatprep.subr.bf16.mxu1 %v13201_v50  ;;  %v13291_v49 = vld [vmem:[%s17677_s1 + $0x1344] ss:$16 sps:$4 sm:$0xff]   ;;  %v13294_v50 = vld [vmem:[%s17677_s1 + $0x134c] ss:$16 sps:$4 sm:$0xff]  }
 0x233   :  { %6914 = vmatpush1.bf16.msra.mxu0 %v13196_v51  ;;  %8009 = vmatpush1.bf16.msra.mxu1 %v13199_v52  ;;  %v13289_v51 = vld [vmem:[%s17677_s1 + $0x1340] ss:$16 sps:$4 sm:$0xff]   ;;  %v13292_v52 = vld [vmem:[%s17677_s1 + $0x1348] ss:$16 sps:$4 sm:$0xff]  }
 0x234   :  { %6915 = vmatprep.subr.bf16.mxu0 %v13205_v53  ;;  %8010 = vmatprep.subr.bf16.mxu1 %v13208_v54  ;;  %v13298_v53 = vld [vmem:[%s17677_s1 + $0x1364] ss:$16 sps:$4 sm:$0xff]   ;;  %v13301_v54 = vld [vmem:[%s17677_s1 + $0x136c] ss:$16 sps:$4 sm:$0xff]  }
 0x237   :  { %6916 = vmatpush1.bf16.msra.mxu0 %v13203_v55  ;;  %8011 = vmatpush1.bf16.msra.mxu1 %v13206_v56  ;;  %v13296_v55 = vld [vmem:[%s17677_s1 + $0x1360] ss:$16 sps:$4 sm:$0xff]   ;;  %v13299_v56 = vld [vmem:[%s17677_s1 + $0x1368] ss:$16 sps:$4 sm:$0xff]  }
 0x238   :  { %6917 = vmatprep.subr.bf16.mxu0 %v13213_v57  ;;  %8012 = vmatprep.subr.bf16.mxu1 %v13216_v58  ;;  %v13306_v57 = vld [vmem:[%s17677_s1 + $0x1384] ss:$16 sps:$4 sm:$0xff]   ;;  %v13309_v58 = vld [vmem:[%s17677_s1 + $0x138c] ss:$16 sps:$4 sm:$0xff]  }
 0x23b   :  { %6918 = vmatpush1.bf16.msra.mxu0 %v13211_v59  ;;  %8013 = vmatpush1.bf16.msra.mxu1 %v13214_v60  ;;  %v13304_v59 = vld [vmem:[%s17677_s1 + $0x1380] ss:$16 sps:$4 sm:$0xff]   ;;  %v13307_v60 = vld [vmem:[%s17677_s1 + $0x1388] ss:$16 sps:$4 sm:$0xff]  }
 0x23c   :  { %6919 = vmatprep.subr.bf16.mxu0 %v13220_v61  ;;  %8014 = vmatprep.subr.bf16.mxu1 %v13223_v62  ;;  %v13313_v61 = vld [vmem:[%s17677_s1 + $0x13a4] ss:$16 sps:$4 sm:$0xff]   ;;  %v13316_v62 = vld [vmem:[%s17677_s1 + $0x13ac] ss:$16 sps:$4 sm:$0xff]  }
 0x23f   :  { %6920 = vmatpush1.bf16.msra.mxu0 %v13218_v63  ;;  %8015 = vmatpush1.bf16.msra.mxu1 %v13221_v0  ;;  %v13311_v63 = vld [vmem:[%s17677_s1 + $0x13a0] ss:$16 sps:$4 sm:$0xff]   ;;  %v13314_v0 = vld [vmem:[%s17677_s1 + $0x13a8] ss:$16 sps:$4 sm:$0xff]  }
 0x240   :  { %6962 = vmatprep.subr.bf16.mxu0 %v13229_v2  ;;  %8057 = vmatprep.subr.bf16.mxu1 %v13232_v3  ;;  %v13324_v2 = vld [vmem:[%s17677_s1 + $0x13cc] ss:$16 sps:$4 sm:$0xff]   ;;  %v13319_v3 = vld [vmem:[%s17677_s1 + $0x13c0] ss:$16 sps:$4 sm:$0xff]  }
 0x242   :  { %6922 = vmatmul.mubr.bf16.vlgmr.msra.gmra.mrb[0].mxu0 %v13224_v1  ;;  %8017 = vmatmul.mubr.bf16.vlgmr.msra.gmra.mrb[0].mxu1 %v13224_v1  ;;  %v13321_v1 = vld [vmem:[%s17677_s1 + $0x13c4] ss:$16 sps:$4 sm:$0xff]  }
 0x243   :  { %6963 = vmatpush1.bf16.msra.mxu0 %v13227_v4  ;;  %8058 = vmatpush1.bf16.msra.mxu1 %v13230_v5  ;;  %v13322_v4 = vld [vmem:[%s17677_s1 + $0x13c8] ss:$16 sps:$4 sm:$0xff]   ;;  %v13328_v5 = vld [vmem:[%s17677_s1 + $0x13e4] ss:$16 sps:$4 sm:$0xff]  }
 0x244   :  { %6964 = vmatprep.subr.bf16.mxu0 %v13235_v6  ;;  %8059 = vmatprep.subr.bf16.mxu1 %v13238_v7  ;;  %v13331_v6 = vld [vmem:[%s17677_s1 + $0x13ec] ss:$16 sps:$4 sm:$0xff]   ;;  %v13326_v7 = vld [vmem:[%s17677_s1 + $0x13e0] ss:$16 sps:$4 sm:$0xff]  }
 0x245   :  { %6931 = vmatprep.mubr.bf16.mxu0 %v13287_v8  ;;  %8026 = vmatprep.mubr.bf16.mxu1 %v13287_v8  ;;  %v13329_v8 = vld [vmem:[%s17677_s1 + $0x13e8] ss:$16 sps:$4 sm:$0xff]  }
 0x247   :  { %6965 = vmatpush1.bf16.msra.mxu0 %v13233_v9  ;;  %8060 = vmatpush1.bf16.msra.mxu1 %v13236_v10  ;;  %v13337_v9 = vld [vmem:[%s17677_s1 + $0x1404] ss:$16 sps:$4 sm:$0xff]   ;;  %v13340_v10 = vld [vmem:[%s17677_s1 + $0x140c] ss:$16 sps:$4 sm:$0xff]  }
 0x248   :  { %6966 = vmatprep.subr.bf16.mxu0 %v13241_v11  ;;  %8061 = vmatprep.subr.bf16.mxu1 %v13244_v12  ;;  %v13332_v11 = vld [vmem:[%s17678_s0 + $0x48] ss:$116 sps:$4 sm:$0xff]   ;;  %v13335_v12 = vld [vmem:[%s17677_s1 + $0x1400] ss:$16 sps:$4 sm:$0xff]  }
 0x24a   :  { %6932 = vmatmul.mubr.bf16.gmra.mrb[4].mxu0 %v13295_v13  ;;  %8027 = vmatmul.mubr.bf16.gmra.mrb[4].mxu1 %v13295_v13  ;;  %v13338_v13 = vld [vmem:[%s17677_s1 + $0x1408] ss:$16 sps:$4 sm:$0xff]  }
 0x24b   :  { %6967 = vmatpush1.bf16.msra.mxu0 %v13239_v14  ;;  %8062 = vmatpush1.bf16.msra.mxu1 %v13242_v15  ;;  %v13343_v14 = vld [vmem:[%s17677_s1 + $0x1424] ss:$16 sps:$4 sm:$0xff]   ;;  %v13346_v15 = vld [vmem:[%s17677_s1 + $0x142c] ss:$16 sps:$4 sm:$0xff]  }
 0x24c   :  { %6968 = vmatprep.subr.bf16.mxu0 %v13247_v16  ;;  %8063 = vmatprep.subr.bf16.mxu1 %v13250_v17  ;;  %v13395_v16 = vld [vmem:[%s17678_s0 + $0x134] ss:$116 sps:$4 sm:$0xff]   ;;  %v13341_v17 = vld [vmem:[%s17677_s1 + $0x1420] ss:$16 sps:$4 sm:$0xff]  }
 0x24d   :  { %6941 = vmatprep.mubr.bf16.mxu0 %v13302_v18  ;;  %8036 = vmatprep.mubr.bf16.mxu1 %v13302_v18  ;;  %v13344_v18 = vld [vmem:[%s17677_s1 + $0x1428] ss:$16 sps:$4 sm:$0xff]  }
 0x24f   :  { %6969 = vmatpush1.bf16.msra.mxu0 %v13245_v19  ;;  %8064 = vmatpush1.bf16.msra.mxu1 %v13248_v20  ;;  %v13349_v19 = vld [vmem:[%s17677_s1 + $0x1444] ss:$16 sps:$4 sm:$0xff]   ;;  %v13352_v20 = vld [vmem:[%s17677_s1 + $0x144c] ss:$16 sps:$4 sm:$0xff]  }
 0x250   :  { %6970 = vmatprep.subr.bf16.mxu0 %v13253_v21  ;;  %8065 = vmatprep.subr.bf16.mxu1 %v13256_v22  ;;  %v13403_v21 = vld [vmem:[%s17678_s0 + $0x130] ss:$116 sps:$4 sm:$0xff]  }
 0x251   :  { %v13347_v22 = vld [vmem:[%s17677_s1 + $0x1440] ss:$16 sps:$4 sm:$0xff]  }
 0x252   :  { %6942 = vmatmul.mubr.bf16.gmra.mrb[8].mxu0 %v13310_v23  ;;  %8037 = vmatmul.mubr.bf16.gmra.mrb[8].mxu1 %v13310_v23  ;;  %v13350_v23 = vld [vmem:[%s17677_s1 + $0x1448] ss:$16 sps:$4 sm:$0xff]  }
 0x253   :  { %6971 = vmatpush1.bf16.msra.mxu0 %v13251_v24  ;;  %8066 = vmatpush1.bf16.msra.mxu1 %v13254_v25  ;;  %v13355_v24 = vld [vmem:[%s17677_s1 + $0x1464] ss:$16 sps:$4 sm:$0xff]   ;;  %v13358_v25 = vld [vmem:[%s17677_s1 + $0x146c] ss:$16 sps:$4 sm:$0xff]  }
 0x254   :  { %6972 = vmatprep.subr.bf16.mxu0 %v13259_v26  ;;  %8067 = vmatprep.subr.bf16.mxu1 %v13262_v27  ;;  %v13410_v26 = vld [vmem:[%s17678_s0 + $0x21c] ss:$116 sps:$4 sm:$0xff]  }
 0x255   :  { %6951 = vmatprep.mubr.bf16.mxu0 %v13317_v28  ;;  %8046 = vmatprep.mubr.bf16.mxu1 %v13317_v28  ;;  %v13353_v27 = vld [vmem:[%s17677_s1 + $0x1460] ss:$16 sps:$4 sm:$0xff]   ;;  %v13356_v28 = vld [vmem:[%s17677_s1 + $0x1468] ss:$16 sps:$4 sm:$0xff]  }
 0x257   :  { %6973 = vmatpush1.bf16.msra.mxu0 %v13257_v29  ;;  %8068 = vmatpush1.bf16.msra.mxu1 %v13260_v30  ;;  %v13361_v29 = vld [vmem:[%s17677_s1 + $0x1484] ss:$16 sps:$4 sm:$0xff]   ;;  %v13364_v30 = vld [vmem:[%s17677_s1 + $0x148c] ss:$16 sps:$4 sm:$0xff]  }
 0x258   :  { %6974 = vmatprep.subr.bf16.mxu0 %v13265_v31  ;;  %8069 = vmatprep.subr.bf16.mxu1 %v13268_v32  ;;  %v13418_v31 = vld [vmem:[%s17678_s0 + $0x218] ss:$116 sps:$4 sm:$0xff]   ;;  %v13359_v32 = vld [vmem:[%s17677_s1 + $0x1480] ss:$16 sps:$4 sm:$0xff]  }
 0x25a   :  { %6952 = vmatmul.mubr.bf16.gmra.mrb[12].mxu0 %v13325_v33  ;;  %8047 = vmatmul.mubr.bf16.gmra.mrb[12].mxu1 %v13325_v33  ;;  %v13362_v33 = vld [vmem:[%s17677_s1 + $0x1488] ss:$16 sps:$4 sm:$0xff]  }
 0x25b   :  { %6975 = vmatpush1.bf16.msra.mxu0 %v13263_v34  ;;  %8070 = vmatpush1.bf16.msra.mxu1 %v13266_v35  ;;  %v13367_v34 = vld [vmem:[%s17677_s1 + $0x14a4] ss:$16 sps:$4 sm:$0xff]   ;;  %v13370_v35 = vld [vmem:[%s17677_s1 + $0x14ac] ss:$16 sps:$4 sm:$0xff]  }
 0x25c   :  { %6976 = vmatprep.subr.bf16.mxu0 %v13271_v36  ;;  %8071 = vmatprep.subr.bf16.mxu1 %v13274_v37  ;;  %v13425_v36 = vld [vmem:[%s17678_s0 + $0x304] ss:$116 sps:$4 sm:$0xff]   ;;  %v13365_v37 = vld [vmem:[%s17677_s1 + $0x14a0] ss:$16 sps:$4 sm:$0xff]  }
 0x25d   :  { %6994 = vmatprep.mubr.bf16.mxu0 %v13334_v38  ;;  %8089 = vmatprep.mubr.bf16.mxu1 %v13334_v38  ;;  %v13368_v38 = vld [vmem:[%s17677_s1 + $0x14a8] ss:$16 sps:$4 sm:$0xff]  }
 0x25f   :  { %6977 = vmatpush1.bf16.msra.mxu0 %v13269_v39  ;;  %8072 = vmatpush1.bf16.msra.mxu1 %v13272_v40  ;;  %v13373_v39 = vld [vmem:[%s17677_s1 + $0x14c4] ss:$16 sps:$4 sm:$0xff]   ;;  %v13376_v40 = vld [vmem:[%s17677_s1 + $0x14cc] ss:$16 sps:$4 sm:$0xff]  }
 0x260   :  { %6978 = vmatprep.subr.bf16.mxu0 %v13277_v41  ;;  %8073 = vmatprep.subr.bf16.mxu1 %v13280_v42  ;;  %v13433_v41 = vld [vmem:[%s17678_s0 + $0x300] ss:$116 sps:$4 sm:$0xff]  }
 0x261   :  { %v13371_v42 = vld [vmem:[%s17677_s1 + $0x14c0] ss:$16 sps:$4 sm:$0xff]  }
 0x263   :  { %6979 = vmatpush1.bf16.msra.mxu0 %v13275_v43  ;;  %8074 = vmatpush1.bf16.msra.mxu1 %v13278_v44  ;;  %v13374_v43 = vld [vmem:[%s17677_s1 + $0x14c8] ss:$16 sps:$4 sm:$0xff]   ;;  %v13379_v44 = vld [vmem:[%s17677_s1 + $0x14e4] ss:$16 sps:$4 sm:$0xff]  }
 0x264   :  { %6980 = vmatprep.subr.bf16.mxu0 %v13283_v45  ;;  %8075 = vmatprep.subr.bf16.mxu1 %v13286_v46  ;;  %v13382_v45 = vld [vmem:[%s17677_s1 + $0x14ec] ss:$16 sps:$4 sm:$0xff]   ;;  %v13442_v46 = vld [vmem:[%s17678_s0 + $0x54] ss:$116 sps:$4 sm:$0xff]  }
 0x267   :  { %6981 = vmatpush1.bf16.msra.mxu0 %v13281_v47  ;;  %8076 = vmatpush1.bf16.msra.mxu1 %v13284_v48  ;;  %v13377_v47 = vld [vmem:[%s17677_s1 + $0x14e0] ss:$16 sps:$4 sm:$0xff]   ;;  %v13380_v48 = vld [vmem:[%s17677_s1 + $0x14e8] ss:$16 sps:$4 sm:$0xff]  }
 0x268   :  { %6982 = vmatprep.subr.bf16.mxu0 %v13291_v49  ;;  %8077 = vmatprep.subr.bf16.mxu1 %v13294_v50  ;;  %v13385_v49 = vld [vmem:[%s17677_s1 + $0x1504] ss:$16 sps:$4 sm:$0xff]   ;;  %v13388_v50 = vld [vmem:[%s17677_s1 + $0x150c] ss:$16 sps:$4 sm:$0xff]  }
 0x26b   :  { %6983 = vmatpush1.bf16.msra.mxu0 %v13289_v51  ;;  %8078 = vmatpush1.bf16.msra.mxu1 %v13292_v52  ;;  %v13383_v51 = vld [vmem:[%s17677_s1 + $0x1500] ss:$16 sps:$4 sm:$0xff]   ;;  %v13386_v52 = vld [vmem:[%s17677_s1 + $0x1508] ss:$16 sps:$4 sm:$0xff]  }
 0x26c   :  { %6984 = vmatprep.subr.bf16.mxu0 %v13298_v53  ;;  %8079 = vmatprep.subr.bf16.mxu1 %v13301_v54  ;;  %v13391_v53 = vld [vmem:[%s17677_s1 + $0x1524] ss:$16 sps:$4 sm:$0xff]   ;;  %v13394_v54 = vld [vmem:[%s17677_s1 + $0x152c] ss:$16 sps:$4 sm:$0xff]  }
 0x26f   :  { %6985 = vmatpush1.bf16.msra.mxu0 %v13296_v55  ;;  %8080 = vmatpush1.bf16.msra.mxu1 %v13299_v56  ;;  %v13389_v55 = vld [vmem:[%s17677_s1 + $0x1520] ss:$16 sps:$4 sm:$0xff]   ;;  %v13392_v56 = vld [vmem:[%s17677_s1 + $0x1528] ss:$16 sps:$4 sm:$0xff]  }
 0x270   :  { %6986 = vmatprep.subr.bf16.mxu0 %v13306_v57  ;;  %8081 = vmatprep.subr.bf16.mxu1 %v13309_v58  ;;  %v13399_v57 = vld [vmem:[%s17677_s1 + $0x1544] ss:$16 sps:$4 sm:$0xff]   ;;  %v13402_v58 = vld [vmem:[%s17677_s1 + $0x154c] ss:$16 sps:$4 sm:$0xff]  }
 0x273   :  { %6987 = vmatpush1.bf16.msra.mxu0 %v13304_v59  ;;  %8082 = vmatpush1.bf16.msra.mxu1 %v13307_v60  ;;  %v13397_v59 = vld [vmem:[%s17677_s1 + $0x1540] ss:$16 sps:$4 sm:$0xff]   ;;  %v13400_v60 = vld [vmem:[%s17677_s1 + $0x1548] ss:$16 sps:$4 sm:$0xff]  }
 0x274   :  { %6988 = vmatprep.subr.bf16.mxu0 %v13313_v61  ;;  %8083 = vmatprep.subr.bf16.mxu1 %v13316_v62  ;;  %v13406_v61 = vld [vmem:[%s17677_s1 + $0x1564] ss:$16 sps:$4 sm:$0xff]   ;;  %v13409_v62 = vld [vmem:[%s17677_s1 + $0x156c] ss:$16 sps:$4 sm:$0xff]  }
 0x277   :  { %6989 = vmatpush1.bf16.msra.mxu0 %v13311_v63  ;;  %8084 = vmatpush1.bf16.msra.mxu1 %v13314_v0  ;;  %v13404_v63 = vld [vmem:[%s17677_s1 + $0x1560] ss:$16 sps:$4 sm:$0xff]   ;;  %v13407_v0 = vld [vmem:[%s17677_s1 + $0x1568] ss:$16 sps:$4 sm:$0xff]  }
 0x278   :  { %6990 = vmatprep.subr.bf16.mxu0 %v13321_v1  ;;  %8085 = vmatprep.subr.bf16.mxu1 %v13324_v2  ;;  %v13414_v1 = vld [vmem:[%s17677_s1 + $0x1584] ss:$16 sps:$4 sm:$0xff]   ;;  %v13417_v2 = vld [vmem:[%s17677_s1 + $0x158c] ss:$16 sps:$4 sm:$0xff]  }
 0x27b   :  { %6991 = vmatpush1.bf16.msra.mxu0 %v13319_v3  ;;  %8086 = vmatpush1.bf16.msra.mxu1 %v13322_v4  ;;  %v13412_v3 = vld [vmem:[%s17677_s1 + $0x1580] ss:$16 sps:$4 sm:$0xff]   ;;  %v13415_v4 = vld [vmem:[%s17677_s1 + $0x1588] ss:$16 sps:$4 sm:$0xff]  }
 0x27c   :  { %6992 = vmatprep.subr.bf16.mxu0 %v13328_v5  ;;  %8087 = vmatprep.subr.bf16.mxu1 %v13331_v6  ;;  %v13421_v5 = vld [vmem:[%s17677_s1 + $0x15a4] ss:$16 sps:$4 sm:$0xff]   ;;  %v13424_v6 = vld [vmem:[%s17677_s1 + $0x15ac] ss:$16 sps:$4 sm:$0xff]  }
 0x27f   :  { %6993 = vmatpush1.bf16.msra.mxu0 %v13326_v7  ;;  %8088 = vmatpush1.bf16.msra.mxu1 %v13329_v8  ;;  %v13419_v7 = vld [vmem:[%s17677_s1 + $0x15a0] ss:$16 sps:$4 sm:$0xff]   ;;  %v13422_v8 = vld [vmem:[%s17677_s1 + $0x15a8] ss:$16 sps:$4 sm:$0xff]  }
 0x280   :  { %7035 = vmatprep.subr.bf16.mxu0 %v13337_v9  ;;  %8130 = vmatprep.subr.bf16.mxu1 %v13340_v10  ;;  %v13429_v9 = vld [vmem:[%s17677_s1 + $0x15c4] ss:$16 sps:$4 sm:$0xff]   ;;  %v13432_v10 = vld [vmem:[%s17677_s1 + $0x15cc] ss:$16 sps:$4 sm:$0xff]  }
 0x282   :  { %6995 = vmatmul.mubr.bf16.vlgmr.msra.gmra.mrb[0].mxu0 %v13332_v11  ;;  %8090 = vmatmul.mubr.bf16.vlgmr.msra.gmra.mrb[0].mxu1 %v13332_v11  ;;  %v13427_v11 = vld [vmem:[%s17677_s1 + $0x15c0] ss:$16 sps:$4 sm:$0xff]  }
 0x283   :  { %7036 = vmatpush1.bf16.msra.mxu0 %v13335_v12  ;;  %8131 = vmatpush1.bf16.msra.mxu1 %v13338_v13  ;;  %v13430_v12 = vld [vmem:[%s17677_s1 + $0x15c8] ss:$16 sps:$4 sm:$0xff]   ;;  %v13436_v13 = vld [vmem:[%s17677_s1 + $0x15e4] ss:$16 sps:$4 sm:$0xff]  }
 0x284   :  { %7037 = vmatprep.subr.bf16.mxu0 %v13343_v14  ;;  %8132 = vmatprep.subr.bf16.mxu1 %v13346_v15  ;;  %v13439_v14 = vld [vmem:[%s17677_s1 + $0x15ec] ss:$16 sps:$4 sm:$0xff]   ;;  %v13434_v15 = vld [vmem:[%s17677_s1 + $0x15e0] ss:$16 sps:$4 sm:$0xff]  }
 0x285   :  { %7004 = vmatprep.mubr.bf16.mxu0 %v13395_v16  ;;  %8099 = vmatprep.mubr.bf16.mxu1 %v13395_v16  ;;  %v13437_v16 = vld [vmem:[%s17677_s1 + $0x15e8] ss:$16 sps:$4 sm:$0xff]  }
 0x287   :  { %7038 = vmatpush1.bf16.msra.mxu0 %v13341_v17  ;;  %8133 = vmatpush1.bf16.msra.mxu1 %v13344_v18  ;;  %v13445_v17 = vld [vmem:[%s17677_s1 + $0x1604] ss:$16 sps:$4 sm:$0xff]   ;;  %v13448_v18 = vld [vmem:[%s17677_s1 + $0x160c] ss:$16 sps:$4 sm:$0xff]  }
 0x288   :  { %7039 = vmatprep.subr.bf16.mxu0 %v13349_v19  ;;  %8134 = vmatprep.subr.bf16.mxu1 %v13352_v20  ;;  %v13440_v19 = vld [vmem:[%s17678_s0 + $0x50] ss:$116 sps:$4 sm:$0xff]  }
 0x289   :  { %v13443_v20 = vld [vmem:[%s17677_s1 + $0x1600] ss:$16 sps:$4 sm:$0xff]  }
 0x28a   :  { %7005 = vmatmul.mubr.bf16.gmra.mrb[4].mxu0 %v13403_v21  ;;  %8100 = vmatmul.mubr.bf16.gmra.mrb[4].mxu1 %v13403_v21  ;;  %v13446_v21 = vld [vmem:[%s17677_s1 + $0x1608] ss:$16 sps:$4 sm:$0xff]  }
 0x28b   :  { %7040 = vmatpush1.bf16.msra.mxu0 %v13347_v22  ;;  %8135 = vmatpush1.bf16.msra.mxu1 %v13350_v23  ;;  %v13451_v22 = vld [vmem:[%s17677_s1 + $0x1624] ss:$16 sps:$4 sm:$0xff]   ;;  %v13454_v23 = vld [vmem:[%s17677_s1 + $0x162c] ss:$16 sps:$4 sm:$0xff]  }
 0x28c   :  { %7041 = vmatprep.subr.bf16.mxu0 %v13355_v24  ;;  %8136 = vmatprep.subr.bf16.mxu1 %v13358_v25  ;;  %v13503_v24 = vld [vmem:[%s17678_s0 + $0x13c] ss:$116 sps:$4 sm:$0xff]  }
 0x28d   :  { %7014 = vmatprep.mubr.bf16.mxu0 %v13410_v26  ;;  %8109 = vmatprep.mubr.bf16.mxu1 %v13410_v26  ;;  %v13449_v25 = vld [vmem:[%s17677_s1 + $0x1620] ss:$16 sps:$4 sm:$0xff]   ;;  %v13452_v26 = vld [vmem:[%s17677_s1 + $0x1628] ss:$16 sps:$4 sm:$0xff]  }
 0x28f   :  { %7042 = vmatpush1.bf16.msra.mxu0 %v13353_v27  ;;  %8137 = vmatpush1.bf16.msra.mxu1 %v13356_v28  ;;  %v13457_v27 = vld [vmem:[%s17677_s1 + $0x1644] ss:$16 sps:$4 sm:$0xff]   ;;  %v13460_v28 = vld [vmem:[%s17677_s1 + $0x164c] ss:$16 sps:$4 sm:$0xff]  }
 0x290   :  { %7043 = vmatprep.subr.bf16.mxu0 %v13361_v29  ;;  %8138 = vmatprep.subr.bf16.mxu1 %v13364_v30  ;;  %v13511_v29 = vld [vmem:[%s17678_s0 + $0x138] ss:$116 sps:$4 sm:$0xff]   ;;  %v13455_v30 = vld [vmem:[%s17677_s1 + $0x1640] ss:$16 sps:$4 sm:$0xff]  }
 0x292   :  { %7015 = vmatmul.mubr.bf16.gmra.mrb[8].mxu0 %v13418_v31  ;;  %8110 = vmatmul.mubr.bf16.gmra.mrb[8].mxu1 %v13418_v31  ;;  %v13458_v31 = vld [vmem:[%s17677_s1 + $0x1648] ss:$16 sps:$4 sm:$0xff]  }
 0x293   :  { %7044 = vmatpush1.bf16.msra.mxu0 %v13359_v32  ;;  %8139 = vmatpush1.bf16.msra.mxu1 %v13362_v33  ;;  %v13463_v32 = vld [vmem:[%s17677_s1 + $0x1664] ss:$16 sps:$4 sm:$0xff]   ;;  %v13466_v33 = vld [vmem:[%s17677_s1 + $0x166c] ss:$16 sps:$4 sm:$0xff]  }
 0x294   :  { %7045 = vmatprep.subr.bf16.mxu0 %v13367_v34  ;;  %8140 = vmatprep.subr.bf16.mxu1 %v13370_v35  ;;  %v13518_v34 = vld [vmem:[%s17678_s0 + $0x224] ss:$116 sps:$4 sm:$0xff]   ;;  %v13461_v35 = vld [vmem:[%s17677_s1 + $0x1660] ss:$16 sps:$4 sm:$0xff]  }
 0x295   :  { %7024 = vmatprep.mubr.bf16.mxu0 %v13425_v36  ;;  %8119 = vmatprep.mubr.bf16.mxu1 %v13425_v36  ;;  %v13464_v36 = vld [vmem:[%s17677_s1 + $0x1668] ss:$16 sps:$4 sm:$0xff]  }
 0x297   :  { %7046 = vmatpush1.bf16.msra.mxu0 %v13365_v37  ;;  %8141 = vmatpush1.bf16.msra.mxu1 %v13368_v38  ;;  %v13469_v37 = vld [vmem:[%s17677_s1 + $0x1684] ss:$16 sps:$4 sm:$0xff]   ;;  %v13472_v38 = vld [vmem:[%s17677_s1 + $0x168c] ss:$16 sps:$4 sm:$0xff]  }
 0x298   :  { %7047 = vmatprep.subr.bf16.mxu0 %v13373_v39  ;;  %8142 = vmatprep.subr.bf16.mxu1 %v13376_v40  ;;  %v13526_v39 = vld [vmem:[%s17678_s0 + $0x220] ss:$116 sps:$4 sm:$0xff]  }
 0x299   :  { %v13467_v40 = vld [vmem:[%s17677_s1 + $0x1680] ss:$16 sps:$4 sm:$0xff]  }
 0x29a   :  { %7025 = vmatmul.mubr.bf16.gmra.mrb[12].mxu0 %v13433_v41  ;;  %8120 = vmatmul.mubr.bf16.gmra.mrb[12].mxu1 %v13433_v41  ;;  %v13470_v41 = vld [vmem:[%s17677_s1 + $0x1688] ss:$16 sps:$4 sm:$0xff]  }
 0x29b   :  { %7048 = vmatpush1.bf16.msra.mxu0 %v13371_v42  ;;  %8143 = vmatpush1.bf16.msra.mxu1 %v13374_v43  ;;  %v13475_v42 = vld [vmem:[%s17677_s1 + $0x16a4] ss:$16 sps:$4 sm:$0xff]   ;;  %v13478_v43 = vld [vmem:[%s17677_s1 + $0x16ac] ss:$16 sps:$4 sm:$0xff]  }
 0x29c   :  { %7049 = vmatprep.subr.bf16.mxu0 %v13379_v44  ;;  %8144 = vmatprep.subr.bf16.mxu1 %v13382_v45  ;;  %v13533_v44 = vld [vmem:[%s17678_s0 + $0x30c] ss:$116 sps:$4 sm:$0xff]  }
 0x29d   :  { %7067 = vmatprep.mubr.bf16.mxu0 %v13442_v46  ;;  %8162 = vmatprep.mubr.bf16.mxu1 %v13442_v46  ;;  %v13473_v45 = vld [vmem:[%s17677_s1 + $0x16a0] ss:$16 sps:$4 sm:$0xff]   ;;  %v13476_v46 = vld [vmem:[%s17677_s1 + $0x16a8] ss:$16 sps:$4 sm:$0xff]  }
 0x29f   :  { %7050 = vmatpush1.bf16.msra.mxu0 %v13377_v47  ;;  %8145 = vmatpush1.bf16.msra.mxu1 %v13380_v48  ;;  %v13481_v47 = vld [vmem:[%s17677_s1 + $0x16c4] ss:$16 sps:$4 sm:$0xff]   ;;  %v13484_v48 = vld [vmem:[%s17677_s1 + $0x16cc] ss:$16 sps:$4 sm:$0xff]  }
 0x2a0   :  { %7051 = vmatprep.subr.bf16.mxu0 %v13385_v49  ;;  %8146 = vmatprep.subr.bf16.mxu1 %v13388_v50  ;;  %v13541_v49 = vld [vmem:[%s17678_s0 + $0x308] ss:$116 sps:$4 sm:$0xff]   ;;  %v13479_v50 = vld [vmem:[%s17677_s1 + $0x16c0] ss:$16 sps:$4 sm:$0xff]  }
 0x2a3   :  { %7052 = vmatpush1.bf16.msra.mxu0 %v13383_v51  ;;  %8147 = vmatpush1.bf16.msra.mxu1 %v13386_v52  ;;  %v13482_v51 = vld [vmem:[%s17677_s1 + $0x16c8] ss:$16 sps:$4 sm:$0xff]   ;;  %v13487_v52 = vld [vmem:[%s17677_s1 + $0x16e4] ss:$16 sps:$4 sm:$0xff]  }
 0x2a4   :  { %7053 = vmatprep.subr.bf16.mxu0 %v13391_v53  ;;  %8148 = vmatprep.subr.bf16.mxu1 %v13394_v54  ;;  %v13490_v53 = vld [vmem:[%s17677_s1 + $0x16ec] ss:$16 sps:$4 sm:$0xff]  }
 0x2a5   :  { %v13550_v54 = vld [vmem:[%s17678_s0 + $0x5c] ss:$116 sps:$4 sm:$0xff]  }
 0x2a7   :  { %7054 = vmatpush1.bf16.msra.mxu0 %v13389_v55  ;;  %8149 = vmatpush1.bf16.msra.mxu1 %v13392_v56  ;;  %v13485_v55 = vld [vmem:[%s17677_s1 + $0x16e0] ss:$16 sps:$4 sm:$0xff]   ;;  %v13488_v56 = vld [vmem:[%s17677_s1 + $0x16e8] ss:$16 sps:$4 sm:$0xff]  }
 0x2a8   :  { %7055 = vmatprep.subr.bf16.mxu0 %v13399_v57  ;;  %8150 = vmatprep.subr.bf16.mxu1 %v13402_v58  ;;  %v13493_v57 = vld [vmem:[%s17677_s1 + $0x1704] ss:$16 sps:$4 sm:$0xff]   ;;  %v13496_v58 = vld [vmem:[%s17677_s1 + $0x170c] ss:$16 sps:$4 sm:$0xff]  }
 0x2ab   :  { %7056 = vmatpush1.bf16.msra.mxu0 %v13397_v59  ;;  %8151 = vmatpush1.bf16.msra.mxu1 %v13400_v60  ;;  %v13491_v59 = vld [vmem:[%s17677_s1 + $0x1700] ss:$16 sps:$4 sm:$0xff]   ;;  %v13494_v60 = vld [vmem:[%s17677_s1 + $0x1708] ss:$16 sps:$4 sm:$0xff]  }
 0x2ac   :  { %7057 = vmatprep.subr.bf16.mxu0 %v13406_v61  ;;  %8152 = vmatprep.subr.bf16.mxu1 %v13409_v62  ;;  %v13499_v61 = vld [vmem:[%s17677_s1 + $0x1724] ss:$16 sps:$4 sm:$0xff]   ;;  %v13502_v62 = vld [vmem:[%s17677_s1 + $0x172c] ss:$16 sps:$4 sm:$0xff]  }
 0x2af   :  { %7058 = vmatpush1.bf16.msra.mxu0 %v13404_v63  ;;  %8153 = vmatpush1.bf16.msra.mxu1 %v13407_v0  ;;  %v13497_v63 = vld [vmem:[%s17677_s1 + $0x1720] ss:$16 sps:$4 sm:$0xff]   ;;  %v13500_v0 = vld [vmem:[%s17677_s1 + $0x1728] ss:$16 sps:$4 sm:$0xff]  }
 0x2b0   :  { %7059 = vmatprep.subr.bf16.mxu0 %v13414_v1  ;;  %8154 = vmatprep.subr.bf16.mxu1 %v13417_v2  ;;  %v13507_v1 = vld [vmem:[%s17677_s1 + $0x1744] ss:$16 sps:$4 sm:$0xff]   ;;  %v13510_v2 = vld [vmem:[%s17677_s1 + $0x174c] ss:$16 sps:$4 sm:$0xff]  }
 0x2b3   :  { %7060 = vmatpush1.bf16.msra.mxu0 %v13412_v3  ;;  %8155 = vmatpush1.bf16.msra.mxu1 %v13415_v4  ;;  %v13505_v3 = vld [vmem:[%s17677_s1 + $0x1740] ss:$16 sps:$4 sm:$0xff]   ;;  %v13508_v4 = vld [vmem:[%s17677_s1 + $0x1748] ss:$16 sps:$4 sm:$0xff]  }
 0x2b4   :  { %7061 = vmatprep.subr.bf16.mxu0 %v13421_v5  ;;  %8156 = vmatprep.subr.bf16.mxu1 %v13424_v6  ;;  %v13514_v5 = vld [vmem:[%s17677_s1 + $0x1764] ss:$16 sps:$4 sm:$0xff]   ;;  %v13517_v6 = vld [vmem:[%s17677_s1 + $0x176c] ss:$16 sps:$4 sm:$0xff]  }
 0x2b7   :  { %7062 = vmatpush1.bf16.msra.mxu0 %v13419_v7  ;;  %8157 = vmatpush1.bf16.msra.mxu1 %v13422_v8  ;;  %v13512_v7 = vld [vmem:[%s17677_s1 + $0x1760] ss:$16 sps:$4 sm:$0xff]   ;;  %v13515_v8 = vld [vmem:[%s17677_s1 + $0x1768] ss:$16 sps:$4 sm:$0xff]  }
 0x2b8   :  { %7063 = vmatprep.subr.bf16.mxu0 %v13429_v9  ;;  %8158 = vmatprep.subr.bf16.mxu1 %v13432_v10  ;;  %v13522_v9 = vld [vmem:[%s17677_s1 + $0x1784] ss:$16 sps:$4 sm:$0xff]   ;;  %v13525_v10 = vld [vmem:[%s17677_s1 + $0x178c] ss:$16 sps:$4 sm:$0xff]  }
 0x2bb   :  { %7064 = vmatpush1.bf16.msra.mxu0 %v13427_v11  ;;  %8159 = vmatpush1.bf16.msra.mxu1 %v13430_v12  ;;  %v13520_v11 = vld [vmem:[%s17677_s1 + $0x1780] ss:$16 sps:$4 sm:$0xff]   ;;  %v13523_v12 = vld [vmem:[%s17677_s1 + $0x1788] ss:$16 sps:$4 sm:$0xff]  }
 0x2bc   :  { %7065 = vmatprep.subr.bf16.mxu0 %v13436_v13  ;;  %8160 = vmatprep.subr.bf16.mxu1 %v13439_v14  ;;  %v13529_v13 = vld [vmem:[%s17677_s1 + $0x17a4] ss:$16 sps:$4 sm:$0xff]   ;;  %v13532_v14 = vld [vmem:[%s17677_s1 + $0x17ac] ss:$16 sps:$4 sm:$0xff]  }
 0x2bf   :  { %7066 = vmatpush1.bf16.msra.mxu0 %v13434_v15  ;;  %8161 = vmatpush1.bf16.msra.mxu1 %v13437_v16  ;;  %v13527_v15 = vld [vmem:[%s17677_s1 + $0x17a0] ss:$16 sps:$4 sm:$0xff]   ;;  %v13530_v16 = vld [vmem:[%s17677_s1 + $0x17a8] ss:$16 sps:$4 sm:$0xff]  }
 0x2c0   :  { %7108 = vmatprep.subr.bf16.mxu0 %v13445_v17  ;;  %8203 = vmatprep.subr.bf16.mxu1 %v13448_v18  ;;  %v13537_v17 = vld [vmem:[%s17677_s1 + $0x17c4] ss:$16 sps:$4 sm:$0xff]   ;;  %v13540_v18 = vld [vmem:[%s17677_s1 + $0x17cc] ss:$16 sps:$4 sm:$0xff]  }
 0x2c2   :  { %7068 = vmatmul.mubr.bf16.vlgmr.msra.gmra.mrb[0].mxu0 %v13440_v19  ;;  %8163 = vmatmul.mubr.bf16.vlgmr.msra.gmra.mrb[0].mxu1 %v13440_v19  ;;  %v13535_v19 = vld [vmem:[%s17677_s1 + $0x17c0] ss:$16 sps:$4 sm:$0xff]  }
 0x2c3   :  { %7109 = vmatpush1.bf16.msra.mxu0 %v13443_v20  ;;  %8204 = vmatpush1.bf16.msra.mxu1 %v13446_v21  ;;  %v13538_v20 = vld [vmem:[%s17677_s1 + $0x17c8] ss:$16 sps:$4 sm:$0xff]   ;;  %v13544_v21 = vld [vmem:[%s17677_s1 + $0x17e4] ss:$16 sps:$4 sm:$0xff]  }
 0x2c4   :  { %7110 = vmatprep.subr.bf16.mxu0 %v13451_v22  ;;  %8205 = vmatprep.subr.bf16.mxu1 %v13454_v23  ;;  %v13547_v22 = vld [vmem:[%s17677_s1 + $0x17ec] ss:$16 sps:$4 sm:$0xff]   ;;  %v13542_v23 = vld [vmem:[%s17677_s1 + $0x17e0] ss:$16 sps:$4 sm:$0xff]  }
 0x2c5   :  { %7077 = vmatprep.mubr.bf16.mxu0 %v13503_v24  ;;  %8172 = vmatprep.mubr.bf16.mxu1 %v13503_v24  ;;  %v13545_v24 = vld [vmem:[%s17677_s1 + $0x17e8] ss:$16 sps:$4 sm:$0xff]  }
 0x2c7   :  { %7111 = vmatpush1.bf16.msra.mxu0 %v13449_v25  ;;  %8206 = vmatpush1.bf16.msra.mxu1 %v13452_v26  ;;  %v13553_v25 = vld [vmem:[%s17677_s1 + $0x1804] ss:$16 sps:$4 sm:$0xff]   ;;  %v13556_v26 = vld [vmem:[%s17677_s1 + $0x180c] ss:$16 sps:$4 sm:$0xff]  }
 0x2c8   :  { %7112 = vmatprep.subr.bf16.mxu0 %v13457_v27  ;;  %8207 = vmatprep.subr.bf16.mxu1 %v13460_v28  ;;  %v13548_v27 = vld [vmem:[%s17678_s0 + $0x58] ss:$116 sps:$4 sm:$0xff]   ;;  %v13551_v28 = vld [vmem:[%s17677_s1 + $0x1800] ss:$16 sps:$4 sm:$0xff]  }
 0x2ca   :  { %7078 = vmatmul.mubr.bf16.gmra.mrb[4].mxu0 %v13511_v29  ;;  %8173 = vmatmul.mubr.bf16.gmra.mrb[4].mxu1 %v13511_v29  ;;  %v13554_v29 = vld [vmem:[%s17677_s1 + $0x1808] ss:$16 sps:$4 sm:$0xff]  }
 0x2cb   :  { %7113 = vmatpush1.bf16.msra.mxu0 %v13455_v30  ;;  %8208 = vmatpush1.bf16.msra.mxu1 %v13458_v31  ;;  %v13559_v30 = vld [vmem:[%s17677_s1 + $0x1824] ss:$16 sps:$4 sm:$0xff]   ;;  %v13562_v31 = vld [vmem:[%s17677_s1 + $0x182c] ss:$16 sps:$4 sm:$0xff]  }
 0x2cc   :  { %7114 = vmatprep.subr.bf16.mxu0 %v13463_v32  ;;  %8209 = vmatprep.subr.bf16.mxu1 %v13466_v33  ;;  %v13611_v32 = vld [vmem:[%s17678_s0 + $0x144] ss:$116 sps:$4 sm:$0xff]   ;;  %v13557_v33 = vld [vmem:[%s17677_s1 + $0x1820] ss:$16 sps:$4 sm:$0xff]  }
 0x2cd   :  { %7087 = vmatprep.mubr.bf16.mxu0 %v13518_v34  ;;  %8182 = vmatprep.mubr.bf16.mxu1 %v13518_v34  ;;  %v13560_v34 = vld [vmem:[%s17677_s1 + $0x1828] ss:$16 sps:$4 sm:$0xff]  }
 0x2cf   :  { %7115 = vmatpush1.bf16.msra.mxu0 %v13461_v35  ;;  %8210 = vmatpush1.bf16.msra.mxu1 %v13464_v36  ;;  %v13565_v35 = vld [vmem:[%s17677_s1 + $0x1844] ss:$16 sps:$4 sm:$0xff]   ;;  %v13568_v36 = vld [vmem:[%s17677_s1 + $0x184c] ss:$16 sps:$4 sm:$0xff]  }
 0x2d0   :  { %7116 = vmatprep.subr.bf16.mxu0 %v13469_v37  ;;  %8211 = vmatprep.subr.bf16.mxu1 %v13472_v38  ;;  %v13619_v37 = vld [vmem:[%s17678_s0 + $0x140] ss:$116 sps:$4 sm:$0xff]  }
 0x2d1   :  { %v13563_v38 = vld [vmem:[%s17677_s1 + $0x1840] ss:$16 sps:$4 sm:$0xff]  }
 0x2d2   :  { %7088 = vmatmul.mubr.bf16.gmra.mrb[8].mxu0 %v13526_v39  ;;  %8183 = vmatmul.mubr.bf16.gmra.mrb[8].mxu1 %v13526_v39  ;;  %v13566_v39 = vld [vmem:[%s17677_s1 + $0x1848] ss:$16 sps:$4 sm:$0xff]  }
 0x2d3   :  { %7117 = vmatpush1.bf16.msra.mxu0 %v13467_v40  ;;  %8212 = vmatpush1.bf16.msra.mxu1 %v13470_v41  ;;  %v13571_v40 = vld [vmem:[%s17677_s1 + $0x1864] ss:$16 sps:$4 sm:$0xff]   ;;  %v13574_v41 = vld [vmem:[%s17677_s1 + $0x186c] ss:$16 sps:$4 sm:$0xff]  }
 0x2d4   :  { %7118 = vmatprep.subr.bf16.mxu0 %v13475_v42  ;;  %8213 = vmatprep.subr.bf16.mxu1 %v13478_v43  ;;  %v13626_v42 = vld [vmem:[%s17678_s0 + $0x22c] ss:$116 sps:$4 sm:$0xff]  }
 0x2d5   :  { %7097 = vmatprep.mubr.bf16.mxu0 %v13533_v44  ;;  %8192 = vmatprep.mubr.bf16.mxu1 %v13533_v44  ;;  %v13569_v43 = vld [vmem:[%s17677_s1 + $0x1860] ss:$16 sps:$4 sm:$0xff]   ;;  %v13572_v44 = vld [vmem:[%s17677_s1 + $0x1868] ss:$16 sps:$4 sm:$0xff]  }
 0x2d7   :  { %7119 = vmatpush1.bf16.msra.mxu0 %v13473_v45  ;;  %8214 = vmatpush1.bf16.msra.mxu1 %v13476_v46  ;;  %v13577_v45 = vld [vmem:[%s17677_s1 + $0x1884] ss:$16 sps:$4 sm:$0xff]   ;;  %v13580_v46 = vld [vmem:[%s17677_s1 + $0x188c] ss:$16 sps:$4 sm:$0xff]  }
 0x2d8   :  { %7120 = vmatprep.subr.bf16.mxu0 %v13481_v47  ;;  %8215 = vmatprep.subr.bf16.mxu1 %v13484_v48  ;;  %v13634_v47 = vld [vmem:[%s17678_s0 + $0x228] ss:$116 sps:$4 sm:$0xff]   ;;  %v13575_v48 = vld [vmem:[%s17677_s1 + $0x1880] ss:$16 sps:$4 sm:$0xff]  }
 0x2da   :  { %7098 = vmatmul.mubr.bf16.gmra.mrb[12].mxu0 %v13541_v49  ;;  %8193 = vmatmul.mubr.bf16.gmra.mrb[12].mxu1 %v13541_v49  ;;  %v13578_v49 = vld [vmem:[%s17677_s1 + $0x1888] ss:$16 sps:$4 sm:$0xff]  }
 0x2db   :  { %7121 = vmatpush1.bf16.msra.mxu0 %v13479_v50  ;;  %8216 = vmatpush1.bf16.msra.mxu1 %v13482_v51  ;;  %v13583_v50 = vld [vmem:[%s17677_s1 + $0x18a4] ss:$16 sps:$4 sm:$0xff]   ;;  %v13586_v51 = vld [vmem:[%s17677_s1 + $0x18ac] ss:$16 sps:$4 sm:$0xff]  }
 0x2dc   :  { %7122 = vmatprep.subr.bf16.mxu0 %v13487_v52  ;;  %8217 = vmatprep.subr.bf16.mxu1 %v13490_v53  ;;  %v13641_v52 = vld [vmem:[%s17678_s0 + $0x314] ss:$116 sps:$4 sm:$0xff]   ;;  %v13581_v53 = vld [vmem:[%s17677_s1 + $0x18a0] ss:$16 sps:$4 sm:$0xff]  }
 0x2dd   :  { %7140 = vmatprep.mubr.bf16.mxu0 %v13550_v54  ;;  %8235 = vmatprep.mubr.bf16.mxu1 %v13550_v54  ;;  %v13584_v54 = vld [vmem:[%s17677_s1 + $0x18a8] ss:$16 sps:$4 sm:$0xff]  }
 0x2df   :  { %7123 = vmatpush1.bf16.msra.mxu0 %v13485_v55  ;;  %8218 = vmatpush1.bf16.msra.mxu1 %v13488_v56  ;;  %v13589_v55 = vld [vmem:[%s17677_s1 + $0x18c4] ss:$16 sps:$4 sm:$0xff]   ;;  %v13592_v56 = vld [vmem:[%s17677_s1 + $0x18cc] ss:$16 sps:$4 sm:$0xff]  }
 0x2e0   :  { %7124 = vmatprep.subr.bf16.mxu0 %v13493_v57  ;;  %8219 = vmatprep.subr.bf16.mxu1 %v13496_v58  ;;  %v13649_v57 = vld [vmem:[%s17678_s0 + $0x310] ss:$116 sps:$4 sm:$0xff]  }
 0x2e1   :  { %v13587_v58 = vld [vmem:[%s17677_s1 + $0x18c0] ss:$16 sps:$4 sm:$0xff]  }
 0x2e3   :  { %7125 = vmatpush1.bf16.msra.mxu0 %v13491_v59  ;;  %8220 = vmatpush1.bf16.msra.mxu1 %v13494_v60  ;;  %v13590_v59 = vld [vmem:[%s17677_s1 + $0x18c8] ss:$16 sps:$4 sm:$0xff]   ;;  %v13595_v60 = vld [vmem:[%s17677_s1 + $0x18e4] ss:$16 sps:$4 sm:$0xff]  }
 0x2e4   :  { %7126 = vmatprep.subr.bf16.mxu0 %v13499_v61  ;;  %8221 = vmatprep.subr.bf16.mxu1 %v13502_v62  ;;  %v13598_v61 = vld [vmem:[%s17677_s1 + $0x18ec] ss:$16 sps:$4 sm:$0xff]   ;;  %v13658_v62 = vld [vmem:[%s17678_s0 + $0x64] ss:$116 sps:$4 sm:$0xff]  }
 0x2e7   :  { %7127 = vmatpush1.bf16.msra.mxu0 %v13497_v63  ;;  %8222 = vmatpush1.bf16.msra.mxu1 %v13500_v0  ;;  %v13593_v63 = vld [vmem:[%s17677_s1 + $0x18e0] ss:$16 sps:$4 sm:$0xff]   ;;  %v13596_v0 = vld [vmem:[%s17677_s1 + $0x18e8] ss:$16 sps:$4 sm:$0xff]  }
 0x2e8   :  { %7128 = vmatprep.subr.bf16.mxu0 %v13507_v1  ;;  %8223 = vmatprep.subr.bf16.mxu1 %v13510_v2  ;;  %v13601_v1 = vld [vmem:[%s17677_s1 + $0x1904] ss:$16 sps:$4 sm:$0xff]   ;;  %v13604_v2 = vld [vmem:[%s17677_s1 + $0x190c] ss:$16 sps:$4 sm:$0xff]  }
 0x2eb   :  { %7129 = vmatpush1.bf16.msra.mxu0 %v13505_v3  ;;  %8224 = vmatpush1.bf16.msra.mxu1 %v13508_v4  ;;  %v13599_v3 = vld [vmem:[%s17677_s1 + $0x1900] ss:$16 sps:$4 sm:$0xff]   ;;  %v13602_v4 = vld [vmem:[%s17677_s1 + $0x1908] ss:$16 sps:$4 sm:$0xff]  }
 0x2ec   :  { %7130 = vmatprep.subr.bf16.mxu0 %v13514_v5  ;;  %8225 = vmatprep.subr.bf16.mxu1 %v13517_v6  ;;  %v13607_v5 = vld [vmem:[%s17677_s1 + $0x1924] ss:$16 sps:$4 sm:$0xff]   ;;  %v13610_v6 = vld [vmem:[%s17677_s1 + $0x192c] ss:$16 sps:$4 sm:$0xff]  }
 0x2ef   :  { %7131 = vmatpush1.bf16.msra.mxu0 %v13512_v7  ;;  %8226 = vmatpush1.bf16.msra.mxu1 %v13515_v8  ;;  %v13605_v7 = vld [vmem:[%s17677_s1 + $0x1920] ss:$16 sps:$4 sm:$0xff]   ;;  %v13608_v8 = vld [vmem:[%s17677_s1 + $0x1928] ss:$16 sps:$4 sm:$0xff]  }
 0x2f0   :  { %7132 = vmatprep.subr.bf16.mxu0 %v13522_v9  ;;  %8227 = vmatprep.subr.bf16.mxu1 %v13525_v10  ;;  %v13615_v9 = vld [vmem:[%s17677_s1 + $0x1944] ss:$16 sps:$4 sm:$0xff]   ;;  %v13618_v10 = vld [vmem:[%s17677_s1 + $0x194c] ss:$16 sps:$4 sm:$0xff]  }
 0x2f3   :  { %7133 = vmatpush1.bf16.msra.mxu0 %v13520_v11  ;;  %8228 = vmatpush1.bf16.msra.mxu1 %v13523_v12  ;;  %v13613_v11 = vld [vmem:[%s17677_s1 + $0x1940] ss:$16 sps:$4 sm:$0xff]   ;;  %v13616_v12 = vld [vmem:[%s17677_s1 + $0x1948] ss:$16 sps:$4 sm:$0xff]  }
 0x2f4   :  { %7134 = vmatprep.subr.bf16.mxu0 %v13529_v13  ;;  %8229 = vmatprep.subr.bf16.mxu1 %v13532_v14  ;;  %v13622_v13 = vld [vmem:[%s17677_s1 + $0x1964] ss:$16 sps:$4 sm:$0xff]   ;;  %v13625_v14 = vld [vmem:[%s17677_s1 + $0x196c] ss:$16 sps:$4 sm:$0xff]  }
 0x2f7   :  { %7135 = vmatpush1.bf16.msra.mxu0 %v13527_v15  ;;  %8230 = vmatpush1.bf16.msra.mxu1 %v13530_v16  ;;  %v13620_v15 = vld [vmem:[%s17677_s1 + $0x1960] ss:$16 sps:$4 sm:$0xff]   ;;  %v13623_v16 = vld [vmem:[%s17677_s1 + $0x1968] ss:$16 sps:$4 sm:$0xff]  }
 0x2f8   :  { %7136 = vmatprep.subr.bf16.mxu0 %v13537_v17  ;;  %8231 = vmatprep.subr.bf16.mxu1 %v13540_v18  ;;  %v13630_v17 = vld [vmem:[%s17677_s1 + $0x1984] ss:$16 sps:$4 sm:$0xff]   ;;  %v13633_v18 = vld [vmem:[%s17677_s1 + $0x198c] ss:$16 sps:$4 sm:$0xff]  }
 0x2fb   :  { %7137 = vmatpush1.bf16.msra.mxu0 %v13535_v19  ;;  %8232 = vmatpush1.bf16.msra.mxu1 %v13538_v20  ;;  %v13628_v19 = vld [vmem:[%s17677_s1 + $0x1980] ss:$16 sps:$4 sm:$0xff]   ;;  %v13631_v20 = vld [vmem:[%s17677_s1 + $0x1988] ss:$16 sps:$4 sm:$0xff]  }
 0x2fc   :  { %7138 = vmatprep.subr.bf16.mxu0 %v13544_v21  ;;  %8233 = vmatprep.subr.bf16.mxu1 %v13547_v22  ;;  %v13637_v21 = vld [vmem:[%s17677_s1 + $0x19a4] ss:$16 sps:$4 sm:$0xff]   ;;  %v13640_v22 = vld [vmem:[%s17677_s1 + $0x19ac] ss:$16 sps:$4 sm:$0xff]  }
 0x2ff   :  { %7139 = vmatpush1.bf16.msra.mxu0 %v13542_v23  ;;  %8234 = vmatpush1.bf16.msra.mxu1 %v13545_v24  ;;  %v13635_v23 = vld [vmem:[%s17677_s1 + $0x19a0] ss:$16 sps:$4 sm:$0xff]   ;;  %v13638_v24 = vld [vmem:[%s17677_s1 + $0x19a8] ss:$16 sps:$4 sm:$0xff]  }
 0x300   :  { %7181 = vmatprep.subr.bf16.mxu0 %v13553_v25  ;;  %8276 = vmatprep.subr.bf16.mxu1 %v13556_v26  ;;  %v13645_v25 = vld [vmem:[%s17677_s1 + $0x19c4] ss:$16 sps:$4 sm:$0xff]   ;;  %v13648_v26 = vld [vmem:[%s17677_s1 + $0x19cc] ss:$16 sps:$4 sm:$0xff]  }
 0x302   :  { %7141 = vmatmul.mubr.bf16.vlgmr.msra.gmra.mrb[0].mxu0 %v13548_v27  ;;  %8236 = vmatmul.mubr.bf16.vlgmr.msra.gmra.mrb[0].mxu1 %v13548_v27  ;;  %v13643_v27 = vld [vmem:[%s17677_s1 + $0x19c0] ss:$16 sps:$4 sm:$0xff]  }
 0x303   :  { %7182 = vmatpush1.bf16.msra.mxu0 %v13551_v28  ;;  %8277 = vmatpush1.bf16.msra.mxu1 %v13554_v29  ;;  %v13646_v28 = vld [vmem:[%s17677_s1 + $0x19c8] ss:$16 sps:$4 sm:$0xff]   ;;  %v13652_v29 = vld [vmem:[%s17677_s1 + $0x19e4] ss:$16 sps:$4 sm:$0xff]  }
 0x304   :  { %7183 = vmatprep.subr.bf16.mxu0 %v13559_v30  ;;  %8278 = vmatprep.subr.bf16.mxu1 %v13562_v31  ;;  %v13655_v30 = vld [vmem:[%s17677_s1 + $0x19ec] ss:$16 sps:$4 sm:$0xff]   ;;  %v13650_v31 = vld [vmem:[%s17677_s1 + $0x19e0] ss:$16 sps:$4 sm:$0xff]  }
 0x305   :  { %7150 = vmatprep.mubr.bf16.mxu0 %v13611_v32  ;;  %8245 = vmatprep.mubr.bf16.mxu1 %v13611_v32  ;;  %v13653_v32 = vld [vmem:[%s17677_s1 + $0x19e8] ss:$16 sps:$4 sm:$0xff]  }
 0x307   :  { %7184 = vmatpush1.bf16.msra.mxu0 %v13557_v33  ;;  %8279 = vmatpush1.bf16.msra.mxu1 %v13560_v34  ;;  %v13661_v33 = vld [vmem:[%s17677_s1 + $0x1a04] ss:$16 sps:$4 sm:$0xff]   ;;  %v13664_v34 = vld [vmem:[%s17677_s1 + $0x1a0c] ss:$16 sps:$4 sm:$0xff]  }
 0x308   :  { %7185 = vmatprep.subr.bf16.mxu0 %v13565_v35  ;;  %8280 = vmatprep.subr.bf16.mxu1 %v13568_v36  ;;  %v13656_v35 = vld [vmem:[%s17678_s0 + $0x60] ss:$116 sps:$4 sm:$0xff]  }
 0x309   :  { %v13659_v36 = vld [vmem:[%s17677_s1 + $0x1a00] ss:$16 sps:$4 sm:$0xff]  }
 0x30a   :  { %7151 = vmatmul.mubr.bf16.gmra.mrb[4].mxu0 %v13619_v37  ;;  %8246 = vmatmul.mubr.bf16.gmra.mrb[4].mxu1 %v13619_v37  ;;  %v13662_v37 = vld [vmem:[%s17677_s1 + $0x1a08] ss:$16 sps:$4 sm:$0xff]  }
 0x30b   :  { %7186 = vmatpush1.bf16.msra.mxu0 %v13563_v38  ;;  %8281 = vmatpush1.bf16.msra.mxu1 %v13566_v39  ;;  %v13667_v38 = vld [vmem:[%s17677_s1 + $0x1a24] ss:$16 sps:$4 sm:$0xff]   ;;  %v13670_v39 = vld [vmem:[%s17677_s1 + $0x1a2c] ss:$16 sps:$4 sm:$0xff]  }
 0x30c   :  { %7187 = vmatprep.subr.bf16.mxu0 %v13571_v40  ;;  %8282 = vmatprep.subr.bf16.mxu1 %v13574_v41  ;;  %v13719_v40 = vld [vmem:[%s17678_s0 + $0x14c] ss:$116 sps:$4 sm:$0xff]  }
 0x30d   :  { %7160 = vmatprep.mubr.bf16.mxu0 %v13626_v42  ;;  %8255 = vmatprep.mubr.bf16.mxu1 %v13626_v42  ;;  %v13665_v41 = vld [vmem:[%s17677_s1 + $0x1a20] ss:$16 sps:$4 sm:$0xff]   ;;  %v13668_v42 = vld [vmem:[%s17677_s1 + $0x1a28] ss:$16 sps:$4 sm:$0xff]  }
 0x30f   :  { %7188 = vmatpush1.bf16.msra.mxu0 %v13569_v43  ;;  %8283 = vmatpush1.bf16.msra.mxu1 %v13572_v44  ;;  %v13673_v43 = vld [vmem:[%s17677_s1 + $0x1a44] ss:$16 sps:$4 sm:$0xff]   ;;  %v13676_v44 = vld [vmem:[%s17677_s1 + $0x1a4c] ss:$16 sps:$4 sm:$0xff]  }
 0x310   :  { %7189 = vmatprep.subr.bf16.mxu0 %v13577_v45  ;;  %8284 = vmatprep.subr.bf16.mxu1 %v13580_v46  ;;  %v13721_v45 = vld [vmem:[%s17678_s0 + $0x148] ss:$116 sps:$4 sm:$0xff]   ;;  %v13671_v46 = vld [vmem:[%s17677_s1 + $0x1a40] ss:$16 sps:$4 sm:$0xff]  }
 0x312   :  { %7161 = vmatmul.mubr.bf16.gmra.mrb[8].mxu0 %v13634_v47  ;;  %8256 = vmatmul.mubr.bf16.gmra.mrb[8].mxu1 %v13634_v47  ;;  %v13674_v47 = vld [vmem:[%s17677_s1 + $0x1a48] ss:$16 sps:$4 sm:$0xff]  }
 0x313   :  { %7190 = vmatpush1.bf16.msra.mxu0 %v13575_v48  ;;  %8285 = vmatpush1.bf16.msra.mxu1 %v13578_v49  ;;  %v13679_v48 = vld [vmem:[%s17677_s1 + $0x1a64] ss:$16 sps:$4 sm:$0xff]   ;;  %v13682_v49 = vld [vmem:[%s17677_s1 + $0x1a6c] ss:$16 sps:$4 sm:$0xff]  }
 0x314   :  { %7191 = vmatprep.subr.bf16.mxu0 %v13583_v50  ;;  %8286 = vmatprep.subr.bf16.mxu1 %v13586_v51  ;;  %v13734_v50 = vld [vmem:[%s17678_s0 + $0x234] ss:$116 sps:$4 sm:$0xff]   ;;  %v13677_v51 = vld [vmem:[%s17677_s1 + $0x1a60] ss:$16 sps:$4 sm:$0xff]  }
 0x315   :  { %7170 = vmatprep.mubr.bf16.mxu0 %v13641_v52  ;;  %8265 = vmatprep.mubr.bf16.mxu1 %v13641_v52  ;;  %v13680_v52 = vld [vmem:[%s17677_s1 + $0x1a68] ss:$16 sps:$4 sm:$0xff]  }
 0x317   :  { %7192 = vmatpush1.bf16.msra.mxu0 %v13581_v53  ;;  %8287 = vmatpush1.bf16.msra.mxu1 %v13584_v54  ;;  %v13685_v53 = vld [vmem:[%s17677_s1 + $0x1a84] ss:$16 sps:$4 sm:$0xff]   ;;  %v13688_v54 = vld [vmem:[%s17677_s1 + $0x1a8c] ss:$16 sps:$4 sm:$0xff]  }
 0x318   :  { %7193 = vmatprep.subr.bf16.mxu0 %v13589_v55  ;;  %8288 = vmatprep.subr.bf16.mxu1 %v13592_v56  ;;  %v13736_v55 = vld [vmem:[%s17678_s0 + $0x230] ss:$116 sps:$4 sm:$0xff]  }
 0x319   :  { %v13683_v56 = vld [vmem:[%s17677_s1 + $0x1a80] ss:$16 sps:$4 sm:$0xff]  }
 0x31a   :  { %7171 = vmatmul.mubr.bf16.gmra.mrb[12].mxu0 %v13649_v57  ;;  %8266 = vmatmul.mubr.bf16.gmra.mrb[12].mxu1 %v13649_v57  ;;  %v13686_v57 = vld [vmem:[%s17677_s1 + $0x1a88] ss:$16 sps:$4 sm:$0xff]  }
 0x31b   :  { %7194 = vmatpush1.bf16.msra.mxu0 %v13587_v58  ;;  %8289 = vmatpush1.bf16.msra.mxu1 %v13590_v59  ;;  %v13691_v58 = vld [vmem:[%s17677_s1 + $0x1aa4] ss:$16 sps:$4 sm:$0xff]   ;;  %v13694_v59 = vld [vmem:[%s17677_s1 + $0x1aac] ss:$16 sps:$4 sm:$0xff]  }
 0x31c   :  { %7195 = vmatprep.subr.bf16.mxu0 %v13595_v60  ;;  %8290 = vmatprep.subr.bf16.mxu1 %v13598_v61  ;;  %v13749_v60 = vld [vmem:[%s17678_s0 + $0x31c] ss:$116 sps:$4 sm:$0xff]  }
 0x31d   :  { %7213 = vmatprep.mubr.bf16.mxu0 %v13658_v62  ;;  %8308 = vmatprep.mubr.bf16.mxu1 %v13658_v62  ;;  %v13689_v61 = vld [vmem:[%s17677_s1 + $0x1aa0] ss:$16 sps:$4 sm:$0xff]   ;;  %v13692_v62 = vld [vmem:[%s17677_s1 + $0x1aa8] ss:$16 sps:$4 sm:$0xff]  }
 0x31f   :  { %7196 = vmatpush1.bf16.msra.mxu0 %v13593_v63  ;;  %8291 = vmatpush1.bf16.msra.mxu1 %v13596_v0  ;;  %v13697_v63 = vld [vmem:[%s17677_s1 + $0x1ac4] ss:$16 sps:$4 sm:$0xff]   ;;  %v13700_v0 = vld [vmem:[%s17677_s1 + $0x1acc] ss:$16 sps:$4 sm:$0xff]  }
 0x320   :  { %7197 = vmatprep.subr.bf16.mxu0 %v13601_v1  ;;  %8292 = vmatprep.subr.bf16.mxu1 %v13604_v2  ;;  %v13751_v1 = vld [vmem:[%s17678_s0 + $0x318] ss:$116 sps:$4 sm:$0xff]   ;;  %v13695_v2 = vld [vmem:[%s17677_s1 + $0x1ac0] ss:$16 sps:$4 sm:$0xff]  }
 0x323   :  { %7198 = vmatpush1.bf16.msra.mxu0 %v13599_v3  ;;  %8293 = vmatpush1.bf16.msra.mxu1 %v13602_v4  ;;  %v13698_v3 = vld [vmem:[%s17677_s1 + $0x1ac8] ss:$16 sps:$4 sm:$0xff]   ;;  %v13703_v4 = vld [vmem:[%s17677_s1 + $0x1ae4] ss:$16 sps:$4 sm:$0xff]  }
 0x324   :  { %7199 = vmatprep.subr.bf16.mxu0 %v13607_v5  ;;  %8294 = vmatprep.subr.bf16.mxu1 %v13610_v6  ;;  %v13706_v5 = vld [vmem:[%s17677_s1 + $0x1aec] ss:$16 sps:$4 sm:$0xff]  }
 0x325   :  { %v13766_v6 = vld [vmem:[%s17678_s0 + $0x6c] ss:$116 sps:$4 sm:$0xff]  }
 0x327   :  { %7200 = vmatpush1.bf16.msra.mxu0 %v13605_v7  ;;  %8295 = vmatpush1.bf16.msra.mxu1 %v13608_v8  ;;  %v13701_v7 = vld [vmem:[%s17677_s1 + $0x1ae0] ss:$16 sps:$4 sm:$0xff]   ;;  %v13704_v8 = vld [vmem:[%s17677_s1 + $0x1ae8] ss:$16 sps:$4 sm:$0xff]  }
 0x328   :  { %7201 = vmatprep.subr.bf16.mxu0 %v13615_v9  ;;  %8296 = vmatprep.subr.bf16.mxu1 %v13618_v10  ;;  %v13709_v9 = vld [vmem:[%s17677_s1 + $0x1b04] ss:$16 sps:$4 sm:$0xff]   ;;  %v13712_v10 = vld [vmem:[%s17677_s1 + $0x1b0c] ss:$16 sps:$4 sm:$0xff]  }
 0x32b   :  { %7202 = vmatpush1.bf16.msra.mxu0 %v13613_v11  ;;  %8297 = vmatpush1.bf16.msra.mxu1 %v13616_v12  ;;  %v13707_v11 = vld [vmem:[%s17677_s1 + $0x1b00] ss:$16 sps:$4 sm:$0xff]   ;;  %v13710_v12 = vld [vmem:[%s17677_s1 + $0x1b08] ss:$16 sps:$4 sm:$0xff]  }
 0x32c   :  { %7203 = vmatprep.subr.bf16.mxu0 %v13622_v13  ;;  %8298 = vmatprep.subr.bf16.mxu1 %v13625_v14  ;;  %v13715_v13 = vld [vmem:[%s17677_s1 + $0x1b24] ss:$16 sps:$4 sm:$0xff]   ;;  %v13718_v14 = vld [vmem:[%s17677_s1 + $0x1b2c] ss:$16 sps:$4 sm:$0xff]  }
 0x32f   :  { %7204 = vmatpush1.bf16.msra.mxu0 %v13620_v15  ;;  %8299 = vmatpush1.bf16.msra.mxu1 %v13623_v16  ;;  %v13713_v15 = vld [vmem:[%s17677_s1 + $0x1b20] ss:$16 sps:$4 sm:$0xff]   ;;  %v13716_v16 = vld [vmem:[%s17677_s1 + $0x1b28] ss:$16 sps:$4 sm:$0xff]  }
 0x330   :  { %7205 = vmatprep.subr.bf16.mxu0 %v13630_v17  ;;  %8300 = vmatprep.subr.bf16.mxu1 %v13633_v18  ;;  %v13724_v17 = vld [vmem:[%s17677_s1 + $0x1b44] ss:$16 sps:$4 sm:$0xff]   ;;  %v13727_v18 = vld [vmem:[%s17677_s1 + $0x1b4c] ss:$16 sps:$4 sm:$0xff]  }
 0x333   :  { %7206 = vmatpush1.bf16.msra.mxu0 %v13628_v19  ;;  %8301 = vmatpush1.bf16.msra.mxu1 %v13631_v20  ;;  %v13722_v19 = vld [vmem:[%s17677_s1 + $0x1b40] ss:$16 sps:$4 sm:$0xff]   ;;  %v13725_v20 = vld [vmem:[%s17677_s1 + $0x1b48] ss:$16 sps:$4 sm:$0xff]  }
 0x334   :  { %7207 = vmatprep.subr.bf16.mxu0 %v13637_v21  ;;  %8302 = vmatprep.subr.bf16.mxu1 %v13640_v22  ;;  %v13730_v21 = vld [vmem:[%s17677_s1 + $0x1b64] ss:$16 sps:$4 sm:$0xff]   ;;  %v13733_v22 = vld [vmem:[%s17677_s1 + $0x1b6c] ss:$16 sps:$4 sm:$0xff]  }
 0x337   :  { %7208 = vmatpush1.bf16.msra.mxu0 %v13635_v23  ;;  %8303 = vmatpush1.bf16.msra.mxu1 %v13638_v24  ;;  %v13728_v23 = vld [vmem:[%s17677_s1 + $0x1b60] ss:$16 sps:$4 sm:$0xff]   ;;  %v13731_v24 = vld [vmem:[%s17677_s1 + $0x1b68] ss:$16 sps:$4 sm:$0xff]  }
 0x338   :  { %7209 = vmatprep.subr.bf16.mxu0 %v13645_v25  ;;  %8304 = vmatprep.subr.bf16.mxu1 %v13648_v26  ;;  %v13739_v25 = vld [vmem:[%s17677_s1 + $0x1b84] ss:$16 sps:$4 sm:$0xff]   ;;  %v13742_v26 = vld [vmem:[%s17677_s1 + $0x1b8c] ss:$16 sps:$4 sm:$0xff]  }
 0x33b   :  { %7210 = vmatpush1.bf16.msra.mxu0 %v13643_v27  ;;  %8305 = vmatpush1.bf16.msra.mxu1 %v13646_v28  ;;  %v13737_v27 = vld [vmem:[%s17677_s1 + $0x1b80] ss:$16 sps:$4 sm:$0xff]   ;;  %v13740_v28 = vld [vmem:[%s17677_s1 + $0x1b88] ss:$16 sps:$4 sm:$0xff]  }
 0x33c   :  { %7211 = vmatprep.subr.bf16.mxu0 %v13652_v29  ;;  %8306 = vmatprep.subr.bf16.mxu1 %v13655_v30  ;;  %v13745_v29 = vld [vmem:[%s17677_s1 + $0x1ba4] ss:$16 sps:$4 sm:$0xff]   ;;  %v13748_v30 = vld [vmem:[%s17677_s1 + $0x1bac] ss:$16 sps:$4 sm:$0xff]  }
 0x33f   :  { %7212 = vmatpush1.bf16.msra.mxu0 %v13650_v31  ;;  %8307 = vmatpush1.bf16.msra.mxu1 %v13653_v32  ;;  %v13743_v31 = vld [vmem:[%s17677_s1 + $0x1ba0] ss:$16 sps:$4 sm:$0xff]   ;;  %v13746_v32 = vld [vmem:[%s17677_s1 + $0x1ba8] ss:$16 sps:$4 sm:$0xff]  }
 0x340   :  { %7254 = vmatprep.subr.bf16.mxu0 %v13661_v33  ;;  %8349 = vmatprep.subr.bf16.mxu1 %v13664_v34  ;;  %v13754_v33 = vld [vmem:[%s17677_s1 + $0x1bc4] ss:$16 sps:$4 sm:$0xff]   ;;  %v13757_v34 = vld [vmem:[%s17677_s1 + $0x1bcc] ss:$16 sps:$4 sm:$0xff]  }
 0x342   :  { %7214 = vmatmul.mubr.bf16.vlgmr.msra.gmra.mrb[0].mxu0 %v13656_v35  ;;  %8309 = vmatmul.mubr.bf16.vlgmr.msra.gmra.mrb[0].mxu1 %v13656_v35  ;;  %v13752_v35 = vld [vmem:[%s17677_s1 + $0x1bc0] ss:$16 sps:$4 sm:$0xff]  }
 0x343   :  { %7255 = vmatpush1.bf16.msra.mxu0 %v13659_v36  ;;  %8350 = vmatpush1.bf16.msra.mxu1 %v13662_v37  ;;  %v13755_v36 = vld [vmem:[%s17677_s1 + $0x1bc8] ss:$16 sps:$4 sm:$0xff]   ;;  %v13760_v37 = vld [vmem:[%s17677_s1 + $0x1be4] ss:$16 sps:$4 sm:$0xff]  }
 0x344   :  { %7256 = vmatprep.subr.bf16.mxu0 %v13667_v38  ;;  %8351 = vmatprep.subr.bf16.mxu1 %v13670_v39  ;;  %v13763_v38 = vld [vmem:[%s17677_s1 + $0x1bec] ss:$16 sps:$4 sm:$0xff]   ;;  %v13758_v39 = vld [vmem:[%s17677_s1 + $0x1be0] ss:$16 sps:$4 sm:$0xff]  }
 0x345   :  { %7223 = vmatprep.mubr.bf16.mxu0 %v13719_v40  ;;  %8318 = vmatprep.mubr.bf16.mxu1 %v13719_v40  ;;  %v13761_v40 = vld [vmem:[%s17677_s1 + $0x1be8] ss:$16 sps:$4 sm:$0xff]  }
 0x347   :  { %7257 = vmatpush1.bf16.msra.mxu0 %v13665_v41  ;;  %8352 = vmatpush1.bf16.msra.mxu1 %v13668_v42  ;;  %v13769_v41 = vld [vmem:[%s17677_s1 + $0x1c04] ss:$16 sps:$4 sm:$0xff]   ;;  %v13772_v42 = vld [vmem:[%s17677_s1 + $0x1c0c] ss:$16 sps:$4 sm:$0xff]  }
 0x348   :  { %7258 = vmatprep.subr.bf16.mxu0 %v13673_v43  ;;  %8353 = vmatprep.subr.bf16.mxu1 %v13676_v44  ;;  %v13764_v43 = vld [vmem:[%s17678_s0 + $0x68] ss:$116 sps:$4 sm:$0xff]   ;;  %v13767_v44 = vld [vmem:[%s17677_s1 + $0x1c00] ss:$16 sps:$4 sm:$0xff]  }
 0x34a   :  { %7224 = vmatmul.mubr.bf16.gmra.mrb[4].mxu0 %v13721_v45  ;;  %8319 = vmatmul.mubr.bf16.gmra.mrb[4].mxu1 %v13721_v45  ;;  %v13770_v45 = vld [vmem:[%s17677_s1 + $0x1c08] ss:$16 sps:$4 sm:$0xff]  }
 0x34b   :  { %7259 = vmatpush1.bf16.msra.mxu0 %v13671_v46  ;;  %8354 = vmatpush1.bf16.msra.mxu1 %v13674_v47  ;;  %v13775_v46 = vld [vmem:[%s17677_s1 + $0x1c24] ss:$16 sps:$4 sm:$0xff]   ;;  %v13778_v47 = vld [vmem:[%s17677_s1 + $0x1c2c] ss:$16 sps:$4 sm:$0xff]  }
 0x34c   :  { %7260 = vmatprep.subr.bf16.mxu0 %v13679_v48  ;;  %8355 = vmatprep.subr.bf16.mxu1 %v13682_v49  ;;  %v13779_v48 = vld [vmem:[%s17678_s0 + $0x154] ss:$116 sps:$4 sm:$0xff]   ;;  %v13773_v49 = vld [vmem:[%s17677_s1 + $0x1c20] ss:$16 sps:$4 sm:$0xff]  }
 0x34d   :  { %7233 = vmatprep.mubr.bf16.mxu0 %v13734_v50  ;;  %8328 = vmatprep.mubr.bf16.mxu1 %v13734_v50  ;;  %v13776_v50 = vld [vmem:[%s17677_s1 + $0x1c28] ss:$16 sps:$4 sm:$0xff]  }
 0x34f   :  { %7261 = vmatpush1.bf16.msra.mxu0 %v13677_v51  ;;  %8356 = vmatpush1.bf16.msra.mxu1 %v13680_v52  ;;  %v13784_v51 = vld [vmem:[%s17677_s1 + $0x1c44] ss:$16 sps:$4 sm:$0xff]   ;;  %v13787_v52 = vld [vmem:[%s17677_s1 + $0x1c4c] ss:$16 sps:$4 sm:$0xff]  }
 0x350   :  { %7262 = vmatprep.subr.bf16.mxu0 %v13685_v53  ;;  %8357 = vmatprep.subr.bf16.mxu1 %v13688_v54  ;;  %v13781_v53 = vld [vmem:[%s17678_s0 + $0x150] ss:$116 sps:$4 sm:$0xff]  }
 0x351   :  { %v13782_v54 = vld [vmem:[%s17677_s1 + $0x1c40] ss:$16 sps:$4 sm:$0xff]  }
 0x352   :  { %7234 = vmatmul.mubr.bf16.gmra.mrb[8].mxu0 %v13736_v55  ;;  %8329 = vmatmul.mubr.bf16.gmra.mrb[8].mxu1 %v13736_v55  ;;  %v13785_v55 = vld [vmem:[%s17677_s1 + $0x1c48] ss:$16 sps:$4 sm:$0xff]  }
 0x353   :  { %7263 = vmatpush1.bf16.msra.mxu0 %v13683_v56  ;;  %8358 = vmatpush1.bf16.msra.mxu1 %v13686_v57  ;;  %v13790_v56 = vld [vmem:[%s17677_s1 + $0x1c64] ss:$16 sps:$4 sm:$0xff]   ;;  %v13793_v57 = vld [vmem:[%s17677_s1 + $0x1c6c] ss:$16 sps:$4 sm:$0xff]  }
 0x354   :  { %7264 = vmatprep.subr.bf16.mxu0 %v13691_v58  ;;  %8359 = vmatprep.subr.bf16.mxu1 %v13694_v59  ;;  %v13794_v58 = vld [vmem:[%s17678_s0 + $0x23c] ss:$116 sps:$4 sm:$0xff]  }
 0x355   :  { %7243 = vmatprep.mubr.bf16.mxu0 %v13749_v60  ;;  %8338 = vmatprep.mubr.bf16.mxu1 %v13749_v60  ;;  %v13788_v59 = vld [vmem:[%s17677_s1 + $0x1c60] ss:$16 sps:$4 sm:$0xff]   ;;  %v13791_v60 = vld [vmem:[%s17677_s1 + $0x1c68] ss:$16 sps:$4 sm:$0xff]  }
 0x357   :  { %7265 = vmatpush1.bf16.msra.mxu0 %v13689_v61  ;;  %8360 = vmatpush1.bf16.msra.mxu1 %v13692_v62  ;;  %v13799_v61 = vld [vmem:[%s17677_s1 + $0x1c84] ss:$16 sps:$4 sm:$0xff]   ;;  %v13802_v62 = vld [vmem:[%s17677_s1 + $0x1c8c] ss:$16 sps:$4 sm:$0xff]  }
 0x358   :  { %7266 = vmatprep.subr.bf16.mxu0 %v13697_v63  ;;  %8361 = vmatprep.subr.bf16.mxu1 %v13700_v0  ;;  %v13796_v63 = vld [vmem:[%s17678_s0 + $0x238] ss:$116 sps:$4 sm:$0xff]   ;;  %v13797_v0 = vld [vmem:[%s17677_s1 + $0x1c80] ss:$16 sps:$4 sm:$0xff]  }
 0x35a   :  { %7244 = vmatmul.mubr.bf16.gmra.mrb[12].mxu0 %v13751_v1  ;;  %8339 = vmatmul.mubr.bf16.gmra.mrb[12].mxu1 %v13751_v1  ;;  %v13800_v1 = vld [vmem:[%s17677_s1 + $0x1c88] ss:$16 sps:$4 sm:$0xff]  }
 0x35b   :  { %7267 = vmatpush1.bf16.msra.mxu0 %v13695_v2  ;;  %8362 = vmatpush1.bf16.msra.mxu1 %v13698_v3  ;;  %v13805_v2 = vld [vmem:[%s17677_s1 + $0x1ca4] ss:$16 sps:$4 sm:$0xff]   ;;  %v13808_v3 = vld [vmem:[%s17677_s1 + $0x1cac] ss:$16 sps:$4 sm:$0xff]  }
 0x35c   :  { %7268 = vmatprep.subr.bf16.mxu0 %v13703_v4  ;;  %8363 = vmatprep.subr.bf16.mxu1 %v13706_v5  ;;  %v13809_v4 = vld [vmem:[%s17678_s0 + $0x324] ss:$116 sps:$4 sm:$0xff]   ;;  %v13803_v5 = vld [vmem:[%s17677_s1 + $0x1ca0] ss:$16 sps:$4 sm:$0xff]  }
 0x35d   :  { %7286 = vmatprep.mubr.bf16.mxu0 %v13766_v6  ;;  %8381 = vmatprep.mubr.bf16.mxu1 %v13766_v6  ;;  %v13806_v6 = vld [vmem:[%s17677_s1 + $0x1ca8] ss:$16 sps:$4 sm:$0xff]  }
 0x35f   :  { %7269 = vmatpush1.bf16.msra.mxu0 %v13701_v7  ;;  %8364 = vmatpush1.bf16.msra.mxu1 %v13704_v8  ;;  %v13814_v7 = vld [vmem:[%s17677_s1 + $0x1cc4] ss:$16 sps:$4 sm:$0xff]   ;;  %v13817_v8 = vld [vmem:[%s17677_s1 + $0x1ccc] ss:$16 sps:$4 sm:$0xff]  }
 0x360   :  { %7270 = vmatprep.subr.bf16.mxu0 %v13709_v9  ;;  %8365 = vmatprep.subr.bf16.mxu1 %v13712_v10  ;;  %v13811_v9 = vld [vmem:[%s17678_s0 + $0x320] ss:$116 sps:$4 sm:$0xff]  }
 0x361   :  { %v13812_v10 = vld [vmem:[%s17677_s1 + $0x1cc0] ss:$16 sps:$4 sm:$0xff]  }
 0x363   :  { %7271 = vmatpush1.bf16.msra.mxu0 %v13707_v11  ;;  %8366 = vmatpush1.bf16.msra.mxu1 %v13710_v12  ;;  %v13815_v11 = vld [vmem:[%s17677_s1 + $0x1cc8] ss:$16 sps:$4 sm:$0xff]   ;;  %v13820_v12 = vld [vmem:[%s17677_s1 + $0x1ce4] ss:$16 sps:$4 sm:$0xff]  }
 0x364   :  { %7272 = vmatprep.subr.bf16.mxu0 %v13715_v13  ;;  %8367 = vmatprep.subr.bf16.mxu1 %v13718_v14  ;;  %v13823_v13 = vld [vmem:[%s17677_s1 + $0x1cec] ss:$16 sps:$4 sm:$0xff]   ;;  %v13818_v14 = vld [vmem:[%s17677_s1 + $0x1ce0] ss:$16 sps:$4 sm:$0xff]  }
 0x367   :  { %7273 = vmatpush1.bf16.msra.mxu0 %v13713_v15  ;;  %8368 = vmatpush1.bf16.msra.mxu1 %v13716_v16  ;;  %v13821_v15 = vld [vmem:[%s17677_s1 + $0x1ce8] ss:$16 sps:$4 sm:$0xff]   ;;  %v13980_v16 = vmov 0  }
 0x368   :  { %7274 = vmatprep.subr.bf16.mxu0 %v13724_v17  ;;  %8369 = vmatprep.subr.bf16.mxu1 %v13727_v18  ;;  %v13824_v17 = vld [vmem:[%s17678_s0 + $0x70] ss:$116 sps:$4 sm:$0xff]   ;;  %v13825_v18 = vld [vmem:[%s17678_s0 + $0x158] ss:$116 sps:$4 sm:$0xff]  }
 0x36b   :  { %7275 = vmatpush1.bf16.msra.mxu0 %v13722_v19  ;;  %8370 = vmatpush1.bf16.msra.mxu1 %v13725_v20  ;;  %v13826_v19 = vld [vmem:[%s17678_s0 + $0x240] ss:$116 sps:$4 sm:$0xff]   ;;  %v13827_v20 = vld [vmem:[%s17678_s0 + $0x328] ss:$116 sps:$4 sm:$0xff]  }
 0x36c   :  { %7276 = vmatprep.subr.bf16.mxu0 %v13730_v21  ;;  %8371 = vmatprep.subr.bf16.mxu1 %v13733_v22  ;;  %v13828_v21 = vld [vmem:[%s17679_s3 + $0x40] sm:$0xff]  }
 0x36d   :  { %v13829_v22 = vld [vmem:[%s17679_s3 + $0xc0] sm:$0xff]  }
 0x36f   :  { %7277 = vmatpush1.bf16.msra.mxu0 %v13728_v23  ;;  %8372 = vmatpush1.bf16.msra.mxu1 %v13731_v24  ;;  %v13830_v23 = vld [vmem:[%s17679_s3] sm:$0xff]  }
 0x370   :  { %7278 = vmatprep.subr.bf16.mxu0 %v13739_v25  ;;  %8373 = vmatprep.subr.bf16.mxu1 %v13742_v26  ;;  %v13831_v24 = vld [vmem:[%s17679_s3 + $0x80] sm:$0xff]   ;;  %v13832_v25 = vld [vmem:[%s17679_s3 + $0x48] sm:$0xff]  }
 0x371   :  { %v13833_v26 = vld [vmem:[%s17679_s3 + $0xc8] sm:$0xff]  }
 0x373   :  { %7279 = vmatpush1.bf16.msra.mxu0 %v13737_v27  ;;  %8374 = vmatpush1.bf16.msra.mxu1 %v13740_v28  ;;  %v13834_v27 = vld [vmem:[%s17679_s3 + $0x8] sm:$0xff]  }
 0x374   :  { %7280 = vmatprep.subr.bf16.mxu0 %v13745_v29  ;;  %8375 = vmatprep.subr.bf16.mxu1 %v13748_v30  ;;  %v13835_v28 = vld [vmem:[%s17679_s3 + $0x88] sm:$0xff]   ;;  %v13836_v29 = vld [vmem:[%s17679_s3 + $0x50] sm:$0xff]  }
 0x375   :  { %v13837_v30 = vld [vmem:[%s17679_s3 + $0xd0] sm:$0xff]  }
 0x377   :  { %7281 = vmatpush1.bf16.msra.mxu0 %v13743_v31  ;;  %8376 = vmatpush1.bf16.msra.mxu1 %v13746_v32  ;;  %v13838_v31 = vld [vmem:[%s17679_s3 + $0x10] sm:$0xff]  }
 0x378   :  { %7282 = vmatprep.subr.bf16.mxu0 %v13754_v33  ;;  %8377 = vmatprep.subr.bf16.mxu1 %v13757_v34  ;;  %v13839_v32 = vld [vmem:[%s17679_s3 + $0x90] sm:$0xff]   ;;  %v13840_v33 = vld [vmem:[%s17679_s3 + $0x58] sm:$0xff]  }
 0x379   :  { %v13841_v34 = vld [vmem:[%s17679_s3 + $0xd8] sm:$0xff]  }
 0x37b   :  { %7283 = vmatpush1.bf16.msra.mxu0 %v13752_v35  ;;  %8378 = vmatpush1.bf16.msra.mxu1 %v13755_v36  ;;  %v13842_v35 = vld [vmem:[%s17679_s3 + $0x18] sm:$0xff]  }
 0x37c   :  { %7284 = vmatprep.subr.bf16.mxu0 %v13760_v37  ;;  %8379 = vmatprep.subr.bf16.mxu1 %v13763_v38  ;;  %v13843_v36 = vld [vmem:[%s17679_s3 + $0x98] sm:$0xff]   ;;  %v13844_v37 = vld [vmem:[%s17679_s3 + $0x60] sm:$0xff]  }
 0x37d   :  { %v13845_v38 = vld [vmem:[%s17679_s3 + $0xe0] sm:$0xff]  }
 0x37f   :  { %7285 = vmatpush1.bf16.msra.mxu0 %v13758_v39  ;;  %8380 = vmatpush1.bf16.msra.mxu1 %v13761_v40  ;;  %v13846_v39 = vld [vmem:[%s17679_s3 + $0x20] sm:$0xff]  }
 0x380   :  { %7327 = vmatprep.subr.bf16.mxu0 %v13769_v41  ;;  %8422 = vmatprep.subr.bf16.mxu1 %v13772_v42  ;;  %v13847_v40 = vld [vmem:[%s17679_s3 + $0xa0] sm:$0xff]   ;;  %v13848_v41 = vld [vmem:[%s17679_s3 + $0x68] sm:$0xff]  }
 0x381   :  { %v13849_v42 = vld [vmem:[%s17679_s3 + $0xe8] sm:$0xff]  }
 0x382   :  { %7287 = vmatmul.mubr.bf16.vlgmr.msra.gmra.mrb[0].mxu0 %v13764_v43  ;;  %8382 = vmatmul.mubr.bf16.vlgmr.msra.gmra.mrb[0].mxu1 %v13764_v43  ;;  %v13850_v43 = vld [vmem:[%s17679_s3 + $0x28] sm:$0xff]  }
 0x383   :  { %7328 = vmatpush1.bf16.msra.mxu0 %v13767_v44  ;;  %8423 = vmatpush1.bf16.msra.mxu1 %v13770_v45  ;;  %v13851_v44 = vld [vmem:[%s17679_s3 + $0xa8] sm:$0xff]   ;;  %v13852_v45 = vld [vmem:[%s17679_s3 + $0x70] sm:$0xff]  }
 0x384   :  { %7329 = vmatprep.subr.bf16.mxu0 %v13775_v46  ;;  %8424 = vmatprep.subr.bf16.mxu1 %v13778_v47  ;;  %v13853_v46 = vld [vmem:[%s17679_s3 + $0xf0] sm:$0xff]  }
 0x385   :  { %7296 = vmatprep.mubr.bf16.mxu0 %v13779_v48  ;;  %8391 = vmatprep.mubr.bf16.mxu1 %v13779_v48  ;;  %v13854_v47 = vld [vmem:[%s17679_s3 + $0x30] sm:$0xff]  }
 0x386   :  { %v13855_v48 = vld [vmem:[%s17679_s3 + $0xb0] sm:$0xff]  }
 0x387   :  { %7330 = vmatpush1.bf16.msra.mxu0 %v13773_v49  ;;  %8425 = vmatpush1.bf16.msra.mxu1 %v13776_v50  ;;  %v13856_v49 = vld [vmem:[%s17679_s3 + $0x78] sm:$0xff]  }
 0x388   :  { %7331 = vmatprep.subr.bf16.mxu0 %v13784_v51  ;;  %8426 = vmatprep.subr.bf16.mxu1 %v13787_v52  ;;  %v13857_v50 = vld [vmem:[%s17679_s3 + $0xf8] sm:$0xff]  }
 0x389   :  { %v13858_v51 = vld [vmem:[%s17679_s3 + $0x38] sm:$0xff]  }
 0x38a   :  { %7297 = vmatmul.mubr.bf16.gmra.mrb[4].mxu0 %v13781_v53  ;;  %8392 = vmatmul.mubr.bf16.gmra.mrb[4].mxu1 %v13781_v53  ;;  %v13859_v52 = vld [vmem:[%s17679_s3 + $0xb8] sm:$0xff]   ;;  %v13860_v53 = vld [vmem:[%s17679_s3 + $0x140] sm:$0xff]  }
 0x38b   :  { %7332 = vmatpush1.bf16.msra.mxu0 %v13782_v54  ;;  %8427 = vmatpush1.bf16.msra.mxu1 %v13785_v55  ;;  %v13861_v54 = vld [vmem:[%s17679_s3 + $0x1c0] sm:$0xff]  }
 0x38c   :  { %7333 = vmatprep.subr.bf16.mxu0 %v13790_v56  ;;  %8428 = vmatprep.subr.bf16.mxu1 %v13793_v57 }
 0x38d   :  { %7306 = vmatprep.mubr.bf16.mxu0 %v13794_v58  ;;  %8401 = vmatprep.mubr.bf16.mxu1 %v13794_v58 }
 0x38f   :  { %7334 = vmatpush1.bf16.msra.mxu0 %v13788_v59  ;;  %8429 = vmatpush1.bf16.msra.mxu1 %v13791_v60 }
 0x390   :  { %7335 = vmatprep.subr.bf16.mxu0 %v13799_v61  ;;  %8430 = vmatprep.subr.bf16.mxu1 %v13802_v62 }
 0x392   :  { %7307 = vmatmul.mubr.bf16.gmra.mrb[8].mxu0 %v13796_v63  ;;  %8402 = vmatmul.mubr.bf16.gmra.mrb[8].mxu1 %v13796_v63 }
 0x393   :  { %7336 = vmatpush1.bf16.msra.mxu0 %v13797_v0  ;;  %8431 = vmatpush1.bf16.msra.mxu1 %v13800_v1 }
 0x394   :  { %7337 = vmatprep.subr.bf16.mxu0 %v13805_v2  ;;  %8432 = vmatprep.subr.bf16.mxu1 %v13808_v3 }
 0x395   :  { %7316 = vmatprep.mubr.bf16.mxu0 %v13809_v4  ;;  %8411 = vmatprep.mubr.bf16.mxu1 %v13809_v4 }
 0x397   :  { %7338 = vmatpush1.bf16.msra.mxu0 %v13803_v5  ;;  %8433 = vmatpush1.bf16.msra.mxu1 %v13806_v6 }
 0x398   :  { %7339 = vmatprep.subr.bf16.mxu0 %v13814_v7  ;;  %8434 = vmatprep.subr.bf16.mxu1 %v13817_v8 }
 0x39a   :  { %7317 = vmatmul.mubr.bf16.gmra.mrb[12].mxu0 %v13811_v9  ;;  %8412 = vmatmul.mubr.bf16.gmra.mrb[12].mxu1 %v13811_v9 }
 0x39b   :  { %7340 = vmatpush1.bf16.msra.mxu0 %v13812_v10  ;;  %8435 = vmatpush1.bf16.msra.mxu1 %v13815_v11 }
 0x39c   :  { %7341 = vmatprep.subr.bf16.mxu0 %v13820_v12  ;;  %8436 = vmatprep.subr.bf16.mxu1 %v13823_v13 }
 0x39d   :  { %7359 = vmatprep.mubr.bf16.mxu0 %v13980_v16  ;;  %8454 = vmatprep.mubr.bf16.mxu1 %v13980_v16 }
 0x39f   :  { %7342 = vmatpush1.bf16.msra.mxu0 %v13818_v14  ;;  %8437 = vmatpush1.bf16.msra.mxu1 %v13821_v15  ;;  %v8521_v15 = vlaneseq }
 0x3a0   :  { %11579 = vmatprep.subr.bf16.mxu0 %v13828_v21  ;;  %11601 = vmatprep.subr.bf16.mxu1 %v13829_v22 }
 0x3a2   :  { %7360 = vmatmul.mubr.bf16.vlgmr.msra.gmra.mrb[0].mxu0 %v13824_v17  ;;  %8455 = vmatmul.mubr.bf16.vlgmr.msra.gmra.mrb[0].mxu1 %v13824_v17 }
 0x3a3   :  { %7369 = vmatprep.mubr.bf16.mxu0 %v13980_v16  ;;  %8464 = vmatprep.mubr.bf16.mxu1 %v13980_v16 }
 0x3a4   :  { %11580 = vmatpush3.bf16.msra.mxu0 %v13830_v23  ;;  %11602 = vmatpush3.bf16.msra.mxu1 %v13831_v24 }
 0x3a5   :  { %11581 = vmatprep.subr.bf16.mxu0 %v13832_v25  ;;  %11603 = vmatprep.subr.bf16.mxu1 %v13833_v26 }
 0x3a8   :  { %11582 = vmatpush3.bf16.msra.mxu0 %v13834_v27  ;;  %11604 = vmatpush3.bf16.msra.mxu1 %v13835_v28  ;;  %v8519_v27 = vld [vmem:[%s17680_s2] sm:$0xf] }
 0x3a9   :  { %11583 = vmatprep.subr.bf16.mxu0 %v13836_v29  ;;  %11605 = vmatprep.subr.bf16.mxu1 %v13837_v30 }
 0x3aa   :  { %7370 = vmatmul.mubr.bf16.gmra.mrb[4].mxu0 %v13825_v18  ;;  %8465 = vmatmul.mubr.bf16.gmra.mrb[4].mxu1 %v13825_v18 }
 0x3ab   :  { %7379 = vmatprep.mubr.bf16.mxu0 %v13980_v16  ;;  %8474 = vmatprep.mubr.bf16.mxu1 %v13980_v16 }
 0x3ac   :  { %11584 = vmatpush3.bf16.msra.mxu0 %v13838_v31  ;;  %11606 = vmatpush3.bf16.msra.mxu1 %v13839_v32 }
 0x3ad   :  { %11585 = vmatprep.subr.bf16.mxu0 %v13840_v33  ;;  %11607 = vmatprep.subr.bf16.mxu1 %v13841_v34 }
 0x3b0   :  { %11586 = vmatpush3.bf16.msra.mxu0 %v13842_v35  ;;  %11608 = vmatpush3.bf16.msra.mxu1 %v13843_v36 }
 0x3b1   :  { %11587 = vmatprep.subr.bf16.mxu0 %v13844_v37  ;;  %11609 = vmatprep.subr.bf16.mxu1 %v13845_v38 }
 0x3b2   :  { %7380 = vmatmul.mubr.bf16.gmra.mrb[8].mxu0 %v13826_v19  ;;  %8475 = vmatmul.mubr.bf16.gmra.mrb[8].mxu1 %v13826_v19 }
 0x3b3   :  { %7389 = vmatprep.mubr.bf16.mxu0 %v13980_v16  ;;  %8484 = vmatprep.mubr.bf16.mxu1 %v13980_v16 }
 0x3b4   :  { %11588 = vmatpush3.bf16.msra.mxu0 %v13846_v39  ;;  %11610 = vmatpush3.bf16.msra.mxu1 %v13847_v40 }
 0x3b5   :  { %11589 = vmatprep.subr.bf16.mxu0 %v13848_v41  ;;  %11611 = vmatprep.subr.bf16.mxu1 %v13849_v42 }
 0x3b8   :  { %11590 = vmatpush3.bf16.msra.mxu0 %v13850_v43  ;;  %11612 = vmatpush3.bf16.msra.mxu1 %v13851_v44 }
 0x3b9   :  { %11591 = vmatprep.subr.bf16.mxu0 %v13852_v45  ;;  %11613 = vmatprep.subr.bf16.mxu1 %v13853_v46 }
 0x3ba   :  { %7390 = vmatmul.mubr.bf16.gmra.mrb[12].mxu0 %v13827_v20  ;;  %8485 = vmatmul.mubr.bf16.gmra.mrb[12].mxu1 %v13827_v20  ;;  %v8522_v20 = vshrl.u32 %v8521_v15, 7 }
 0x3bc   :  { %11592 = vmatpush3.bf16.msra.mxu0 %v13854_v47  ;;  %11614 = vmatpush3.bf16.msra.mxu1 %v13855_v48  ;;  %v8523_v25 = vsub.s32 0, %v8522_v20  ;;  %v8531_v26 = vsub.s32 2, %v8522_v20  ;;  %v8527_v28 = vsub.s32 1, %v8522_v20  ;;  %v8535_v29 = vsub.s32 3, %v8522_v20  ;;  %v13867_v20 = vld [vmem:[%s17679_s3 + $0x188] sm:$0xff]  }
 0x3bd   :  { %11593 = vmatprep.subr.bf16.mxu0 %v13856_v49  ;;  %11615 = vmatprep.subr.bf16.mxu1 %v13857_v50 }
 0x3be   :  { %v8524_v33 = vrot.slane %v8519_v27, %v8523_v25  ;;  %v8532_v35 = vrot.slane %v8519_v27, %v8531_v26  ;;  %v8528_v39 = vrot.slane %v8519_v27, %v8527_v28  ;;  %v8536_v41 = vrot.slane %v8519_v27, %v8535_v29  ;;  %v13872_v25 = vld [vmem:[%s17679_s3 + $0x158] sm:$0xff]   ;;  %v13876_v29 = vld [vmem:[%s17679_s3 + $0x160] sm:$0xff]  }
 0x3bf   :  { %v13873_v26 = vld [vmem:[%s17679_s3 + $0x1d8] sm:$0xff]  }
 0x3c0   :  { %11594 = vmatpush3.bf16.msra.mxu0 %v13858_v51  ;;  %11616 = vmatpush3.bf16.msra.mxu1 %v13859_v52  ;;  %v13874_v27 = vld [vmem:[%s17679_s3 + $0x118] sm:$0xff]  }
 0x3c1   :  { %11623 = vmatprep.subr.bf16.mxu0 %v13860_v53  ;;  %11645 = vmatprep.subr.bf16.mxu1 %v13861_v54  ;;  %v13875_v28 = vld [vmem:[%s17679_s3 + $0x198] sm:$0xff]  }
 0x475   :  { %v7361_v55 = vpop.f32.mrb[0].mxu0  ;;  %v8456_v56 = vpop.f32.mrb[0].mxu1 }
 0x476   :  { %v7363_v57 = vpop.f32.mrb[1].mxu0  ;;  %v8458_v58 = vpop.f32.mrb[1].mxu1 }
 0x477   :  { %v17267_v59 = vpop.f32.mrb[2].mxu0  ;;  %v17269_v60 = vpop.f32.mrb[2].mxu1 }
 0x478   :  { %v17271_v61 = vpop.f32.mrb[3].mxu0  ;;  %v17273_v62 = vpop.f32.mrb[3].mxu1 }
 0x47d   :  { %v7371_v63 = vpop.f32.mrb[4].mxu0  ;;  %v8466_v0 = vpop.f32.mrb[4].mxu1 }
 0x47e   :  { %v8495_v1 = vmax.f32 %v7361_v55, %v7371_v63  ;;  %v8497_v2 = vmax.f32 %v8456_v56, %v8466_v0  ;;  %v7373_v3 = vpop.f32.mrb[5].mxu0  ;;  %v8468_v4 = vpop.f32.mrb[5].mxu1 }
 0x47f   :  { %v8496_v5 = vmax.f32 %v7363_v57, %v7373_v3  ;;  %v8498_v6 = vmax.f32 %v8458_v58, %v8468_v4  ;;  %v7375_v7 = vpop.f32.mrb[6].mxu0  ;;  %v8470_v8 = vpop.f32.mrb[6].mxu1 }
 0x480   :  { %v8499_v9 = vmax.f32 %v17267_v59, %v7375_v7  ;;  %v8501_v10 = vmax.f32 %v17269_v60, %v8470_v8  ;;  %v7377_v11 = vpop.f32.mrb[7].mxu0  ;;  %v8472_v12 = vpop.f32.mrb[7].mxu1 }
 0x481   :  { %v8500_v13 = vmax.f32 %v17271_v61, %v7377_v11  ;;  %v8502_v14 = vmax.f32 %v17273_v62, %v8472_v12 }
 0x485   :  { %v7381_v16 = vpop.f32.mrb[8].mxu0  ;;  %v8476_v17 = vpop.f32.mrb[8].mxu1 }
 0x486   :  { %v7383_v18 = vpop.f32.mrb[9].mxu0  ;;  %v8478_v19 = vpop.f32.mrb[9].mxu1 }
 0x487   :  { %v7385_v21 = vpop.f32.mrb[10].mxu0  ;;  %v8480_v22 = vpop.f32.mrb[10].mxu1 }
 0x488   :  { %v7387_v23 = vpop.f32.mrb[11].mxu0  ;;  %v8482_v24 = vpop.f32.mrb[11].mxu1 }
 0x48d   :  { %v7391_v30 = vpop.f32.mrb[12].mxu0  ;;  %v8486_v31 = vpop.f32.mrb[12].mxu1 }
 0x48e   :  { %v8503_v32 = vmax.f32 %v7381_v16, %v7391_v30  ;;  %v8505_v34 = vmax.f32 %v8476_v17, %v8486_v31  ;;  %v7393_v36 = vpop.f32.mrb[13].mxu0  ;;  %v8488_v37 = vpop.f32.mrb[13].mxu1  ;;  %v13863_v16 = vld [vmem:[%s17679_s3 + $0x180] sm:$0xff]   ;;  %v13864_v17 = vld [vmem:[%s17679_s3 + $0x148] sm:$0xff]  }
 0x48f   :  { %v8504_v38 = vmax.f32 %v7383_v18, %v7393_v36  ;;  %v8506_v40 = vmax.f32 %v8478_v19, %v8488_v37  ;;  %v7395_v42 = vpop.f32.mrb[14].mxu0  ;;  %v8490_v43 = vpop.f32.mrb[14].mxu1  ;;  %v13865_v18 = vld [vmem:[%s17679_s3 + $0x1c8] sm:$0xff]   ;;  %v13877_v30 = vld [vmem:[%s17679_s3 + $0x1e0] sm:$0xff]   ;;  %v13884_v37 = vld [vmem:[%s17679_s3 + $0x170] sm:$0xff]  }
 0x490   :  { %v8511_v44 = vmax.f32 %v8495_v1, %v8503_v32  ;;  %v8513_v45 = vmax.f32 %v8497_v2, %v8505_v34  ;;  %v8507_v46 = vmax.f32 %v7385_v21, %v7395_v42  ;;  %v8509_v47 = vmax.f32 %v8480_v22, %v8490_v43  ;;  %v7397_v48 = vpop.f32.mrb[15].mxu0  ;;  %v8492_v49 = vpop.f32.mrb[15].mxu1  ;;  %v13866_v19 = vld [vmem:[%s17679_s3 + $0x108] sm:$0xff]   ;;  %v13868_v21 = vld [vmem:[%s17679_s3 + $0x150] sm:$0xff]   ;;  %v13878_v31 = vld [vmem:[%s17679_s3 + $0x120] sm:$0xff]  }
 0x491   :  { %v8512_v50 = vmax.f32 %v8496_v5, %v8504_v38  ;;  %v8514_v51 = vmax.f32 %v8498_v6, %v8506_v40  ;;  %v8508_v52 = vmax.f32 %v7387_v23, %v7397_v48  ;;  %v8510_v53 = vmax.f32 %v8482_v24, %v8492_v49  ;;  %v13869_v22 = vld [vmem:[%s17679_s3 + $0x1d0] sm:$0xff]   ;;  %v13879_v32 = vld [vmem:[%s17679_s3 + $0x1a0] sm:$0xff]   ;;  %v13881_v34 = vld [vmem:[%s17679_s3 + $0x1e8] sm:$0xff]  }
 0x492   :  { %v8541_v54 = vadd.f32 %v8524_v33, %v8511_v44  ;;  %v8543_v55 = vadd.f32 %v8532_v35, %v8513_v45  ;;  %v8515_v56 = vmax.f32 %v8499_v9, %v8507_v46  ;;  %v8517_v57 = vmax.f32 %v8501_v10, %v8509_v47  ;;  %v13870_v23 = vld [vmem:[%s17679_s3 + $0x110] sm:$0xff]   ;;  %v13883_v36 = vld [vmem:[%s17679_s3 + $0x1a8] sm:$0xff]   ;;  %v13889_v42 = vld [vmem:[%s17679_s3 + $0x1f8] sm:$0xff]  }
 0x493   :  { %v8542_v58 = vadd.f32 %v8528_v39, %v8512_v50  ;;  %v8544_v59 = vadd.f32 %v8536_v41, %v8514_v51  ;;  %v8516_v60 = vmax.f32 %v8500_v13, %v8508_v52  ;;  %v8518_v61 = vmax.f32 %v8502_v14, %v8510_v53  ;;  %v13862_v14 = vld [vmem:[%s17679_s3 + $0x100] sm:$0xff]   ;;  %v13871_v24 = vld [vmem:[%s17679_s3 + $0x190] sm:$0xff]   ;;  %v13890_v43 = vld [vmem:[%s17679_s3 + $0x138] sm:$0xff]  }
 0x494   :  { %v8545_v62 = vadd.f32 %v8524_v33, %v8515_v56  ;;  %v8547_v63 = vadd.f32 %v8532_v35, %v8517_v57  ;;  %v8549_v2 = vmax.f32 %v8541_v54, 0.0  ;;  %v8551_v3 = vmax.f32 %v8543_v55, 0.0  ;;  %v13880_v33 = vld [vmem:[%s17679_s3 + $0x168] sm:$0xff]   ;;  %v13885_v38 = vld [vmem:[%s17679_s3 + $0x1f0] sm:$0xff]   ;;  %v13891_v44 = vld [vmem:[%s17679_s3 + $0x1b8] sm:$0xff]  }
 0x495   :  { %v8546_v0 = vadd.f32 %v8528_v39, %v8516_v60  ;;  %v8548_v1 = vadd.f32 %v8536_v41, %v8518_v61  ;;  %v8550_v5 = vmax.f32 %v8542_v58, 0.0  ;;  %v8552_v6 = vmax.f32 %v8544_v59, 0.0  ;;  %v13882_v35 = vld [vmem:[%s17679_s3 + $0x128] sm:$0xff]   ;;  %v13886_v39 = vld [vmem:[%s17679_s3 + $0x130] sm:$0xff]   ;;  %v13888_v41 = vld [vmem:[%s17679_s3 + $0x178] sm:$0xff]  }
 0x496   :  { %v8553_v4 = vmax.f32 %v8545_v62, 0.0  ;;  %v8555_v7 = vmax.f32 %v8547_v63, 0.0  ;;  %v13887_v40 = vld [vmem:[%s17679_s3 + $0x1b0] sm:$0xff]   ;;  %v13892_v45 = vld [vmem:[%s17679_s3 + $0x240] sm:$0xff]   ;;  %v13896_v49 = vld [vmem:[%s17679_s3 + $0x248] sm:$0xff]  }
 0x497   :  { %v8554_v8 = vmax.f32 %v8546_v0, 0.0  ;;  %v8556_v11 = vmax.f32 %v8548_v1, 0.0  ;;  %v13893_v46 = vld [vmem:[%s17679_s3 + $0x2c0] sm:$0xff]   ;;  %v13897_v50 = vld [vmem:[%s17679_s3 + $0x2c8] sm:$0xff]   ;;  %v13900_v53 = vld [vmem:[%s17679_s3 + $0x250] sm:$0xff]  }
 0x498   :  { %v17283_v12 = vpack.c.bf16 %v8553_v4, %v8549_v2  ;;  %v17285_v9 = vpack.c.bf16 %v8555_v7, %v8551_v3  ;;  %v13894_v47 = vld [vmem:[%s17679_s3 + $0x200] sm:$0xff]   ;;  %v13898_v51 = vld [vmem:[%s17679_s3 + $0x208] sm:$0xff]   ;;  %v13901_v54 = vld [vmem:[%s17679_s3 + $0x2d0] sm:$0xff]  }
 0x499   :  { %v17287_v10 = vpack.c.bf16 %v8554_v8, %v8550_v5  ;;  %v17289_v13 = vpack.c.bf16 %v8556_v11, %v8552_v6  ;;  %v13895_v48 = vld [vmem:[%s17679_s3 + $0x280] sm:$0xff]   ;;  %v13899_v52 = vld [vmem:[%s17679_s3 + $0x288] sm:$0xff]   ;;  %v13902_v55 = vld [vmem:[%s17679_s3 + $0x210] sm:$0xff]  }
 0x49a   :  { %v13903_v56 = vld [vmem:[%s17679_s3 + $0x290] sm:$0xff]   ;;  %v13904_v57 = vld [vmem:[%s17679_s3 + $0x258] sm:$0xff]   ;;  %v13908_v61 = vld [vmem:[%s17679_s3 + $0x260] sm:$0xff]  }
 0x49b   :  { %8849 = vmatprep.mubr.bf16.mxu0 %v17287_v10  ;;  %8890 = vmatprep.mubr.bf16.mxu1 %v17289_v13  ;;  %v13905_v58 = vld [vmem:[%s17679_s3 + $0x2d8] sm:$0xff]   ;;  %v13909_v62 = vld [vmem:[%s17679_s3 + $0x2e0] sm:$0xff]   ;;  %v13912_v1 = vld [vmem:[%s17679_s3 + $0x268] sm:$0xff]  }
 0x49c   :  { %8850 = vmatmul.mubr.bf16.vlgmr.msra.gmra.mrb[16].mxu0 %v17283_v12  ;;  %8891 = vmatmul.mubr.bf16.vlgmr.msra.gmra.mrb[16].mxu1 %v17285_v9  ;;  %v13906_v59 = vld [vmem:[%s17679_s3 + $0x218] sm:$0xff]   ;;  %v13910_v63 = vld [vmem:[%s17679_s3 + $0x220] sm:$0xff]   ;;  %v13913_v2 = vld [vmem:[%s17679_s3 + $0x2e8] sm:$0xff]  }
 0x49d   :  { %11624 = vmatpush3.bf16.msra.mxu0 %v13862_v14  ;;  %11646 = vmatpush3.bf16.msra.mxu1 %v13863_v16  ;;  %v13907_v60 = vld [vmem:[%s17679_s3 + $0x298] sm:$0xff]   ;;  %v13911_v0 = vld [vmem:[%s17679_s3 + $0x2a0] sm:$0xff]   ;;  %v13914_v3 = vld [vmem:[%s17679_s3 + $0x228] sm:$0xff]  }
 0x49e   :  { %9188 = vmatprep.mubr.bf16.mxu0 %v17287_v10  ;;  %9229 = vmatprep.mubr.bf16.mxu1 %v17289_v13  ;;  %v13915_v4 = vld [vmem:[%s17679_s3 + $0x2a8] sm:$0xff]   ;;  %v13916_v7 = vld [vmem:[%s17679_s3 + $0x270] sm:$0xff]   ;;  %v13920_v11 = vld [vmem:[%s17679_s3 + $0x278] sm:$0xff]  }
 0x49f   :  { %11625 = vmatprep.subr.bf16.mxu0 %v13864_v17  ;;  %11647 = vmatprep.subr.bf16.mxu1 %v13865_v18  ;;  %v13917_v5 = vld [vmem:[%s17679_s3 + $0x2f0] sm:$0xff]   ;;  %v13921_v14 = vld [vmem:[%s17679_s3 + $0x2f8] sm:$0xff]   ;;  %v13924_v18 = vld [vmem:[%s17679_s3 + $0x340] sm:$0xff]  }
 0x4a0   :  { %v13918_v6 = vld [vmem:[%s17679_s3 + $0x230] sm:$0xff]   ;;  %v13922_v16 = vld [vmem:[%s17679_s3 + $0x238] sm:$0xff]  }
 0x4a1   :  { %11626 = vmatpush3.bf16.msra.mxu0 %v13866_v19  ;;  %11648 = vmatpush3.bf16.msra.mxu1 %v13867_v20  ;;  %v13919_v8 = vld [vmem:[%s17679_s3 + $0x2b0] sm:$0xff]   ;;  %v13923_v17 = vld [vmem:[%s17679_s3 + $0x2b8] sm:$0xff]   ;;  %v13925_v19 = vld [vmem:[%s17679_s3 + $0x3c0] sm:$0xff]  }
 0x4a2   :  { %11627 = vmatprep.subr.bf16.mxu0 %v13868_v21  ;;  %11649 = vmatprep.subr.bf16.mxu1 %v13869_v22  ;;  %v13926_v20 = vld [vmem:[%s17679_s3 + $0x300] sm:$0xff]   ;;  %v13928_v22 = vld [vmem:[%s17679_s3 + $0x348] sm:$0xff]  }
 0x4a3   :  { %v13927_v21 = vld [vmem:[%s17679_s3 + $0x380] sm:$0xff]  }
 0x4a5   :  { %11628 = vmatpush3.bf16.msra.mxu0 %v13870_v23  ;;  %11650 = vmatpush3.bf16.msra.mxu1 %v13871_v24  ;;  %v13929_v23 = vld [vmem:[%s17679_s3 + $0x3c8] sm:$0xff]  }
 0x4a6   :  { %11629 = vmatprep.subr.bf16.mxu0 %v13872_v25  ;;  %11651 = vmatprep.subr.bf16.mxu1 %v13873_v26  ;;  %v13930_v24 = vld [vmem:[%s17679_s3 + $0x308] sm:$0xff]   ;;  %v13932_v26 = vld [vmem:[%s17679_s3 + $0x350] sm:$0xff]  }
 0x4a7   :  { %v13931_v25 = vld [vmem:[%s17679_s3 + $0x388] sm:$0xff]  }
 0x4a9   :  { %11630 = vmatpush3.bf16.msra.mxu0 %v13874_v27  ;;  %11652 = vmatpush3.bf16.msra.mxu1 %v13875_v28  ;;  %v13933_v27 = vld [vmem:[%s17679_s3 + $0x3d0] sm:$0xff]  }
 0x4aa   :  { %11631 = vmatprep.subr.bf16.mxu0 %v13876_v29  ;;  %11653 = vmatprep.subr.bf16.mxu1 %v13877_v30  ;;  %v13935_v28 = vld [vmem:[%s17679_s3 + $0x390] sm:$0xff]   ;;  %v13937_v29 = vld [vmem:[%s17679_s3 + $0x3d8] sm:$0xff]  }
 0x4ab   :  { %v13938_v30 = vld [vmem:[%s17679_s3 + $0x318] sm:$0xff]  }
 0x4ad   :  { %11632 = vmatpush3.bf16.msra.mxu0 %v13878_v31  ;;  %11654 = vmatpush3.bf16.msra.mxu1 %v13879_v32  ;;  %v13939_v31 = vld [vmem:[%s17679_s3 + $0x398] sm:$0xff]   ;;  %v13940_v32 = vld [vmem:[%s17679_s3 + $0x360] sm:$0xff]  }
 0x4ae   :  { %11633 = vmatprep.subr.bf16.mxu0 %v13880_v33  ;;  %11655 = vmatprep.subr.bf16.mxu1 %v13881_v34  ;;  %v13941_v33 = vld [vmem:[%s17679_s3 + $0x3e0] sm:$0xff]  }
 0x4af   :  { %v13942_v34 = vld [vmem:[%s17679_s3 + $0x320] sm:$0xff]  }
 0x4b1   :  { %11634 = vmatpush3.bf16.msra.mxu0 %v13882_v35  ;;  %11656 = vmatpush3.bf16.msra.mxu1 %v13883_v36  ;;  %v13943_v35 = vld [vmem:[%s17679_s3 + $0x3a0] sm:$0xff]   ;;  %v13944_v36 = vld [vmem:[%s17679_s3 + $0x368] sm:$0xff]  }
 0x4b2   :  { %11635 = vmatprep.subr.bf16.mxu0 %v13884_v37  ;;  %11657 = vmatprep.subr.bf16.mxu1 %v13885_v38  ;;  %v13945_v37 = vld [vmem:[%s17679_s3 + $0x3e8] sm:$0xff]  }
 0x4b3   :  { %v13946_v38 = vld [vmem:[%s17679_s3 + $0x328] sm:$0xff]  }
 0x4b5   :  { %11636 = vmatpush3.bf16.msra.mxu0 %v13886_v39  ;;  %11658 = vmatpush3.bf16.msra.mxu1 %v13887_v40  ;;  %v13947_v39 = vld [vmem:[%s17679_s3 + $0x3a8] sm:$0xff]   ;;  %v13948_v40 = vld [vmem:[%s17679_s3 + $0x370] sm:$0xff]  }
 0x4b6   :  { %11637 = vmatprep.subr.bf16.mxu0 %v13888_v41  ;;  %11659 = vmatprep.subr.bf16.mxu1 %v13889_v42  ;;  %v13949_v41 = vld [vmem:[%s17679_s3 + $0x3f0] sm:$0xff]  }
 0x4b7   :  { %v13950_v42 = vld [vmem:[%s17679_s3 + $0x330] sm:$0xff]  }
 0x4b9   :  { %11638 = vmatpush3.bf16.msra.mxu0 %v13890_v43  ;;  %11660 = vmatpush3.bf16.msra.mxu1 %v13891_v44  ;;  %v13951_v43 = vld [vmem:[%s17679_s3 + $0x3b0] sm:$0xff]   ;;  %v13952_v44 = vld [vmem:[%s17679_s3 + $0x378] sm:$0xff]  }
 0x4ba   :  { %11667 = vmatprep.subr.bf16.mxu0 %v13892_v45  ;;  %11689 = vmatprep.subr.bf16.mxu1 %v13893_v46  ;;  %v13953_v45 = vld [vmem:[%s17679_s3 + $0x3f8] sm:$0xff]  }
 0x4bb   :  { %v13954_v46 = vld [vmem:[%s17679_s3 + $0x338] sm:$0xff]  }
 0x4bc   :  { %9189 = vmatmul.mubr.bf16.vlgmr.msra.gmra.mrb[20].mxu0 %v17283_v12  ;;  %9230 = vmatmul.mubr.bf16.vlgmr.msra.gmra.mrb[20].mxu1 %v17285_v9 }
 0x4bd   :  { %11668 = vmatpush3.bf16.msra.mxu0 %v13894_v47  ;;  %9529 = vmatprep.mubr.bf16.mxu0 %v17287_v10  ;;  %v13955_v47 = vld [vmem:[%s17679_s3 + $0x3b8] sm:$0xff]  }
 0x4be   :  { %11690 = vmatpush3.bf16.msra.mxu1 %v13895_v48  ;;  %9570 = vmatprep.mubr.bf16.mxu1 %v17289_v13  ;;  %v13981_v48 = vmov 0.0  }
 0x4bf   :  { %11669 = vmatprep.subr.bf16.mxu0 %v13896_v49  ;;  %11691 = vmatprep.subr.bf16.mxu1 %v13897_v50  ;;  %v13956_v49 = vld [vmem:[%s17681_s5] sm:$0xff]   ;;  %v13957_v50 = vld [vmem:[%s17681_s5 + $0x8] sm:$0xff]  }
 0x4c1   :  { %11670 = vmatpush3.bf16.msra.mxu0 %v13898_v51  ;;  %v13960_v51 = vld [vmem:[%s17681_s5 + $0x20] sm:$0xff]  }
 0x4c2   :  { %11692 = vmatpush3.bf16.msra.mxu1 %v13899_v52  ;;  %11671 = vmatprep.subr.bf16.mxu0 %v13900_v53  ;;  %v13961_v52 = vld [vmem:[%s17681_s5 + $0x28] sm:$0xff]   ;;  %v13962_v53 = vld [vmem:[%s17681_s5 + $0x30] sm:$0xff]  }
 0x4c3   :  { %11693 = vmatprep.subr.bf16.mxu1 %v13901_v54  ;;  %v13963_v54 = vld [vmem:[%s17681_s5 + $0x38] sm:$0xff]  }
 0x4c5   :  { %11672 = vmatpush3.bf16.msra.mxu0 %v13902_v55  ;;  %v13964_v55 = vld [vmem:[%s17682_s7] sm:$0xff]  }
 0x4c6   :  { %11694 = vmatpush3.bf16.msra.mxu1 %v13903_v56  ;;  %11673 = vmatprep.subr.bf16.mxu0 %v13904_v57  ;;  %v13965_v56 = vld [vmem:[%s17682_s7 + $0x8] sm:$0xff]   ;;  %v13966_v57 = vld [vmem:[%s17682_s7 + $0x10] sm:$0xff]  }
 0x4c7   :  { %11695 = vmatprep.subr.bf16.mxu1 %v13905_v58  ;;  %v13967_v58 = vld [vmem:[%s17682_s7 + $0x18] sm:$0xff]  }
 0x4c9   :  { %11674 = vmatpush3.bf16.msra.mxu0 %v13906_v59 }
 0x4ca   :  { %11696 = vmatpush3.bf16.msra.mxu1 %v13907_v60  ;;  %11675 = vmatprep.subr.bf16.mxu0 %v13908_v61  ;;  %v13968_v61 = vld [vmem:[%s17682_s7 + $0x20] sm:$0xff]  }
 0x4cb   :  { %11697 = vmatprep.subr.bf16.mxu1 %v13909_v62 }
 0x4cd   :  { %11676 = vmatpush3.bf16.msra.mxu0 %v13910_v63 }
 0x4ce   :  { %11698 = vmatpush3.bf16.msra.mxu1 %v13911_v0  ;;  %11677 = vmatprep.subr.bf16.mxu0 %v13912_v1 }
 0x4cf   :  { %11699 = vmatprep.subr.bf16.mxu1 %v13913_v2 }
 0x4d1   :  { %11678 = vmatpush3.bf16.msra.mxu0 %v13914_v3 }
 0x4d2   :  { %11700 = vmatpush3.bf16.msra.mxu1 %v13915_v4  ;;  %11679 = vmatprep.subr.bf16.mxu0 %v13916_v7 }
 0x4d3   :  { %11701 = vmatprep.subr.bf16.mxu1 %v13917_v5 }
 0x4d5   :  { %11680 = vmatpush3.bf16.msra.mxu0 %v13918_v6 }
 0x4d6   :  { %11702 = vmatpush3.bf16.msra.mxu1 %v13919_v8  ;;  %11681 = vmatprep.subr.bf16.mxu0 %v13920_v11  ;;  %v13969_v11 = vld [vmem:[%s17682_s7 + $0x28] sm:$0xff]  }
 0x4d7   :  { %11703 = vmatprep.subr.bf16.mxu1 %v13921_v14 }
 0x4d9   :  { %11682 = vmatpush3.bf16.msra.mxu0 %v13922_v16 }
 0x4da   :  { %11704 = vmatpush3.bf16.msra.mxu1 %v13923_v17  ;;  %11711 = vmatprep.subr.bf16.mxu0 %v13924_v18 }
 0x4db   :  { %11733 = vmatprep.subr.bf16.mxu1 %v13925_v19 }
 0x4dc   :  { %9530 = vmatmul.mubr.bf16.vlgmr.msra.gmra.mrb[24].mxu0 %v17283_v12 }
 0x4dd   :  { %9571 = vmatmul.mubr.bf16.vlgmr.msra.gmra.mrb[24].mxu1 %v17285_v9  ;;  %11712 = vmatpush3.bf16.msra.mxu0 %v13926_v20 }
 0x4de   :  { %9870 = vmatprep.mubr.bf16.mxu0 %v17287_v10  ;;  %11734 = vmatpush3.bf16.msra.mxu1 %v13927_v21  ;;  %v13934_v10 = vld [vmem:[%s17679_s3 + $0x310] sm:$0xff]  }
 0x4df   :  { %9911 = vmatprep.mubr.bf16.mxu1 %v17289_v13  ;;  %11713 = vmatprep.subr.bf16.mxu0 %v13928_v22  ;;  %v13936_v13 = vld [vmem:[%s17679_s3 + $0x358] sm:$0xff]  }
 0x4e0   :  { %11735 = vmatprep.subr.bf16.mxu1 %v13929_v23 }
 0x4e1   :  { %11714 = vmatpush3.bf16.msra.mxu0 %v13930_v24 }
 0x4e2   :  { %11736 = vmatpush3.bf16.msra.mxu1 %v13931_v25  ;;  %11715 = vmatprep.subr.bf16.mxu0 %v13932_v26 }
 0x4e3   :  { %11737 = vmatprep.subr.bf16.mxu1 %v13933_v27 }
 0x4e5   :  { %11716 = vmatpush3.bf16.msra.mxu0 %v13934_v10 }
 0x4e6   :  { %11738 = vmatpush3.bf16.msra.mxu1 %v13935_v28  ;;  %11717 = vmatprep.subr.bf16.mxu0 %v13936_v13 }
 0x4e7   :  { %11739 = vmatprep.subr.bf16.mxu1 %v13937_v29 }
 0x4e9   :  { %11718 = vmatpush3.bf16.msra.mxu0 %v13938_v30 }
 0x4ea   :  { %11740 = vmatpush3.bf16.msra.mxu1 %v13939_v31  ;;  %11719 = vmatprep.subr.bf16.mxu0 %v13940_v32 }
 0x4eb   :  { %11741 = vmatprep.subr.bf16.mxu1 %v13941_v33 }
 0x4ed   :  { %11720 = vmatpush3.bf16.msra.mxu0 %v13942_v34 }
 0x4ee   :  { %11742 = vmatpush3.bf16.msra.mxu1 %v13943_v35  ;;  %11721 = vmatprep.subr.bf16.mxu0 %v13944_v36 }
 0x4ef   :  { %11743 = vmatprep.subr.bf16.mxu1 %v13945_v37 }
 0x4f1   :  { %11722 = vmatpush3.bf16.msra.mxu0 %v13946_v38 }
 0x4f2   :  { %11744 = vmatpush3.bf16.msra.mxu1 %v13947_v39  ;;  %11723 = vmatprep.subr.bf16.mxu0 %v13948_v40 }
 0x4f3   :  { %11745 = vmatprep.subr.bf16.mxu1 %v13949_v41 }
 0x4f5   :  { %11724 = vmatpush3.bf16.msra.mxu0 %v13950_v42 }
 0x4f6   :  { %11746 = vmatpush3.bf16.msra.mxu1 %v13951_v43  ;;  %11725 = vmatprep.subr.bf16.mxu0 %v13952_v44 }
 0x4f7   :  { %11747 = vmatprep.subr.bf16.mxu1 %v13953_v45 }
 0x4f9   :  { %11726 = vmatpush3.bf16.msra.mxu0 %v13954_v46 }
 0x4fa   :  { %11748 = vmatpush3.bf16.msra.mxu1 %v13955_v47  ;;  %11773 = vmatprep.subr.bf16.mxu0 %v13981_v48 }
 0x4fb   :  { %11793 = vmatprep.subr.bf16.mxu1 %v13981_v48 }
 0x4fc   :  { %9871 = vmatmul.mubr.bf16.vlgmr.msra.gmra.mrb[28].mxu0 %v17283_v12  ;;  %v13958_v12 = vld [vmem:[%s17681_s5 + $0x10] sm:$0xff]  }
 0x4fd   :  { %9912 = vmatmul.mubr.bf16.vlgmr.msra.gmra.mrb[28].mxu1 %v17285_v9  ;;  %11774 = vmatpush3.bf16.msra.mxu0 %v13956_v49  ;;  %v13959_v9 = vld [vmem:[%s17681_s5 + $0x18] sm:$0xff]  }
 0x4fe   :  { %11775 = vmatprep.subr.bf16.mxu0 %v13981_v48  ;;  %11789 = vmatprep.mubr.msk.bf16.mxu0 %vm13982_vm0, %v13981_v48 }
 0x4ff   :  { %11809 = vmatprep.mubr.msk.bf16.mxu1 %vm13982_vm0, %v13981_v48  ;;  %11794 = vmatpush3.bf16.msra.mxu1 %v13964_v55 }
 0x500   :  { %11795 = vmatprep.subr.bf16.mxu1 %v13981_v48 }
 0x501   :  { %11776 = vmatpush3.bf16.msra.mxu0 %v13957_v50 }
 0x502   :  { %11777 = vmatprep.subr.bf16.mxu0 %v13981_v48 }
 0x503   :  { %11796 = vmatpush3.bf16.msra.mxu1 %v13965_v56 }
 0x504   :  { %11797 = vmatprep.subr.bf16.mxu1 %v13981_v48 }
 0x505   :  { %11778 = vmatpush3.bf16.msra.mxu0 %v13958_v12 }
 0x506   :  { %11779 = vmatprep.subr.bf16.mxu0 %v13981_v48 }
 0x507   :  { %11798 = vmatpush3.bf16.msra.mxu1 %v13966_v57 }
 0x508   :  { %11799 = vmatprep.subr.bf16.mxu1 %v13981_v48 }
 0x509   :  { %11780 = vmatpush3.bf16.msra.mxu0 %v13959_v9 }
 0x50a   :  { %11781 = vmatprep.subr.bf16.mxu0 %v13981_v48 }
 0x50b   :  { %11800 = vmatpush3.bf16.msra.mxu1 %v13967_v58  ;;  %v11560_v58 = vld [vmem:[%s17683_s4] ss:$0 sm:$0xff] }
 0x50c   :  { %11801 = vmatprep.subr.bf16.mxu1 %v13981_v48 }
 0x50d   :  { %11782 = vmatpush3.bf16.msra.mxu0 %v13960_v51 }
 0x50e   :  { %11783 = vmatprep.subr.bf16.mxu0 %v13981_v48 }
 0x50f   :  { %11802 = vmatpush3.bf16.msra.mxu1 %v13968_v61 }
 0x510   :  { %11803 = vmatprep.subr.bf16.mxu1 %v13981_v48 }
 0x511   :  { %11784 = vmatpush3.bf16.msra.mxu0 %v13961_v52 }
 0x512   :  { %11785 = vmatprep.subr.bf16.mxu0 %v13981_v48 }
 0x513   :  { %11804 = vmatpush3.bf16.msra.mxu1 %v13969_v11 }
 0x514   :  { %11805 = vmatprep.subr.bf16.mxu1 %v13981_v48 }
 0x515   :  { %11786 = vmatpush3.bf16.msra.mxu0 %v13962_v53 }
 0x516   :  { %11787 = vmatprep.subr.bf16.mxu0 %v13981_v48 }
 0x519   :  { %11788 = vmatpush3.bf16.msra.mxu0 %v13963_v54 }
 0x56f   :  { %v11595_v59 = vpop.f32.mrb[16].mxu0  ;;  %v11617_v60 = vpop.f32.mrb[16].mxu1 }
 0x570   :  { %v11596_v62 = vpop.f32.mrb[17].mxu0  ;;  %v11618_v63 = vpop.f32.mrb[17].mxu1 }
 0x571   :  { %v11597_v0 = vadd.f32 %v11596_v62, %v11595_v59  ;;  %v11619_v1 = vadd.f32 %v11618_v63, %v11617_v60  ;;  %v11598_v2 = vpop.f32.mrb[18].mxu0  ;;  %v11620_v3 = vpop.f32.mrb[18].mxu1 }
 0x572   :  { %v11599_v4 = vpop.f32.mrb[19].mxu0  ;;  %v11621_v7 = vpop.f32.mrb[19].mxu1 }
 0x573   :  { %v8893_v5 = vadd.f32 %v11619_v1, %v11597_v0  ;;  %v11600_v6 = vadd.f32 %v11599_v4, %v11598_v2  ;;  %v11622_v8 = vadd.f32 %v11621_v7, %v11620_v3  ;;  %v13970_v3 = vld [vmem:[%s17682_s7 + $0x30] sm:$0xff]   ;;  %v13971_v4 = vld [vmem:[%s17682_s7 + $0x38] sm:$0xff]   ;;  %v11561_v7 = vld [vmem:[%s17684_s6] ss:$0 sm:$0xff] }
 0x574   :  { %11806 = vmatpush3.bf16.msra.mxu1 %v13970_v3 }
 0x575   :  { %v8896_v14 = vadd.f32 %v11622_v8, %v11600_v6  ;;  %11807 = vmatprep.subr.bf16.mxu1 %v13981_v48  ;;  %v10162_v48 = vand.u32 127, %v8521_v15 }
 0x577   :  { %vm10163_vm1 = vcmp.lt.s32.totalorder %v10162_v48, 10 }
 0x578   :  { %11808 = vmatpush3.bf16.msra.mxu1 %v13971_v4 }
 0x58f   :  { %v11639_v16 = vpop.f32.mrb[20].mxu0  ;;  %v11661_v17 = vpop.f32.mrb[20].mxu1 }
 0x590   :  { %v11640_v18 = vpop.f32.mrb[21].mxu0  ;;  %v11662_v19 = vpop.f32.mrb[21].mxu1 }
 0x591   :  { %v11641_v20 = vadd.f32 %v11640_v18, %v11639_v16  ;;  %v11663_v21 = vadd.f32 %v11662_v19, %v11661_v17  ;;  %v11642_v22 = vpop.f32.mrb[22].mxu0  ;;  %v11664_v23 = vpop.f32.mrb[22].mxu1 }
 0x592   :  { %v11643_v24 = vpop.f32.mrb[23].mxu0  ;;  %v11665_v25 = vpop.f32.mrb[23].mxu1 }
 0x593   :  { %v9232_v26 = vadd.f32 %v11663_v21, %v11641_v20  ;;  %v11644_v27 = vadd.f32 %v11643_v24, %v11642_v22  ;;  %v11666_v10 = vadd.f32 %v11665_v25, %v11664_v23  ;;  %v11570_v20 = vld [vmem:[%s17685_s8] ss:$0 sm:$0xff] }
 0x595   :  { %v9238_v28 = vmax.f32 %v8893_v5, %v9232_v26  ;;  %v9235_v13 = vadd.f32 %v11666_v10, %v11644_v27 }
 0x597   :  { %v9239_v29 = vmax.f32 %v8896_v14, %v9235_v13 }
 0x5af   :  { %v11683_v30 = vpop.f32.mrb[24].mxu0 }
 0x5b0   :  { %v11705_v31 = vpop.f32.mrb[24].mxu1  ;;  %v11684_v32 = vpop.f32.mrb[25].mxu0 }
 0x5b1   :  { %v11685_v33 = vadd.f32 %v11684_v32, %v11683_v30  ;;  %v11706_v34 = vpop.f32.mrb[25].mxu1  ;;  %v11686_v35 = vpop.f32.mrb[26].mxu0 }
 0x5b2   :  { %v11707_v36 = vadd.f32 %v11706_v34, %v11705_v31  ;;  %v11708_v37 = vpop.f32.mrb[26].mxu1  ;;  %v11687_v38 = vpop.f32.mrb[27].mxu0 }
 0x5b3   :  { %v11688_v39 = vadd.f32 %v11687_v38, %v11686_v35  ;;  %v11709_v40 = vpop.f32.mrb[27].mxu1 }
 0x5b4   :  { %v9573_v41 = vadd.f32 %v11707_v36, %v11685_v33  ;;  %v11710_v42 = vadd.f32 %v11709_v40, %v11708_v37 }
 0x5b6   :  { %v9579_v43 = vmax.f32 %v9238_v28, %v9573_v41  ;;  %v9576_v44 = vadd.f32 %v11710_v42, %v11688_v39 }
 0x5b8   :  { %v9580_v45 = vmax.f32 %v9239_v29, %v9576_v44 }
 0x5cf   :  { %v11727_v46 = vpop.f32.mrb[28].mxu0 }
 0x5d0   :  { %v11749_v47 = vpop.f32.mrb[28].mxu1  ;;  %v11728_v49 = vpop.f32.mrb[29].mxu0 }
 0x5d1   :  { %v11729_v50 = vadd.f32 %v11728_v49, %v11727_v46  ;;  %v11750_v12 = vpop.f32.mrb[29].mxu1  ;;  %v11730_v9 = vpop.f32.mrb[30].mxu0 }
 0x5d2   :  { %v11751_v51 = vadd.f32 %v11750_v12, %v11749_v47  ;;  %v11752_v52 = vpop.f32.mrb[30].mxu1  ;;  %v11731_v53 = vpop.f32.mrb[31].mxu0 }
 0x5d3   :  { %v11732_v54 = vadd.f32 %v11731_v53, %v11730_v9  ;;  %v11753_v55 = vpop.f32.mrb[31].mxu1 }
 0x5d4   :  { %v9914_v56 = vadd.f32 %v11751_v51, %v11729_v50  ;;  %v11754_v57 = vadd.f32 %v11753_v55, %v11752_v52 }
 0x5d6   :  { %v9920_v59 = vmax.f32 %v9579_v43, %v9914_v56  ;;  %v9917_v60 = vadd.f32 %v11754_v57, %v11732_v54 }
 0x5d8   :  { %v9929_v61 = vadd.f32 %v11560_v58, %v9920_v59  ;;  %v9921_v62 = vmax.f32 %v9580_v45, %v9917_v60 }
 0x5da   :  { %v9930_v63 = vadd.f32 %v11560_v58, %v9921_v62  ;;  %v9931_v0 = vmax.f32 %v9929_v61, 0.0 }
 0x5dc   :  { %v9932_v1 = vmax.f32 %v9930_v63, 0.0 }
 0x5de   :  { %v9933_v2 = vpack.c.bf16 %v9932_v1, %v9931_v0 }
 0x5e0   :  { %11790 = vmatmul.mubr.bf16.vlgmr.msra.gmra.mrb[32].mxu0 %v9933_v2 }
 0x6b3   :  { %v10039_v5 = vpop.f32.mrb[32].mxu0 }
 0x6b4   :  { %v10040_v6 = vadd.f32 %v11561_v7, %v10039_v5  ;;  %v11791_v8 = vpop.f32.mrb[33].mxu0 }
 0x6b5   :  { %v10042_v11 = vpop.f32.mrb[34].mxu0 }
 0x6b6   :  { %v10043_v14 = vadd.f32 %v11561_v7, %v10042_v11  ;;  %v11792_v16 = vpop.f32.mrb[35].mxu0  ;;  %v10046_v17 = vmax.f32 %v10040_v6, 0.0 }
 0x6b8   :  { %v10047_v18 = vmax.f32 %v10043_v14, 0.0 }
 0x6ba   :  { %v10048_v19 = vpack.c.bf16 %v10047_v18, %v10046_v17 }
 0x6bc   :  { %11810 = vmatmul.mubr.bf16.vlgmr.msra.gmra.mrb[32].mxu1 %v10048_v19 }
 0x78f   :  { %v10154_v21 = vpop.f32.mrb[32].mxu1 }
 0x790   :  { %v10155_v22 = vadd.f32 %v11570_v20, %v10154_v21  ;;  %v11811_v23 = vpop.f32.mrb[33].mxu1 }
 0x791   :  { %v10157_v24 = vpop.f32.mrb[34].mxu1 }
 0x792   :  { %v10158_v25 = vadd.f32 %v11570_v20, %v10157_v24  ;;  %v11812_v26 = vpop.f32.mrb[35].mxu1  ;;  %v10164_v27 = vsel %vm10163_vm1, %v10155_v22, -inf }
 0x793   :  { %10166 = vmax.xlane.f32.xlu0 %v10164_v27 }
 0x794   :  { %v10165_v10 = vsel %vm10163_vm1, %v10158_v25, -inf }
 0x797   :  { %10168 = vmax.xlane.f32.xlu0 %v10165_v10 }
 0x820   :  { %v10167_v28 = vpop.xlane.xlu0 %10166 }
 0x821   :  { %v10170_v13 = vsub.f32 %v10155_v22, %v10167_v28 }
 0x823   :  { %v10172_v15 = vmul.f32 1.442695, %v10170_v13 }
 0x824   :  { %v10169_v29 = vpop.xlane.xlu0 %10168 }
 0x825   :  { %13972 = vpow2.f32 %v10172_v15  ;;  %v10171_v30 = vsub.f32 %v10158_v25, %v10169_v29 }
 0x827   :  { %v10174_v31 = vmul.f32 1.442695, %v10171_v30 }
 0x829   :  { %13974 = vpow2.f32 %v10174_v31 }
 0x82f   :  { %v13973_v32 = vpop.eup %13972 }
 0x830   :  { %v10176_v33 = vsel %vm10163_vm1, %v13973_v32, 0.0 }
 0x831   :  { %10178 = vadd.xlane.f32.xlu1 %v10176_v33 }
 0x833   :  { %v13975_v34 = vpop.eup %13974 }
 0x834   :  { %v10177_v35 = vsel %vm10163_vm1, %v13975_v34, 0.0 }
 0x835   :  { %10180 = vadd.xlane.f32.xlu1 %v10177_v35 }
 0x8be   :  { %v10179_v36 = vpop.xlane.xlu1 %10178 }
 0x8bf   :  { %13976 = vlog2.f32 %v10179_v36 }
 0x8c2   :  { %v10181_v37 = vpop.xlane.xlu1 %10180 }
 0x8c3   :  { %13978 = vlog2.f32 %v10181_v37 }
 0x8c9   :  { %v13977_v38 = vpop.eup %13976 }
 0x8ca   :  { %v10183_v39 = vmul.f32 0.6931472, %v13977_v38 }
 0x8cc   :  { %v10186_v40 = vsub.f32 %v10170_v13, %v10183_v39 }
 0x8cd   :  { %v13979_v41 = vpop.eup %13978 }
 0x8ce   :  { %v10188_v42 = vsel %vm10163_vm1, %v10186_v40, 0.0  ;;  %v10185_v43 = vmul.f32 0.6931472, %v13979_v41 }
 0x8cf   :  { %10190 = vst [vmem:[%s17686_s9] sm:$0xff] %v10188_v42 }
 0x8d0   :  { %v10187_v44 = vsub.f32 %v10171_v30, %v10185_v43 }
 0x8d2   :  { %v10189_v45 = vsel %vm10163_vm1, %v10187_v44, 0.0 }
 0x8d3   :  { %10191 = vst [vmem:[%s17686_s9 + $0x8] sm:$0xff] %v10189_v45 }

</bundles_post_ra>
